<compile_context>
chip_gen: v6e
topology: v6e:2x2x1
jax: 0.10.0
libtpu: 0.0.40
codegen_flags: <defaults>
</compile_context>

<pallas_src>
import functools

import jax
import jax.numpy as jnp
from jax import lax
from jax.experimental import pallas as pl
from jax.experimental.pallas import tpu as pltpu


# ---------------------------------------------------------------------------
# Small helpers
# ---------------------------------------------------------------------------
def _round_up(n, m):
    return ((n + m - 1) // m) * m


def _choose_time_chunk(T, cap=32):
    """(timesteps per recurrence grid step, padded sequence length)."""
    if T <= cap:
        return T, T
    # Prefer an exact divisor in (cap/2, cap]; otherwise pad T to whichever
    # chunk size wastes the fewest timesteps (never fall back to tc = 1).
    best_tc, best_pad = cap, (-T) % cap
    for tc in range(cap, cap // 2, -1):
        pad = (-T) % tc
        if pad < best_pad:
            best_tc, best_pad = tc, pad
            if pad == 0:
                break
    return best_tc, T + best_pad


def _choose_tm(M, bytes_per_row, align, budget):
    """Largest M-tile (multiple of `align`, dividing M) whose double-buffered
    streams fit `budget`; keeps the parallel grid >= 2 when possible."""
    best = M
    tm = min(M, 1024)
    tm -= tm % align
    while tm >= align:
        if M % tm == 0 and 2 * tm * bytes_per_row <= budget:
            best = tm
            break
        tm -= align
    if best == M and M >= 2 * align:
        half = M // 2
        half -= half % align
        if half >= align and M % half == 0:
            best = half          # grid >= 2 -> both v7x TensorCores get work
    return best


def _vmem_limit(streamed, resident=()):
    """Scoped-VMEM budget: streamed blocks double buffered, constant-index
    blocks once, +50% headroom, capped at ~80% of physical VMEM."""
    need = 2 * int(sum(streamed)) + int(sum(resident))
    need = (need * 3) // 2 + (4 << 20)
    try:
        phys = int(pltpu.get_tpu_info().vmem_capacity_bytes)
    except Exception:  # pragma: no cover - fallback if query unavailable
        phys = 64 << 20
    cap = (phys * 4) // 5
    floor = min(32 << 20, cap)
    return int(min(max(need, floor), cap))


def _sigmoid(x):
    # Single EUP tanh per element instead of exp + reciprocal.
    return 0.5 * (jnp.tanh(0.5 * x) + 1.0)


def _lstm_cell(g, c, hidden):
    """Packed gate order [i | f | o | g_cand]; all math in f32."""
    s = _sigmoid(g[:, :3 * hidden])            # one contiguous sigmoid pass
    i_g = s[:, 0 * hidden:1 * hidden]
    f_g = s[:, 1 * hidden:2 * hidden]
    o_g = s[:, 2 * hidden:3 * hidden]
    g_g = jnp.tanh(g[:, 3 * hidden:4 * hidden])
    c = f_g * c + i_g * g_g
    h = o_g * jnp.tanh(c)
    return h, c


# ---------------------------------------------------------------------------
# Kernel 1: time-parallel input projection  gates_x = x @ Wih + b  (bf16 out)
# ---------------------------------------------------------------------------
def _input_proj_kernel(x_ref, w_ref, b_ref, o_ref):
    acc = jnp.dot(x_ref[...], w_ref[...], preferred_element_type=jnp.float32)
    o_ref[...] = (acc + b_ref[...]).astype(jnp.bfloat16)


def _input_proj(x_flat, wih, b):
    """x_flat: (T*Bp, Dp) bf16, wih: (Dp, 4Hp) bf16, b: (1, 4Hp) f32."""
    M, Dp = x_flat.shape
    G = wih.shape[1]                                   # 4 * Hp
    tm = _choose_tm(M, bytes_per_row=2 * (Dp + G), align=16,
                    budget=20 << 20)
    vlim = _vmem_limit(streamed=[tm * Dp * 2, tm * G * 2],
                       resident=[Dp * G * 2, G * 4])
    return pl.pallas_call(
        _input_proj_kernel,
        out_shape=jax.ShapeDtypeStruct((M, G), jnp.bfloat16),
        grid=(M // tm,),
        in_specs=[
            pl.BlockSpec((tm, Dp), lambda i: (i, 0)),
            pl.BlockSpec((Dp, G), lambda i: (0, 0)),
            pl.BlockSpec((1, G), lambda i: (0, 0)),
        ],
        out_specs=pl.BlockSpec((tm, G), lambda i: (i, 0)),
        compiler_params=pltpu.CompilerParams(
            dimension_semantics=("parallel",),
            vmem_limit_bytes=vlim,
        ),
    )(x_flat, wih, b)


# ---------------------------------------------------------------------------
# Kernel 2a: chunked recurrence, full sequence output (intermediate layers)
# ---------------------------------------------------------------------------
def _lstm_rec_seq_kernel(gx_ref, whh_ref, seq_ref, h_scr, c_scr,
                         *, tc, b_rows, hidden, t_valid, mask_tail):
    @pl.when(pl.program_id(0) == 0)
    def _init():
        h_scr[...] = jnp.zeros_like(h_scr)
        c_scr[...] = jnp.zeros_like(c_scr)

    t0 = pl.program_id(0) * tc

    def step(t, carry):
        h, c = carry
        r0 = pl.multiple_of(t * b_rows, b_rows)
        g = gx_ref[pl.ds(r0, b_rows), :].astype(jnp.float32) + jnp.dot(
            h.astype(jnp.bfloat16), whh_ref[...],
            preferred_element_type=jnp.float32)
        h_new, c_new = _lstm_cell(g, c, hidden)
        if mask_tail:
            keep = (t0 + t) < t_valid
            h_new = jnp.where(keep, h_new, h)
            c_new = jnp.where(keep, c_new, c)
        seq_ref[pl.ds(r0, b_rows), :] = h_new.astype(jnp.bfloat16)
        return h_new, c_new

    h, c = lax.fori_loop(0, tc, step, (h_scr[...], c_scr[...]), unroll=True)
    h_scr[...] = h
    c_scr[...] = c


def _lstm_recurrence_seq(gx, whh, *, b_rows, tc, t_valid):
    M, G = gx.shape
    Hp = whh.shape[0]
    nchunk = (M // b_rows) // tc
    mask_tail = (M // b_rows) != t_valid
    kern = functools.partial(_lstm_rec_seq_kernel, tc=tc, b_rows=b_rows,
                             hidden=Hp, t_valid=t_valid, mask_tail=mask_tail)
    vlim = _vmem_limit(
        streamed=[tc * b_rows * G * 2, tc * b_rows * Hp * 2],
        resident=[Hp * G * 2, 2 * b_rows * Hp * 4])
    return pl.pallas_call(
        kern,
        out_shape=jax.ShapeDtypeStruct((M, Hp), jnp.bfloat16),
        grid=(nchunk,),
        in_specs=[
            pl.BlockSpec((tc * b_rows, G), lambda i: (i, 0)),
            pl.BlockSpec((Hp, G), lambda i: (0, 0)),
        ],
        out_specs=pl.BlockSpec((tc * b_rows, Hp), lambda i: (i, 0)),
        scratch_shapes=[
            pltpu.VMEM((b_rows, Hp), jnp.float32),
            pltpu.VMEM((b_rows, Hp), jnp.float32),
        ],
        compiler_params=pltpu.CompilerParams(
            dimension_semantics=("arbitrary",),
            vmem_limit_bytes=vlim,
        ),
    )(gx, whh)


# ---------------------------------------------------------------------------
# Kernel 2b: chunked recurrence, last layer -> only h_T, FC fused in
# ---------------------------------------------------------------------------
def _lstm_rec_last_fc_kernel(gx_ref, whh_ref, wfc_ref, bfc_ref, out_ref,
                             h_scr, c_scr, *, tc, b_rows, hidden,
                             t_valid, mask_tail):
    @pl.when(pl.program_id(0) == 0)
    def _init():
        h_scr[...] = jnp.zeros_like(h_scr)
        c_scr[...] = jnp.zeros_like(c_scr)

    t0 = pl.program_id(0) * tc

    def step(t, carry):
        h, c = carry
        r0 = pl.multiple_of(t * b_rows, b_rows)
        g = gx_ref[pl.ds(r0, b_rows), :].astype(jnp.float32) + jnp.dot(
            h.astype(jnp.bfloat16), whh_ref[...],
            preferred_element_type=jnp.float32)
        h_new, c_new = _lstm_cell(g, c, hidden)
        if mask_tail:
            keep = (t0 + t) < t_valid
            h_new = jnp.where(keep, h_new, h)
            c_new = jnp.where(keep, c_new, c)
        return h_new, c_new

    h, c = lax.fori_loop(0, tc, step, (h_scr[...], c_scr[...]), unroll=True)
    h_scr[...] = h
    c_scr[...] = c

    @pl.when(pl.program_id(0) == pl.num_programs(0) - 1)
    def _fc():
        out_ref[...] = (
            jnp.dot(h.astype(jnp.bfloat16), wfc_ref[...],
                    preferred_element_type=jnp.float32)
            + bfc_ref[...]
        )


def _lstm_recurrence_last_fc(gx, whh, wfc, bfc, *, b_rows, tc, t_valid):
    M, G = gx.shape
    Hp = whh.shape[0]
    Op = wfc.shape[1]
    nchunk = (M // b_rows) // tc
    mask_tail = (M // b_rows) != t_valid
    kern = functools.partial(_lstm_rec_last_fc_kernel, tc=tc, b_rows=b_rows,
                             hidden=Hp, t_valid=t_valid, mask_tail=mask_tail)
    vlim = _vmem_limit(
        streamed=[tc * b_rows * G * 2],
        resident=[Hp * G * 2, Hp * Op * 2, Op * 4, b_rows * Op * 4,
                  2 * b_rows * Hp * 4])
    return pl.pallas_call(
        kern,
        out_shape=jax.ShapeDtypeStruct((b_rows, Op), jnp.float32),
        grid=(nchunk,),
        in_specs=[
            pl.BlockSpec((tc * b_rows, G), lambda i: (i, 0)),
            pl.BlockSpec((Hp, G), lambda i: (0, 0)),
            pl.BlockSpec((Hp, Op), lambda i: (0, 0)),
            pl.BlockSpec((1, Op), lambda i: (0, 0)),
        ],
        out_specs=pl.BlockSpec((b_rows, Op), lambda i: (0, 0)),
        scratch_shapes=[
            pltpu.VMEM((b_rows, Hp), jnp.float32),
            pltpu.VMEM((b_rows, Hp), jnp.float32),
        ],
        compiler_params=pltpu.CompilerParams(
            dimension_semantics=("arbitrary",),
            vmem_limit_bytes=vlim,
        ),
    )(gx, whh, wfc, bfc)


# ---------------------------------------------------------------------------
# Forward pass (matches PyTorch: lstm -> last timestep -> fc)
# ---------------------------------------------------------------------------
@functools.partial(jax.jit, static_argnames=("out_dim",))
def lstm_classifier_forward(x, params, *, out_dim):
    """x: (B, T, input_dim) batch-first, like the PyTorch module."""
    B, T, Din = x.shape
    Bp = _round_up(max(B, 8), 16)              # bf16-tile aligned batch rows
    Dp = params["layers"][0][0].shape[0]
    tc, T_pad = _choose_time_chunk(T)

    # batch-first -> padded time-major flat rows (row = t*Bp + b), bf16 stream.
    xt = jnp.transpose(x, (1, 0, 2)).astype(jnp.bfloat16)        # (T, B, Din)
    x_p = jnp.zeros((T_pad, Bp, Dp), jnp.bfloat16).at[:T, :B, :Din].set(xt)
    h = x_p.reshape(T_pad * Bp, Dp)

    n_layers = len(params["layers"])
    out_p = None
    for li, (wih, whh, b) in enumerate(params["layers"]):
        gx = _input_proj(h, wih, b)                     # (T_pad*Bp, 4Hp) bf16
        if li < n_layers - 1:
            h = _lstm_recurrence_seq(gx, whh, b_rows=Bp, tc=tc, t_valid=T)
        else:
            out_p = _lstm_recurrence_last_fc(
                gx, whh, params["w_fc"], params["b_fc"],
                b_rows=Bp, tc=tc, t_valid=T)
    return out_p[:B, :out_dim]


# ---------------------------------------------------------------------------
# Parameters: canonical PyTorch layout + padded/bf16 packing for the kernels
# ---------------------------------------------------------------------------
def init_params(key, input_dim, hidden_dim, num_layers, output_dim):
    """Canonical PyTorch-shaped f32 params, U(-1/sqrt(H), 1/sqrt(H))."""
    k = 1.0 / jnp.sqrt(jnp.float32(hidden_dim))
    layers = []
    for layer in range(num_layers):
        in_dim = input_dim if layer == 0 else hidden_dim
        key, k1, k2, k3, k4 = jax.random.split(key, 5)
        w_ih = jax.random.uniform(k1, (4 * hidden_dim, in_dim), jnp.float32, -k, k)
        w_hh = jax.random.uniform(k2, (4 * hidden_dim, hidden_dim), jnp.float32, -k, k)
        b_ih = jax.random.uniform(k3, (4 * hidden_dim,), jnp.float32, -k, k)
        b_hh = jax.random.uniform(k4, (4 * hidden_dim,), jnp.float32, -k, k)
        layers.append((w_ih, w_hh, b_ih, b_hh))
    key, k5, k6 = jax.random.split(key, 3)
    w_fc = jax.random.uniform(k5, (output_dim, hidden_dim), jnp.float32, -k, k)
    b_fc = jax.random.uniform(k6, (output_dim,), jnp.float32, -k, k)
    return {"layers": layers, "w_fc": w_fc, "b_fc": b_fc}


# PyTorch stacks gates as (i, f, g, o); we pack them as [i | f | o | g] so the
# three sigmoid gates form one contiguous lane block.
_GATE_ORDER = (0, 1, 3, 2)


def _pack_gates_t(w, H, Hp, in_pad):
    """(4H, Din) -> transposed (in_pad, 4Hp), per-gate lane-aligned blocks."""
    Din = w.shape[1]
    out = jnp.zeros((in_pad, 4 * Hp), jnp.float32)
    for dst, src in enumerate(_GATE_ORDER):
        out = out.at[:Din, dst * Hp:dst * Hp + H].set(w[src * H:(src + 1) * H, :].T)
    return out


def _pack_gates_bias(b, H, Hp):
    out = jnp.zeros((1, 4 * Hp), jnp.float32)
    for dst, src in enumerate(_GATE_ORDER):
        out = out.at[0, dst * Hp:dst * Hp + H].set(b[src * H:(src + 1) * H])
    return out


def pack_params(canon, hidden_dim):
    H = hidden_dim
    Hp = _round_up(H, 128)
    layers_p = []
    for li, (w_ih, w_hh, b_ih, b_hh) in enumerate(canon["layers"]):
        din = w_ih.shape[1]
        in_pad = _round_up(din, 8) if li == 0 else Hp
        wih_p = _pack_gates_t(w_ih, H, Hp, in_pad).astype(jnp.bfloat16)
        whh_p = _pack_gates_t(w_hh, H, Hp, Hp).astype(jnp.bfloat16)
        b_p = _pack_gates_bias(b_ih + b_hh, H, Hp)              # f32
        layers_p.append((wih_p, whh_p, b_p))
    O = canon["w_fc"].shape[0]
    Op = _round_up(O, 128)
    wfc_p = (jnp.zeros((Hp, Op), jnp.float32)
             .at[:H, :O].set(canon["w_fc"].T).astype(jnp.bfloat16))
    bfc_p = jnp.zeros((1, Op), jnp.float32).at[0, :O].set(canon["b_fc"])
    return {"layers": layers_p, "w_fc": wfc_p, "b_fc": bfc_p}


# ---------------------------------------------------------------------------
# Pure-JAX reference (mirrors the kernel's bf16 HBM streams + f32 gate math)
# ---------------------------------------------------------------------------
def ref_forward(x, canon):
    B, T, _ = x.shape
    seq = x.astype(jnp.bfloat16)
    last_h = None
    for (w_ih, w_hh, b_ih, b_hh) in canon["layers"]:
        H = w_hh.shape[1]
        wih_t = w_ih.T.astype(jnp.bfloat16)
        whh_t = w_hh.T.astype(jnp.bfloat16)
        b = (b_ih + b_hh)[None, None, :]
        gx_all = (jnp.einsum("btd,dg->btg", seq, wih_t,
                             preferred_element_type=jnp.float32) + b
                  ).astype(jnp.bfloat16)
        h = jnp.zeros((B, H), jnp.float32)
        c = jnp.zeros((B, H), jnp.float32)
        outs = []
        for t in range(T):
            g = gx_all[:, t].astype(jnp.float32) + jnp.dot(
                h.astype(jnp.bfloat16), whh_t, preferred_element_type=jnp.float32)
            i_g = jax.nn.sigmoid(g[:, :H])
            f_g = jax.nn.sigmoid(g[:, H:2 * H])
            g_g = jnp.tanh(g[:, 2 * H:3 * H])
            o_g = jax.nn.sigmoid(g[:, 3 * H:])
            c = f_g * c + i_g * g_g
            h = o_g * jnp.tanh(c)
            outs.append(h)
        seq = jnp.stack(outs, axis=1).astype(jnp.bfloat16)
        last_h = h
    wfc_t = canon["w_fc"].T.astype(jnp.bfloat16)
    return (jnp.dot(last_h.astype(jnp.bfloat16), wfc_t,
                    preferred_element_type=jnp.float32)
            + canon["b_fc"][None, :])


if __name__ == "__main__":
    B, T = 2, 8
    input_dim, hidden_dim, num_layers, output_dim = 16, 32, 2, 4

    key = jax.random.PRNGKey(0)
    key, kx, kp = jax.random.split(key, 3)
    x = jax.random.normal(kx, (B, T, input_dim), jnp.float32)

    canon = init_params(kp, input_dim, hidden_dim, num_layers, output_dim)
    kparams = pack_params(canon, hidden_dim)

    out = lstm_classifier_forward(x, kparams, out_dim=output_dim)
    out = jax.block_until_ready(out)

    ref = ref_forward(x, canon)
    assert out.shape == (B, output_dim), out.shape
    assert jnp.allclose(out, ref, atol=1e-2, rtol=1e-2), (out, ref)

    print("KERNEL_OK")
</pallas_src>

<mosaic_0001>
module attributes {stable_mosaic.version = 11 : i64} {
  func.func @_input_proj_kernel(%arg0: i32, %arg1: memref<64x16xbf16, #tpu.memory_space<vmem>>, %arg2: memref<16x512xbf16, #tpu.memory_space<vmem>>, %arg3: memref<1x512xf32, #tpu.memory_space<vmem>>, %arg4: memref<64x512xbf16, #tpu.memory_space<vmem>>) attributes {dimension_semantics = [#tpu.dimension_semantics<parallel>], iteration_bounds = array<i64: 2>, scalar_prefetch = 0 : i64, scratch_operands = 0 : i64, tpu.core_type = #tpu.core_type<tc>, window_params = [{transform_indices = @transform_0, window_bounds = array<i64: 64, 16>}, {pipeline_mode = #tpu.pipeline_mode<synchronous>, transform_indices = @transform_1, window_bounds = array<i64: 16, 512>}, {pipeline_mode = #tpu.pipeline_mode<synchronous>, transform_indices = @transform_2, window_bounds = array<i64: 1, 512>}, {transform_indices = @transform_3, window_bounds = array<i64: 64, 512>}]} {
    %c0 = arith.constant 0 : index
    %c0_0 = arith.constant 0 : index
    %0 = vector.load %arg1[%c0, %c0_0] : memref<64x16xbf16, #tpu.memory_space<vmem>>, vector<64x16xbf16>
    %c0_1 = arith.constant 0 : index
    %c0_2 = arith.constant 0 : index
    %1 = vector.load %arg2[%c0_1, %c0_2] : memref<16x512xbf16, #tpu.memory_space<vmem>>, vector<16x512xbf16>
    %cst = arith.constant dense<0.000000e+00> : vector<64x512xf32>
    %2 = tpu.matmul %0, %1, %cst {dimension_numbers = #tpu.dot_dimension_numbers<[1], [0], [0], [1], [0, 0, 1, 1], [], []>} : vector<64x16xbf16>, vector<16x512xbf16>, vector<64x512xf32> -> vector<64x512xf32>
    %c0_3 = arith.constant 0 : index
    %c0_4 = arith.constant 0 : index
    %3 = vector.load %arg3[%c0_3, %c0_4] : memref<1x512xf32, #tpu.memory_space<vmem>>, vector<1x512xf32>
    %4 = vector.broadcast %3 : vector<1x512xf32> to vector<64x512xf32>
    %5 = arith.addf %2, %4 : vector<64x512xf32>
    %6 = arith.truncf %5 : vector<64x512xf32> to vector<64x512xbf16>
    %c0_5 = arith.constant 0 : index
    %c0_6 = arith.constant 0 : index
    %7 = vector.load %arg4[%c0_5, %c0_6] : memref<64x512xbf16, #tpu.memory_space<vmem>>, vector<64x512xbf16>
    tpu.vector_store %arg4[%c0_5, %c0_6], %6 {strides = array<i32>} : memref<64x512xbf16, #tpu.memory_space<vmem>>, vector<64x512xbf16>,
    return
  }
  func.func @transform_0(%arg0: i32) -> (i32, i32) {
    %c0_i32 = arith.constant 0 : i32
    %c0_i32_0 = arith.constant 0 : i32
    return %arg0, %c0_i32 : i32, i32
  }
  func.func @transform_1(%arg0: i32) -> (i32, i32) {
    %c0_i32 = arith.constant 0 : i32
    %c0_i32_0 = arith.constant 0 : i32
    %c0_i32_1 = arith.constant 0 : i32
    return %c0_i32, %c0_i32_0 : i32, i32
  }
  func.func @transform_2(%arg0: i32) -> (i32, i32) {
    %c0_i32 = arith.constant 0 : i32
    %c0_i32_0 = arith.constant 0 : i32
    %c0_i32_1 = arith.constant 0 : i32
    return %c0_i32, %c0_i32_0 : i32, i32
  }
  func.func @transform_3(%arg0: i32) -> (i32, i32) {
    %c0_i32 = arith.constant 0 : i32
    %c0_i32_0 = arith.constant 0 : i32
    return %arg0, %c0_i32 : i32, i32
  }
}

module attributes {stable_mosaic.version = 11 : i64} {
  func.func @_input_proj_kernel(%arg0: i32, %arg1: memref<64x128xbf16, #tpu.memory_space<vmem>>, %arg2: memref<128x512xbf16, #tpu.memory_space<vmem>>, %arg3: memref<1x512xf32, #tpu.memory_space<vmem>>, %arg4: memref<64x512xbf16, #tpu.memory_space<vmem>>) attributes {dimension_semantics = [#tpu.dimension_semantics<parallel>], iteration_bounds = array<i64: 2>, scalar_prefetch = 0 : i64, scratch_operands = 0 : i64, tpu.core_type = #tpu.core_type<tc>, window_params = [{transform_indices = @transform_0, window_bounds = array<i64: 64, 128>}, {pipeline_mode = #tpu.pipeline_mode<synchronous>, transform_indices = @transform_1, window_bounds = array<i64: 128, 512>}, {pipeline_mode = #tpu.pipeline_mode<synchronous>, transform_indices = @transform_2, window_bounds = array<i64: 1, 512>}, {transform_indices = @transform_3, window_bounds = array<i64: 64, 512>}]} {
    %c0 = arith.constant 0 : index
    %c0_0 = arith.constant 0 : index
    %0 = vector.load %arg1[%c0, %c0_0] : memref<64x128xbf16, #tpu.memory_space<vmem>>, vector<64x128xbf16>
    %c0_1 = arith.constant 0 : index
    %c0_2 = arith.constant 0 : index
    %1 = vector.load %arg2[%c0_1, %c0_2] : memref<128x512xbf16, #tpu.memory_space<vmem>>, vector<128x512xbf16>
    %cst = arith.constant dense<0.000000e+00> : vector<64x512xf32>
    %2 = tpu.matmul %0, %1, %cst {dimension_numbers = #tpu.dot_dimension_numbers<[1], [0], [0], [1], [0, 0, 1, 1], [], []>} : vector<64x128xbf16>, vector<128x512xbf16>, vector<64x512xf32> -> vector<64x512xf32>
    %c0_3 = arith.constant 0 : index
    %c0_4 = arith.constant 0 : index
    %3 = vector.load %arg3[%c0_3, %c0_4] : memref<1x512xf32, #tpu.memory_space<vmem>>, vector<1x512xf32>
    %4 = vector.broadcast %3 : vector<1x512xf32> to vector<64x512xf32>
    %5 = arith.addf %2, %4 : vector<64x512xf32>
    %6 = arith.truncf %5 : vector<64x512xf32> to vector<64x512xbf16>
    %c0_5 = arith.constant 0 : index
    %c0_6 = arith.constant 0 : index
    %7 = vector.load %arg4[%c0_5, %c0_6] : memref<64x512xbf16, #tpu.memory_space<vmem>>, vector<64x512xbf16>
    tpu.vector_store %arg4[%c0_5, %c0_6], %6 {strides = array<i32>} : memref<64x512xbf16, #tpu.memory_space<vmem>>, vector<64x512xbf16>,
    return
  }
  func.func @transform_0(%arg0: i32) -> (i32, i32) {
    %c0_i32 = arith.constant 0 : i32
    %c0_i32_0 = arith.constant 0 : i32
    return %arg0, %c0_i32 : i32, i32
  }
  func.func @transform_1(%arg0: i32) -> (i32, i32) {
    %c0_i32 = arith.constant 0 : i32
    %c0_i32_0 = arith.constant 0 : i32
    %c0_i32_1 = arith.constant 0 : i32
    return %c0_i32, %c0_i32_0 : i32, i32
  }
  func.func @transform_2(%arg0: i32) -> (i32, i32) {
    %c0_i32 = arith.constant 0 : i32
    %c0_i32_0 = arith.constant 0 : i32
    %c0_i32_1 = arith.constant 0 : i32
    return %c0_i32, %c0_i32_0 : i32, i32
  }
  func.func @transform_3(%arg0: i32) -> (i32, i32) {
    %c0_i32 = arith.constant 0 : i32
    %c0_i32_0 = arith.constant 0 : i32
    return %arg0, %c0_i32 : i32, i32
  }
}

module attributes {stable_mosaic.version = 11 : i64} {
  func.func @_lstm_rec_seq_kernel(%arg0: i32, %arg1: memref<128x512xbf16, #tpu.memory_space<vmem>>, %arg2: memref<128x512xbf16, #tpu.memory_space<vmem>>, %arg3: memref<128x128xbf16, #tpu.memory_space<vmem>>, %arg4: memref<16x128xf32, #tpu.memory_space<vmem>>, %arg5: memref<16x128xf32, #tpu.memory_space<vmem>>) attributes {dimension_semantics = [#tpu.dimension_semantics<arbitrary>], iteration_bounds = array<i64: 1>, scalar_prefetch = 0 : i64, scratch_operands = 2 : i64, tpu.core_type = #tpu.core_type<tc>, window_params = [{transform_indices = @transform_0, window_bounds = array<i64: 128, 512>}, {pipeline_mode = #tpu.pipeline_mode<synchronous>, transform_indices = @transform_1, window_bounds = array<i64: 128, 512>}, {transform_indices = @transform_2, window_bounds = array<i64: 128, 128>}]} {
    %c0_i32 = arith.constant 0 : i32
    %0 = arith.cmpi eq, %arg0, %c0_i32 : i32
    %1 = arith.extui %0 : i1 to i32
    %c0_i32_0 = arith.constant 0 : i32
    %2 = arith.cmpi ne, %1, %c0_i32_0 : i32
    scf.if %2 {
      %cst_79 = arith.constant 0.000000e+00 : f32
      %247 = vector.broadcast %cst_79 : f32 to vector<16x128xf32>
      %c0_80 = arith.constant 0 : index
      %c0_81 = arith.constant 0 : index
      %248 = vector.load %arg4[%c0_80, %c0_81] : memref<16x128xf32, #tpu.memory_space<vmem>>, vector<16x128xf32>
      tpu.vector_store %arg4[%c0_80, %c0_81], %247 {strides = array<i32>} : memref<16x128xf32, #tpu.memory_space<vmem>>, vector<16x128xf32>,
      %cst_82 = arith.constant 0.000000e+00 : f32
      %249 = vector.broadcast %cst_82 : f32 to vector<16x128xf32>
      %c0_83 = arith.constant 0 : index
      %c0_84 = arith.constant 0 : index
      %250 = vector.load %arg5[%c0_83, %c0_84] : memref<16x128xf32, #tpu.memory_space<vmem>>, vector<16x128xf32>
      tpu.vector_store %arg5[%c0_83, %c0_84], %249 {strides = array<i32>} : memref<16x128xf32, #tpu.memory_space<vmem>>, vector<16x128xf32>,
    } else {
    }
    %c0 = arith.constant 0 : index
    %c0_1 = arith.constant 0 : index
    %3 = vector.load %arg4[%c0, %c0_1] : memref<16x128xf32, #tpu.memory_space<vmem>>, vector<16x128xf32>
    %c0_2 = arith.constant 0 : index
    %c0_3 = arith.constant 0 : index
    %4 = vector.load %arg5[%c0_2, %c0_3] : memref<16x128xf32, #tpu.memory_space<vmem>>, vector<16x128xf32>
    %c0_i32_4 = arith.constant 0 : i32
    %c16_i32 = arith.constant 16 : i32
    %5 = arith.muli %c0_i32_4, %c16_i32 : i32
    %6 = tpu.assume_multiple %5, 16 : i32
    %7 = arith.index_cast %6 : i32 to index
    %c0_5 = arith.constant 0 : index
    %8 = vector.load %arg1[%7, %c0_5] : memref<128x512xbf16, #tpu.memory_space<vmem>>, vector<16x512xbf16>
    %9 = arith.extf %8 : vector<16x512xbf16> to vector<16x512xf32>
    %10 = arith.truncf %3 : vector<16x128xf32> to vector<16x128xbf16>
    %c0_6 = arith.constant 0 : index
    %c0_7 = arith.constant 0 : index
    %11 = vector.load %arg2[%c0_6, %c0_7] : memref<128x512xbf16, #tpu.memory_space<vmem>>, vector<128x512xbf16>
    %cst = arith.constant dense<0.000000e+00> : vector<16x512xf32>
    %12 = tpu.matmul %10, %11, %cst {dimension_numbers = #tpu.dot_dimension_numbers<[1], [0], [0], [1], [0, 0, 1, 1], [], []>} : vector<16x128xbf16>, vector<128x512xbf16>, vector<16x512xf32> -> vector<16x512xf32>
    %13 = arith.addf %9, %12 : vector<16x512xf32>
    %14 = vector.extract_strided_slice %13 {offsets = [0, 0], sizes = [16, 384], strides = [1, 1]} : vector<16x512xf32> to vector<16x384xf32>
    %cst_8 = arith.constant 5.000000e-01 : f32
    %15 = vector.broadcast %cst_8 : f32 to vector<16x384xf32>
    %16 = arith.mulf %15, %14 : vector<16x384xf32>
    %17 = math.tanh %16 : vector<16x384xf32>
    %cst_9 = arith.constant 1.000000e+00 : f32
    %18 = vector.broadcast %cst_9 : f32 to vector<16x384xf32>
    %19 = arith.addf %17, %18 : vector<16x384xf32>
    %cst_10 = arith.constant 5.000000e-01 : f32
    %20 = vector.broadcast %cst_10 : f32 to vector<16x384xf32>
    %21 = arith.mulf %20, %19 : vector<16x384xf32>
    %22 = vector.extract_strided_slice %21 {offsets = [0, 0], sizes = [16, 128], strides = [1, 1]} : vector<16x384xf32> to vector<16x128xf32>
    %23 = vector.extract_strided_slice %21 {offsets = [0, 128], sizes = [16, 128], strides = [1, 1]} : vector<16x384xf32> to vector<16x128xf32>
    %24 = vector.extract_strided_slice %21 {offsets = [0, 256], sizes = [16, 128], strides = [1, 1]} : vector<16x384xf32> to vector<16x128xf32>
    %25 = vector.extract_strided_slice %13 {offsets = [0, 384], sizes = [16, 128], strides = [1, 1]} : vector<16x512xf32> to vector<16x128xf32>
    %26 = math.tanh %25 : vector<16x128xf32>
    %27 = arith.mulf %23, %4 : vector<16x128xf32>
    %28 = arith.mulf %22, %26 : vector<16x128xf32>
    %29 = arith.addf %27, %28 : vector<16x128xf32>
    %30 = math.tanh %29 : vector<16x128xf32>
    %31 = arith.mulf %24, %30 : vector<16x128xf32>
    %32 = arith.truncf %31 : vector<16x128xf32> to vector<16x128xbf16>
    %33 = arith.index_cast %6 : i32 to index
    %c0_11 = arith.constant 0 : index
    %34 = vector.load %arg3[%33, %c0_11] : memref<128x128xbf16, #tpu.memory_space<vmem>>, vector<16x128xbf16>
    tpu.vector_store %arg3[%33, %c0_11], %32 {strides = array<i32>} : memref<128x128xbf16, #tpu.memory_space<vmem>>, vector<16x128xbf16>,
    %c1_i32 = arith.constant 1 : i32
    %c16_i32_12 = arith.constant 16 : i32
    %35 = arith.muli %c1_i32, %c16_i32_12 : i32
    %36 = tpu.assume_multiple %35, 16 : i32
    %37 = arith.index_cast %36 : i32 to index
    %c0_13 = arith.constant 0 : index
    %38 = vector.load %arg1[%37, %c0_13] : memref<128x512xbf16, #tpu.memory_space<vmem>>, vector<16x512xbf16>
    %39 = arith.extf %38 : vector<16x512xbf16> to vector<16x512xf32>
    %40 = arith.truncf %31 : vector<16x128xf32> to vector<16x128xbf16>
    %c0_14 = arith.constant 0 : index
    %c0_15 = arith.constant 0 : index
    %41 = vector.load %arg2[%c0_14, %c0_15] : memref<128x512xbf16, #tpu.memory_space<vmem>>, vector<128x512xbf16>
    %cst_16 = arith.constant dense<0.000000e+00> : vector<16x512xf32>
    %42 = tpu.matmul %40, %41, %cst_16 {dimension_numbers = #tpu.dot_dimension_numbers<[1], [0], [0], [1], [0, 0, 1, 1], [], []>} : vector<16x128xbf16>, vector<128x512xbf16>, vector<16x512xf32> -> vector<16x512xf32>
    %43 = arith.addf %39, %42 : vector<16x512xf32>
    %44 = vector.extract_strided_slice %43 {offsets = [0, 0], sizes = [16, 384], strides = [1, 1]} : vector<16x512xf32> to vector<16x384xf32>
    %cst_17 = arith.constant 5.000000e-01 : f32
    %45 = vector.broadcast %cst_17 : f32 to vector<16x384xf32>
    %46 = arith.mulf %45, %44 : vector<16x384xf32>
    %47 = math.tanh %46 : vector<16x384xf32>
    %cst_18 = arith.constant 1.000000e+00 : f32
    %48 = vector.broadcast %cst_18 : f32 to vector<16x384xf32>
    %49 = arith.addf %47, %48 : vector<16x384xf32>
    %cst_19 = arith.constant 5.000000e-01 : f32
    %50 = vector.broadcast %cst_19 : f32 to vector<16x384xf32>
    %51 = arith.mulf %50, %49 : vector<16x384xf32>
    %52 = vector.extract_strided_slice %51 {offsets = [0, 0], sizes = [16, 128], strides = [1, 1]} : vector<16x384xf32> to vector<16x128xf32>
    %53 = vector.extract_strided_slice %51 {offsets = [0, 128], sizes = [16, 128], strides = [1, 1]} : vector<16x384xf32> to vector<16x128xf32>
    %54 = vector.extract_strided_slice %51 {offsets = [0, 256], sizes = [16, 128], strides = [1, 1]} : vector<16x384xf32> to vector<16x128xf32>
    %55 = vector.extract_strided_slice %43 {offsets = [0, 384], sizes = [16, 128], strides = [1, 1]} : vector<16x512xf32> to vector<16x128xf32>
    %56 = math.tanh %55 : vector<16x128xf32>
    %57 = arith.mulf %53, %29 : vector<16x128xf32>
    %58 = arith.mulf %52, %56 : vector<16x128xf32>
    %59 = arith.addf %57, %58 : vector<16x128xf32>
    %60 = math.tanh %59 : vector<16x128xf32>
    %61 = arith.mulf %54, %60 : vector<16x128xf32>
    %62 = arith.truncf %61 : vector<16x128xf32> to vector<16x128xbf16>
    %63 = arith.index_cast %36 : i32 to index
    %c0_20 = arith.constant 0 : index
    %64 = vector.load %arg3[%63, %c0_20] : memref<128x128xbf16, #tpu.memory_space<vmem>>, vector<16x128xbf16>
    tpu.vector_store %arg3[%63, %c0_20], %62 {strides = array<i32>} : memref<128x128xbf16, #tpu.memory_space<vmem>>, vector<16x128xbf16>,
    %c2_i32 = arith.constant 2 : i32
    %c16_i32_21 = arith.constant 16 : i32
    %65 = arith.muli %c2_i32, %c16_i32_21 : i32
    %66 = tpu.assume_multiple %65, 16 : i32
    %67 = arith.index_cast %66 : i32 to index
    %c0_22 = arith.constant 0 : index
    %68 = vector.load %arg1[%67, %c0_22] : memref<128x512xbf16, #tpu.memory_space<vmem>>, vector<16x512xbf16>
    %69 = arith.extf %68 : vector<16x512xbf16> to vector<16x512xf32>
    %70 = arith.truncf %61 : vector<16x128xf32> to vector<16x128xbf16>
    %c0_23 = arith.constant 0 : index
    %c0_24 = arith.constant 0 : index
    %71 = vector.load %arg2[%c0_23, %c0_24] : memref<128x512xbf16, #tpu.memory_space<vmem>>, vector<128x512xbf16>
    %cst_25 = arith.constant dense<0.000000e+00> : vector<16x512xf32>
    %72 = tpu.matmul %70, %71, %cst_25 {dimension_numbers = #tpu.dot_dimension_numbers<[1], [0], [0], [1], [0, 0, 1, 1], [], []>} : vector<16x128xbf16>, vector<128x512xbf16>, vector<16x512xf32> -> vector<16x512xf32>
    %73 = arith.addf %69, %72 : vector<16x512xf32>
    %74 = vector.extract_strided_slice %73 {offsets = [0, 0], sizes = [16, 384], strides = [1, 1]} : vector<16x512xf32> to vector<16x384xf32>
    %cst_26 = arith.constant 5.000000e-01 : f32
    %75 = vector.broadcast %cst_26 : f32 to vector<16x384xf32>
    %76 = arith.mulf %75, %74 : vector<16x384xf32>
    %77 = math.tanh %76 : vector<16x384xf32>
    %cst_27 = arith.constant 1.000000e+00 : f32
    %78 = vector.broadcast %cst_27 : f32 to vector<16x384xf32>
    %79 = arith.addf %77, %78 : vector<16x384xf32>
    %cst_28 = arith.constant 5.000000e-01 : f32
    %80 = vector.broadcast %cst_28 : f32 to vector<16x384xf32>
    %81 = arith.mulf %80, %79 : vector<16x384xf32>
    %82 = vector.extract_strided_slice %81 {offsets = [0, 0], sizes = [16, 128], strides = [1, 1]} : vector<16x384xf32> to vector<16x128xf32>
    %83 = vector.extract_strided_slice %81 {offsets = [0, 128], sizes = [16, 128], strides = [1, 1]} : vector<16x384xf32> to vector<16x128xf32>
    %84 = vector.extract_strided_slice %81 {offsets = [0, 256], sizes = [16, 128], strides = [1, 1]} : vector<16x384xf32> to vector<16x128xf32>
    %85 = vector.extract_strided_slice %73 {offsets = [0, 384], sizes = [16, 128], strides = [1, 1]} : vector<16x512xf32> to vector<16x128xf32>
    %86 = math.tanh %85 : vector<16x128xf32>
    %87 = arith.mulf %83, %59 : vector<16x128xf32>
    %88 = arith.mulf %82, %86 : vector<16x128xf32>
    %89 = arith.addf %87, %88 : vector<16x128xf32>
    %90 = math.tanh %89 : vector<16x128xf32>
    %91 = arith.mulf %84, %90 : vector<16x128xf32>
    %92 = arith.truncf %91 : vector<16x128xf32> to vector<16x128xbf16>
    %93 = arith.index_cast %66 : i32 to index
    %c0_29 = arith.constant 0 : index
    %94 = vector.load %arg3[%93, %c0_29] : memref<128x128xbf16, #tpu.memory_space<vmem>>, vector<16x128xbf16>
    tpu.vector_store %arg3[%93, %c0_29], %92 {strides = array<i32>} : memref<128x128xbf16, #tpu.memory_space<vmem>>, vector<16x128xbf16>,
    %c3_i32 = arith.constant 3 : i32
    %c16_i32_30 = arith.constant 16 : i32
    %95 = arith.muli %c3_i32, %c16_i32_30 : i32
    %96 = tpu.assume_multiple %95, 16 : i32
    %97 = arith.index_cast %96 : i32 to index
    %c0_31 = arith.constant 0 : index
    %98 = vector.load %arg1[%97, %c0_31] : memref<128x512xbf16, #tpu.memory_space<vmem>>, vector<16x512xbf16>
    %99 = arith.extf %98 : vector<16x512xbf16> to vector<16x512xf32>
    %100 = arith.truncf %91 : vector<16x128xf32> to vector<16x128xbf16>
    %c0_32 = arith.constant 0 : index
    %c0_33 = arith.constant 0 : index
    %101 = vector.load %arg2[%c0_32, %c0_33] : memref<128x512xbf16, #tpu.memory_space<vmem>>, vector<128x512xbf16>
    %cst_34 = arith.constant dense<0.000000e+00> : vector<16x512xf32>
    %102 = tpu.matmul %100, %101, %cst_34 {dimension_numbers = #tpu.dot_dimension_numbers<[1], [0], [0], [1], [0, 0, 1, 1], [], []>} : vector<16x128xbf16>, vector<128x512xbf16>, vector<16x512xf32> -> vector<16x512xf32>
    %103 = arith.addf %99, %102 : vector<16x512xf32>
    %104 = vector.extract_strided_slice %103 {offsets = [0, 0], sizes = [16, 384], strides = [1, 1]} : vector<16x512xf32> to vector<16x384xf32>
    %cst_35 = arith.constant 5.000000e-01 : f32
    %105 = vector.broadcast %cst_35 : f32 to vector<16x384xf32>
    %106 = arith.mulf %105, %104 : vector<16x384xf32>
    %107 = math.tanh %106 : vector<16x384xf32>
    %cst_36 = arith.constant 1.000000e+00 : f32
    %108 = vector.broadcast %cst_36 : f32 to vector<16x384xf32>
    %109 = arith.addf %107, %108 : vector<16x384xf32>
    %cst_37 = arith.constant 5.000000e-01 : f32
    %110 = vector.broadcast %cst_37 : f32 to vector<16x384xf32>
    %111 = arith.mulf %110, %109 : vector<16x384xf32>
    %112 = vector.extract_strided_slice %111 {offsets = [0, 0], sizes = [16, 128], strides = [1, 1]} : vector<16x384xf32> to vector<16x128xf32>
    %113 = vector.extract_strided_slice %111 {offsets = [0, 128], sizes = [16, 128], strides = [1, 1]} : vector<16x384xf32> to vector<16x128xf32>
    %114 = vector.extract_strided_slice %111 {offsets = [0, 256], sizes = [16, 128], strides = [1, 1]} : vector<16x384xf32> to vector<16x128xf32>
    %115 = vector.extract_strided_slice %103 {offsets = [0, 384], sizes = [16, 128], strides = [1, 1]} : vector<16x512xf32> to vector<16x128xf32>
    %116 = math.tanh %115 : vector<16x128xf32>
    %117 = arith.mulf %113, %89 : vector<16x128xf32>
    %118 = arith.mulf %112, %116 : vector<16x128xf32>
    %119 = arith.addf %117, %118 : vector<16x128xf32>
    %120 = math.tanh %119 : vector<16x128xf32>
    %121 = arith.mulf %114, %120 : vector<16x128xf32>
    %122 = arith.truncf %121 : vector<16x128xf32> to vector<16x128xbf16>
    %123 = arith.index_cast %96 : i32 to index
    %c0_38 = arith.constant 0 : index
    %124 = vector.load %arg3[%123, %c0_38] : memref<128x128xbf16, #tpu.memory_space<vmem>>, vector<16x128xbf16>
    tpu.vector_store %arg3[%123, %c0_38], %122 {strides = array<i32>} : memref<128x128xbf16, #tpu.memory_space<vmem>>, vector<16x128xbf16>,
    %c4_i32 = arith.constant 4 : i32
    %c16_i32_39 = arith.constant 16 : i32
    %125 = arith.muli %c4_i32, %c16_i32_39 : i32
    %126 = tpu.assume_multiple %125, 16 : i32
    %127 = arith.index_cast %126 : i32 to index
    %c0_40 = arith.constant 0 : index
    %128 = vector.load %arg1[%127, %c0_40] : memref<128x512xbf16, #tpu.memory_space<vmem>>, vector<16x512xbf16>
    %129 = arith.extf %128 : vector<16x512xbf16> to vector<16x512xf32>
    %130 = arith.truncf %121 : vector<16x128xf32> to vector<16x128xbf16>
    %c0_41 = arith.constant 0 : index
    %c0_42 = arith.constant 0 : index
    %131 = vector.load %arg2[%c0_41, %c0_42] : memref<128x512xbf16, #tpu.memory_space<vmem>>, vector<128x512xbf16>
    %cst_43 = arith.constant dense<0.000000e+00> : vector<16x512xf32>
    %132 = tpu.matmul %130, %131, %cst_43 {dimension_numbers = #tpu.dot_dimension_numbers<[1], [0], [0], [1], [0, 0, 1, 1], [], []>} : vector<16x128xbf16>, vector<128x512xbf16>, vector<16x512xf32> -> vector<16x512xf32>
    %133 = arith.addf %129, %132 : vector<16x512xf32>
    %134 = vector.extract_strided_slice %133 {offsets = [0, 0], sizes = [16, 384], strides = [1, 1]} : vector<16x512xf32> to vector<16x384xf32>
    %cst_44 = arith.constant 5.000000e-01 : f32
    %135 = vector.broadcast %cst_44 : f32 to vector<16x384xf32>
    %136 = arith.mulf %135, %134 : vector<16x384xf32>
    %137 = math.tanh %136 : vector<16x384xf32>
    %cst_45 = arith.constant 1.000000e+00 : f32
    %138 = vector.broadcast %cst_45 : f32 to vector<16x384xf32>
    %139 = arith.addf %137, %138 : vector<16x384xf32>
    %cst_46 = arith.constant 5.000000e-01 : f32
    %140 = vector.broadcast %cst_46 : f32 to vector<16x384xf32>
    %141 = arith.mulf %140, %139 : vector<16x384xf32>
    %142 = vector.extract_strided_slice %141 {offsets = [0, 0], sizes = [16, 128], strides = [1, 1]} : vector<16x384xf32> to vector<16x128xf32>
    %143 = vector.extract_strided_slice %141 {offsets = [0, 128], sizes = [16, 128], strides = [1, 1]} : vector<16x384xf32> to vector<16x128xf32>
    %144 = vector.extract_strided_slice %141 {offsets = [0, 256], sizes = [16, 128], strides = [1, 1]} : vector<16x384xf32> to vector<16x128xf32>
    %145 = vector.extract_strided_slice %133 {offsets = [0, 384], sizes = [16, 128], strides = [1, 1]} : vector<16x512xf32> to vector<16x128xf32>
    %146 = math.tanh %145 : vector<16x128xf32>
    %147 = arith.mulf %143, %119 : vector<16x128xf32>
    %148 = arith.mulf %142, %146 : vector<16x128xf32>
    %149 = arith.addf %147, %148 : vector<16x128xf32>
    %150 = math.tanh %149 : vector<16x128xf32>
    %151 = arith.mulf %144, %150 : vector<16x128xf32>
    %152 = arith.truncf %151 : vector<16x128xf32> to vector<16x128xbf16>
    %153 = arith.index_cast %126 : i32 to index
    %c0_47 = arith.constant 0 : index
    %154 = vector.load %arg3[%153, %c0_47] : memref<128x128xbf16, #tpu.memory_space<vmem>>, vector<16x128xbf16>
    tpu.vector_store %arg3[%153, %c0_47], %152 {strides = array<i32>} : memref<128x128xbf16, #tpu.memory_space<vmem>>, vector<16x128xbf16>,
    %c5_i32 = arith.constant 5 : i32
    %c16_i32_48 = arith.constant 16 : i32
    %155 = arith.muli %c5_i32, %c16_i32_48 : i32
    %156 = tpu.assume_multiple %155, 16 : i32
    %157 = arith.index_cast %156 : i32 to index
    %c0_49 = arith.constant 0 : index
    %158 = vector.load %arg1[%157, %c0_49] : memref<128x512xbf16, #tpu.memory_space<vmem>>, vector<16x512xbf16>
    %159 = arith.extf %158 : vector<16x512xbf16> to vector<16x512xf32>
    %160 = arith.truncf %151 : vector<16x128xf32> to vector<16x128xbf16>
    %c0_50 = arith.constant 0 : index
    %c0_51 = arith.constant 0 : index
    %161 = vector.load %arg2[%c0_50, %c0_51] : memref<128x512xbf16, #tpu.memory_space<vmem>>, vector<128x512xbf16>
    %cst_52 = arith.constant dense<0.000000e+00> : vector<16x512xf32>
    %162 = tpu.matmul %160, %161, %cst_52 {dimension_numbers = #tpu.dot_dimension_numbers<[1], [0], [0], [1], [0, 0, 1, 1], [], []>} : vector<16x128xbf16>, vector<128x512xbf16>, vector<16x512xf32> -> vector<16x512xf32>
    %163 = arith.addf %159, %162 : vector<16x512xf32>
    %164 = vector.extract_strided_slice %163 {offsets = [0, 0], sizes = [16, 384], strides = [1, 1]} : vector<16x512xf32> to vector<16x384xf32>
    %cst_53 = arith.constant 5.000000e-01 : f32
    %165 = vector.broadcast %cst_53 : f32 to vector<16x384xf32>
    %166 = arith.mulf %165, %164 : vector<16x384xf32>
    %167 = math.tanh %166 : vector<16x384xf32>
    %cst_54 = arith.constant 1.000000e+00 : f32
    %168 = vector.broadcast %cst_54 : f32 to vector<16x384xf32>
    %169 = arith.addf %167, %168 : vector<16x384xf32>
    %cst_55 = arith.constant 5.000000e-01 : f32
    %170 = vector.broadcast %cst_55 : f32 to vector<16x384xf32>
    %171 = arith.mulf %170, %169 : vector<16x384xf32>
    %172 = vector.extract_strided_slice %171 {offsets = [0, 0], sizes = [16, 128], strides = [1, 1]} : vector<16x384xf32> to vector<16x128xf32>
    %173 = vector.extract_strided_slice %171 {offsets = [0, 128], sizes = [16, 128], strides = [1, 1]} : vector<16x384xf32> to vector<16x128xf32>
    %174 = vector.extract_strided_slice %171 {offsets = [0, 256], sizes = [16, 128], strides = [1, 1]} : vector<16x384xf32> to vector<16x128xf32>
    %175 = vector.extract_strided_slice %163 {offsets = [0, 384], sizes = [16, 128], strides = [1, 1]} : vector<16x512xf32> to vector<16x128xf32>
    %176 = math.tanh %175 : vector<16x128xf32>
    %177 = arith.mulf %173, %149 : vector<16x128xf32>
    %178 = arith.mulf %172, %176 : vector<16x128xf32>
    %179 = arith.addf %177, %178 : vector<16x128xf32>
    %180 = math.tanh %179 : vector<16x128xf32>
    %181 = arith.mulf %174, %180 : vector<16x128xf32>
    %182 = arith.truncf %181 : vector<16x128xf32> to vector<16x128xbf16>
    %183 = arith.index_cast %156 : i32 to index
    %c0_56 = arith.constant 0 : index
    %184 = vector.load %arg3[%183, %c0_56] : memref<128x128xbf16, #tpu.memory_space<vmem>>, vector<16x128xbf16>
    tpu.vector_store %arg3[%183, %c0_56], %182 {strides = array<i32>} : memref<128x128xbf16, #tpu.memory_space<vmem>>, vector<16x128xbf16>,
    %c6_i32 = arith.constant 6 : i32
    %c16_i32_57 = arith.constant 16 : i32
    %185 = arith.muli %c6_i32, %c16_i32_57 : i32
    %186 = tpu.assume_multiple %185, 16 : i32
    %187 = arith.index_cast %186 : i32 to index
    %c0_58 = arith.constant 0 : index
    %188 = vector.load %arg1[%187, %c0_58] : memref<128x512xbf16, #tpu.memory_space<vmem>>, vector<16x512xbf16>
    %189 = arith.extf %188 : vector<16x512xbf16> to vector<16x512xf32>
    %190 = arith.truncf %181 : vector<16x128xf32> to vector<16x128xbf16>
    %c0_59 = arith.constant 0 : index
    %c0_60 = arith.constant 0 : index
    %191 = vector.load %arg2[%c0_59, %c0_60] : memref<128x512xbf16, #tpu.memory_space<vmem>>, vector<128x512xbf16>
    %cst_61 = arith.constant dense<0.000000e+00> : vector<16x512xf32>
    %192 = tpu.matmul %190, %191, %cst_61 {dimension_numbers = #tpu.dot_dimension_numbers<[1], [0], [0], [1], [0, 0, 1, 1], [], []>} : vector<16x128xbf16>, vector<128x512xbf16>, vector<16x512xf32> -> vector<16x512xf32>
    %193 = arith.addf %189, %192 : vector<16x512xf32>
    %194 = vector.extract_strided_slice %193 {offsets = [0, 0], sizes = [16, 384], strides = [1, 1]} : vector<16x512xf32> to vector<16x384xf32>
    %cst_62 = arith.constant 5.000000e-01 : f32
    %195 = vector.broadcast %cst_62 : f32 to vector<16x384xf32>
    %196 = arith.mulf %195, %194 : vector<16x384xf32>
    %197 = math.tanh %196 : vector<16x384xf32>
    %cst_63 = arith.constant 1.000000e+00 : f32
    %198 = vector.broadcast %cst_63 : f32 to vector<16x384xf32>
    %199 = arith.addf %197, %198 : vector<16x384xf32>
    %cst_64 = arith.constant 5.000000e-01 : f32
    %200 = vector.broadcast %cst_64 : f32 to vector<16x384xf32>
    %201 = arith.mulf %200, %199 : vector<16x384xf32>
    %202 = vector.extract_strided_slice %201 {offsets = [0, 0], sizes = [16, 128], strides = [1, 1]} : vector<16x384xf32> to vector<16x128xf32>
    %203 = vector.extract_strided_slice %201 {offsets = [0, 128], sizes = [16, 128], strides = [1, 1]} : vector<16x384xf32> to vector<16x128xf32>
    %204 = vector.extract_strided_slice %201 {offsets = [0, 256], sizes = [16, 128], strides = [1, 1]} : vector<16x384xf32> to vector<16x128xf32>
    %205 = vector.extract_strided_slice %193 {offsets = [0, 384], sizes = [16, 128], strides = [1, 1]} : vector<16x512xf32> to vector<16x128xf32>
    %206 = math.tanh %205 : vector<16x128xf32>
    %207 = arith.mulf %203, %179 : vector<16x128xf32>
    %208 = arith.mulf %202, %206 : vector<16x128xf32>
    %209 = arith.addf %207, %208 : vector<16x128xf32>
    %210 = math.tanh %209 : vector<16x128xf32>
    %211 = arith.mulf %204, %210 : vector<16x128xf32>
    %212 = arith.truncf %211 : vector<16x128xf32> to vector<16x128xbf16>
    %213 = arith.index_cast %186 : i32 to index
    %c0_65 = arith.constant 0 : index
    %214 = vector.load %arg3[%213, %c0_65] : memref<128x128xbf16, #tpu.memory_space<vmem>>, vector<16x128xbf16>
    tpu.vector_store %arg3[%213, %c0_65], %212 {strides = array<i32>} : memref<128x128xbf16, #tpu.memory_space<vmem>>, vector<16x128xbf16>,
    %c7_i32 = arith.constant 7 : i32
    %c16_i32_66 = arith.constant 16 : i32
    %215 = arith.muli %c7_i32, %c16_i32_66 : i32
    %216 = tpu.assume_multiple %215, 16 : i32
    %217 = arith.index_cast %216 : i32 to index
    %c0_67 = arith.constant 0 : index
    %218 = vector.load %arg1[%217, %c0_67] : memref<128x512xbf16, #tpu.memory_space<vmem>>, vector<16x512xbf16>
    %219 = arith.extf %218 : vector<16x512xbf16> to vector<16x512xf32>
    %220 = arith.truncf %211 : vector<16x128xf32> to vector<16x128xbf16>
    %c0_68 = arith.constant 0 : index
    %c0_69 = arith.constant 0 : index
    %221 = vector.load %arg2[%c0_68, %c0_69] : memref<128x512xbf16, #tpu.memory_space<vmem>>, vector<128x512xbf16>
    %cst_70 = arith.constant dense<0.000000e+00> : vector<16x512xf32>
    %222 = tpu.matmul %220, %221, %cst_70 {dimension_numbers = #tpu.dot_dimension_numbers<[1], [0], [0], [1], [0, 0, 1, 1], [], []>} : vector<16x128xbf16>, vector<128x512xbf16>, vector<16x512xf32> -> vector<16x512xf32>
    %223 = arith.addf %219, %222 : vector<16x512xf32>
    %224 = vector.extract_strided_slice %223 {offsets = [0, 0], sizes = [16, 384], strides = [1, 1]} : vector<16x512xf32> to vector<16x384xf32>
    %cst_71 = arith.constant 5.000000e-01 : f32
    %225 = vector.broadcast %cst_71 : f32 to vector<16x384xf32>
    %226 = arith.mulf %225, %224 : vector<16x384xf32>
    %227 = math.tanh %226 : vector<16x384xf32>
    %cst_72 = arith.constant 1.000000e+00 : f32
    %228 = vector.broadcast %cst_72 : f32 to vector<16x384xf32>
    %229 = arith.addf %227, %228 : vector<16x384xf32>
    %cst_73 = arith.constant 5.000000e-01 : f32
    %230 = vector.broadcast %cst_73 : f32 to vector<16x384xf32>
    %231 = arith.mulf %230, %229 : vector<16x384xf32>
    %232 = vector.extract_strided_slice %231 {offsets = [0, 0], sizes = [16, 128], strides = [1, 1]} : vector<16x384xf32> to vector<16x128xf32>
    %233 = vector.extract_strided_slice %231 {offsets = [0, 128], sizes = [16, 128], strides = [1, 1]} : vector<16x384xf32> to vector<16x128xf32>
    %234 = vector.extract_strided_slice %231 {offsets = [0, 256], sizes = [16, 128], strides = [1, 1]} : vector<16x384xf32> to vector<16x128xf32>
    %235 = vector.extract_strided_slice %223 {offsets = [0, 384], sizes = [16, 128], strides = [1, 1]} : vector<16x512xf32> to vector<16x128xf32>
    %236 = math.tanh %235 : vector<16x128xf32>
    %237 = arith.mulf %233, %209 : vector<16x128xf32>
    %238 = arith.mulf %232, %236 : vector<16x128xf32>
    %239 = arith.addf %237, %238 : vector<16x128xf32>
    %240 = math.tanh %239 : vector<16x128xf32>
    %241 = arith.mulf %234, %240 : vector<16x128xf32>
    %242 = arith.truncf %241 : vector<16x128xf32> to vector<16x128xbf16>
    %243 = arith.index_cast %216 : i32 to index
    %c0_74 = arith.constant 0 : index
    %244 = vector.load %arg3[%243, %c0_74] : memref<128x128xbf16, #tpu.memory_space<vmem>>, vector<16x128xbf16>
    tpu.vector_store %arg3[%243, %c0_74], %242 {strides = array<i32>} : memref<128x128xbf16, #tpu.memory_space<vmem>>, vector<16x128xbf16>,
    %c8_i32 = arith.constant 8 : i32
    %c0_75 = arith.constant 0 : index
    %c0_76 = arith.constant 0 : index
    %245 = vector.load %arg4[%c0_75, %c0_76] : memref<16x128xf32, #tpu.memory_space<vmem>>, vector<16x128xf32>
    tpu.vector_store %arg4[%c0_75, %c0_76], %241 {strides = array<i32>} : memref<16x128xf32, #tpu.memory_space<vmem>>, vector<16x128xf32>,
    %c0_77 = arith.constant 0 : index
    %c0_78 = arith.constant 0 : index
    %246 = vector.load %arg5[%c0_77, %c0_78] : memref<16x128xf32, #tpu.memory_space<vmem>>, vector<16x128xf32>
    tpu.vector_store %arg5[%c0_77, %c0_78], %239 {strides = array<i32>} : memref<16x128xf32, #tpu.memory_space<vmem>>, vector<16x128xf32>,
    return
  }
  func.func @transform_0(%arg0: i32) -> (i32, i32) {
    %c0_i32 = arith.constant 0 : i32
    %c0_i32_0 = arith.constant 0 : i32
    return %arg0, %c0_i32 : i32, i32
  }
  func.func @transform_1(%arg0: i32) -> (i32, i32) {
    %c0_i32 = arith.constant 0 : i32
    %c0_i32_0 = arith.constant 0 : i32
    %c0_i32_1 = arith.constant 0 : i32
    return %c0_i32, %c0_i32_0 : i32, i32
  }
  func.func @transform_2(%arg0: i32) -> (i32, i32) {
    %c0_i32 = arith.constant 0 : i32
    %c0_i32_0 = arith.constant 0 : i32
    return %arg0, %c0_i32 : i32, i32
  }
}

module attributes {stable_mosaic.version = 11 : i64} {
  func.func @_lstm_rec_last_fc_kernel(%arg0: i32, %arg1: memref<128x512xbf16, #tpu.memory_space<vmem>>, %arg2: memref<128x512xbf16, #tpu.memory_space<vmem>>, %arg3: memref<128x128xbf16, #tpu.memory_space<vmem>>, %arg4: memref<1x128xf32, #tpu.memory_space<vmem>>, %arg5: memref<16x128xf32, #tpu.memory_space<vmem>>, %arg6: memref<16x128xf32, #tpu.memory_space<vmem>>, %arg7: memref<16x128xf32, #tpu.memory_space<vmem>>) attributes {dimension_semantics = [#tpu.dimension_semantics<arbitrary>], iteration_bounds = array<i64: 1>, scalar_prefetch = 0 : i64, scratch_operands = 2 : i64, tpu.core_type = #tpu.core_type<tc>, window_params = [{transform_indices = @transform_0, window_bounds = array<i64: 128, 512>}, {pipeline_mode = #tpu.pipeline_mode<synchronous>, transform_indices = @transform_1, window_bounds = array<i64: 128, 512>}, {pipeline_mode = #tpu.pipeline_mode<synchronous>, transform_indices = @transform_2, window_bounds = array<i64: 128, 128>}, {pipeline_mode = #tpu.pipeline_mode<synchronous>, transform_indices = @transform_3, window_bounds = array<i64: 1, 128>}, {pipeline_mode = #tpu.pipeline_mode<synchronous>, transform_indices = @transform_4, window_bounds = array<i64: 16, 128>}]} {
    %c0_i32 = arith.constant 0 : i32
    %0 = arith.cmpi eq, %arg0, %c0_i32 : i32
    %1 = arith.extui %0 : i1 to i32
    %c0_i32_0 = arith.constant 0 : i32
    %2 = arith.cmpi ne, %1, %c0_i32_0 : i32
    scf.if %2 {
      %cst_73 = arith.constant 0.000000e+00 : f32
      %226 = vector.broadcast %cst_73 : f32 to vector<16x128xf32>
      %c0_74 = arith.constant 0 : index
      %c0_75 = arith.constant 0 : index
      %227 = vector.load %arg6[%c0_74, %c0_75] : memref<16x128xf32, #tpu.memory_space<vmem>>, vector<16x128xf32>
      tpu.vector_store %arg6[%c0_74, %c0_75], %226 {strides = array<i32>} : memref<16x128xf32, #tpu.memory_space<vmem>>, vector<16x128xf32>,
      %cst_76 = arith.constant 0.000000e+00 : f32
      %228 = vector.broadcast %cst_76 : f32 to vector<16x128xf32>
      %c0_77 = arith.constant 0 : index
      %c0_78 = arith.constant 0 : index
      %229 = vector.load %arg7[%c0_77, %c0_78] : memref<16x128xf32, #tpu.memory_space<vmem>>, vector<16x128xf32>
      tpu.vector_store %arg7[%c0_77, %c0_78], %228 {strides = array<i32>} : memref<16x128xf32, #tpu.memory_space<vmem>>, vector<16x128xf32>,
    } else {
    }
    %c0 = arith.constant 0 : index
    %c0_1 = arith.constant 0 : index
    %3 = vector.load %arg6[%c0, %c0_1] : memref<16x128xf32, #tpu.memory_space<vmem>>, vector<16x128xf32>
    %c0_2 = arith.constant 0 : index
    %c0_3 = arith.constant 0 : index
    %4 = vector.load %arg7[%c0_2, %c0_3] : memref<16x128xf32, #tpu.memory_space<vmem>>, vector<16x128xf32>
    %c0_i32_4 = arith.constant 0 : i32
    %c16_i32 = arith.constant 16 : i32
    %5 = arith.muli %c0_i32_4, %c16_i32 : i32
    %6 = tpu.assume_multiple %5, 16 : i32
    %7 = arith.index_cast %6 : i32 to index
    %c0_5 = arith.constant 0 : index
    %8 = vector.load %arg1[%7, %c0_5] : memref<128x512xbf16, #tpu.memory_space<vmem>>, vector<16x512xbf16>
    %9 = arith.extf %8 : vector<16x512xbf16> to vector<16x512xf32>
    %10 = arith.truncf %3 : vector<16x128xf32> to vector<16x128xbf16>
    %c0_6 = arith.constant 0 : index
    %c0_7 = arith.constant 0 : index
    %11 = vector.load %arg2[%c0_6, %c0_7] : memref<128x512xbf16, #tpu.memory_space<vmem>>, vector<128x512xbf16>
    %cst = arith.constant dense<0.000000e+00> : vector<16x512xf32>
    %12 = tpu.matmul %10, %11, %cst {dimension_numbers = #tpu.dot_dimension_numbers<[1], [0], [0], [1], [0, 0, 1, 1], [], []>} : vector<16x128xbf16>, vector<128x512xbf16>, vector<16x512xf32> -> vector<16x512xf32>
    %13 = arith.addf %9, %12 : vector<16x512xf32>
    %14 = vector.extract_strided_slice %13 {offsets = [0, 0], sizes = [16, 384], strides = [1, 1]} : vector<16x512xf32> to vector<16x384xf32>
    %cst_8 = arith.constant 5.000000e-01 : f32
    %15 = vector.broadcast %cst_8 : f32 to vector<16x384xf32>
    %16 = arith.mulf %15, %14 : vector<16x384xf32>
    %17 = math.tanh %16 : vector<16x384xf32>
    %cst_9 = arith.constant 1.000000e+00 : f32
    %18 = vector.broadcast %cst_9 : f32 to vector<16x384xf32>
    %19 = arith.addf %17, %18 : vector<16x384xf32>
    %cst_10 = arith.constant 5.000000e-01 : f32
    %20 = vector.broadcast %cst_10 : f32 to vector<16x384xf32>
    %21 = arith.mulf %20, %19 : vector<16x384xf32>
    %22 = vector.extract_strided_slice %21 {offsets = [0, 0], sizes = [16, 128], strides = [1, 1]} : vector<16x384xf32> to vector<16x128xf32>
    %23 = vector.extract_strided_slice %21 {offsets = [0, 128], sizes = [16, 128], strides = [1, 1]} : vector<16x384xf32> to vector<16x128xf32>
    %24 = vector.extract_strided_slice %21 {offsets = [0, 256], sizes = [16, 128], strides = [1, 1]} : vector<16x384xf32> to vector<16x128xf32>
    %25 = vector.extract_strided_slice %13 {offsets = [0, 384], sizes = [16, 128], strides = [1, 1]} : vector<16x512xf32> to vector<16x128xf32>
    %26 = math.tanh %25 : vector<16x128xf32>
    %27 = arith.mulf %23, %4 : vector<16x128xf32>
    %28 = arith.mulf %22, %26 : vector<16x128xf32>
    %29 = arith.addf %27, %28 : vector<16x128xf32>
    %30 = math.tanh %29 : vector<16x128xf32>
    %31 = arith.mulf %24, %30 : vector<16x128xf32>
    %c1_i32 = arith.constant 1 : i32
    %c16_i32_11 = arith.constant 16 : i32
    %32 = arith.muli %c1_i32, %c16_i32_11 : i32
    %33 = tpu.assume_multiple %32, 16 : i32
    %34 = arith.index_cast %33 : i32 to index
    %c0_12 = arith.constant 0 : index
    %35 = vector.load %arg1[%34, %c0_12] : memref<128x512xbf16, #tpu.memory_space<vmem>>, vector<16x512xbf16>
    %36 = arith.extf %35 : vector<16x512xbf16> to vector<16x512xf32>
    %37 = arith.truncf %31 : vector<16x128xf32> to vector<16x128xbf16>
    %c0_13 = arith.constant 0 : index
    %c0_14 = arith.constant 0 : index
    %38 = vector.load %arg2[%c0_13, %c0_14] : memref<128x512xbf16, #tpu.memory_space<vmem>>, vector<128x512xbf16>
    %cst_15 = arith.constant dense<0.000000e+00> : vector<16x512xf32>
    %39 = tpu.matmul %37, %38, %cst_15 {dimension_numbers = #tpu.dot_dimension_numbers<[1], [0], [0], [1], [0, 0, 1, 1], [], []>} : vector<16x128xbf16>, vector<128x512xbf16>, vector<16x512xf32> -> vector<16x512xf32>
    %40 = arith.addf %36, %39 : vector<16x512xf32>
    %41 = vector.extract_strided_slice %40 {offsets = [0, 0], sizes = [16, 384], strides = [1, 1]} : vector<16x512xf32> to vector<16x384xf32>
    %cst_16 = arith.constant 5.000000e-01 : f32
    %42 = vector.broadcast %cst_16 : f32 to vector<16x384xf32>
    %43 = arith.mulf %42, %41 : vector<16x384xf32>
    %44 = math.tanh %43 : vector<16x384xf32>
    %cst_17 = arith.constant 1.000000e+00 : f32
    %45 = vector.broadcast %cst_17 : f32 to vector<16x384xf32>
    %46 = arith.addf %44, %45 : vector<16x384xf32>
    %cst_18 = arith.constant 5.000000e-01 : f32
    %47 = vector.broadcast %cst_18 : f32 to vector<16x384xf32>
    %48 = arith.mulf %47, %46 : vector<16x384xf32>
    %49 = vector.extract_strided_slice %48 {offsets = [0, 0], sizes = [16, 128], strides = [1, 1]} : vector<16x384xf32> to vector<16x128xf32>
    %50 = vector.extract_strided_slice %48 {offsets = [0, 128], sizes = [16, 128], strides = [1, 1]} : vector<16x384xf32> to vector<16x128xf32>
    %51 = vector.extract_strided_slice %48 {offsets = [0, 256], sizes = [16, 128], strides = [1, 1]} : vector<16x384xf32> to vector<16x128xf32>
    %52 = vector.extract_strided_slice %40 {offsets = [0, 384], sizes = [16, 128], strides = [1, 1]} : vector<16x512xf32> to vector<16x128xf32>
    %53 = math.tanh %52 : vector<16x128xf32>
    %54 = arith.mulf %50, %29 : vector<16x128xf32>
    %55 = arith.mulf %49, %53 : vector<16x128xf32>
    %56 = arith.addf %54, %55 : vector<16x128xf32>
    %57 = math.tanh %56 : vector<16x128xf32>
    %58 = arith.mulf %51, %57 : vector<16x128xf32>
    %c2_i32 = arith.constant 2 : i32
    %c16_i32_19 = arith.constant 16 : i32
    %59 = arith.muli %c2_i32, %c16_i32_19 : i32
    %60 = tpu.assume_multiple %59, 16 : i32
    %61 = arith.index_cast %60 : i32 to index
    %c0_20 = arith.constant 0 : index
    %62 = vector.load %arg1[%61, %c0_20] : memref<128x512xbf16, #tpu.memory_space<vmem>>, vector<16x512xbf16>
    %63 = arith.extf %62 : vector<16x512xbf16> to vector<16x512xf32>
    %64 = arith.truncf %58 : vector<16x128xf32> to vector<16x128xbf16>
    %c0_21 = arith.constant 0 : index
    %c0_22 = arith.constant 0 : index
    %65 = vector.load %arg2[%c0_21, %c0_22] : memref<128x512xbf16, #tpu.memory_space<vmem>>, vector<128x512xbf16>
    %cst_23 = arith.constant dense<0.000000e+00> : vector<16x512xf32>
    %66 = tpu.matmul %64, %65, %cst_23 {dimension_numbers = #tpu.dot_dimension_numbers<[1], [0], [0], [1], [0, 0, 1, 1], [], []>} : vector<16x128xbf16>, vector<128x512xbf16>, vector<16x512xf32> -> vector<16x512xf32>
    %67 = arith.addf %63, %66 : vector<16x512xf32>
    %68 = vector.extract_strided_slice %67 {offsets = [0, 0], sizes = [16, 384], strides = [1, 1]} : vector<16x512xf32> to vector<16x384xf32>
    %cst_24 = arith.constant 5.000000e-01 : f32
    %69 = vector.broadcast %cst_24 : f32 to vector<16x384xf32>
    %70 = arith.mulf %69, %68 : vector<16x384xf32>
    %71 = math.tanh %70 : vector<16x384xf32>
    %cst_25 = arith.constant 1.000000e+00 : f32
    %72 = vector.broadcast %cst_25 : f32 to vector<16x384xf32>
    %73 = arith.addf %71, %72 : vector<16x384xf32>
    %cst_26 = arith.constant 5.000000e-01 : f32
    %74 = vector.broadcast %cst_26 : f32 to vector<16x384xf32>
    %75 = arith.mulf %74, %73 : vector<16x384xf32>
    %76 = vector.extract_strided_slice %75 {offsets = [0, 0], sizes = [16, 128], strides = [1, 1]} : vector<16x384xf32> to vector<16x128xf32>
    %77 = vector.extract_strided_slice %75 {offsets = [0, 128], sizes = [16, 128], strides = [1, 1]} : vector<16x384xf32> to vector<16x128xf32>
    %78 = vector.extract_strided_slice %75 {offsets = [0, 256], sizes = [16, 128], strides = [1, 1]} : vector<16x384xf32> to vector<16x128xf32>
    %79 = vector.extract_strided_slice %67 {offsets = [0, 384], sizes = [16, 128], strides = [1, 1]} : vector<16x512xf32> to vector<16x128xf32>
    %80 = math.tanh %79 : vector<16x128xf32>
    %81 = arith.mulf %77, %56 : vector<16x128xf32>
    %82 = arith.mulf %76, %80 : vector<16x128xf32>
    %83 = arith.addf %81, %82 : vector<16x128xf32>
    %84 = math.tanh %83 : vector<16x128xf32>
    %85 = arith.mulf %78, %84 : vector<16x128xf32>
    %c3_i32 = arith.constant 3 : i32
    %c16_i32_27 = arith.constant 16 : i32
    %86 = arith.muli %c3_i32, %c16_i32_27 : i32
    %87 = tpu.assume_multiple %86, 16 : i32
    %88 = arith.index_cast %87 : i32 to index
    %c0_28 = arith.constant 0 : index
    %89 = vector.load %arg1[%88, %c0_28] : memref<128x512xbf16, #tpu.memory_space<vmem>>, vector<16x512xbf16>
    %90 = arith.extf %89 : vector<16x512xbf16> to vector<16x512xf32>
    %91 = arith.truncf %85 : vector<16x128xf32> to vector<16x128xbf16>
    %c0_29 = arith.constant 0 : index
    %c0_30 = arith.constant 0 : index
    %92 = vector.load %arg2[%c0_29, %c0_30] : memref<128x512xbf16, #tpu.memory_space<vmem>>, vector<128x512xbf16>
    %cst_31 = arith.constant dense<0.000000e+00> : vector<16x512xf32>
    %93 = tpu.matmul %91, %92, %cst_31 {dimension_numbers = #tpu.dot_dimension_numbers<[1], [0], [0], [1], [0, 0, 1, 1], [], []>} : vector<16x128xbf16>, vector<128x512xbf16>, vector<16x512xf32> -> vector<16x512xf32>
    %94 = arith.addf %90, %93 : vector<16x512xf32>
    %95 = vector.extract_strided_slice %94 {offsets = [0, 0], sizes = [16, 384], strides = [1, 1]} : vector<16x512xf32> to vector<16x384xf32>
    %cst_32 = arith.constant 5.000000e-01 : f32
    %96 = vector.broadcast %cst_32 : f32 to vector<16x384xf32>
    %97 = arith.mulf %96, %95 : vector<16x384xf32>
    %98 = math.tanh %97 : vector<16x384xf32>
    %cst_33 = arith.constant 1.000000e+00 : f32
    %99 = vector.broadcast %cst_33 : f32 to vector<16x384xf32>
    %100 = arith.addf %98, %99 : vector<16x384xf32>
    %cst_34 = arith.constant 5.000000e-01 : f32
    %101 = vector.broadcast %cst_34 : f32 to vector<16x384xf32>
    %102 = arith.mulf %101, %100 : vector<16x384xf32>
    %103 = vector.extract_strided_slice %102 {offsets = [0, 0], sizes = [16, 128], strides = [1, 1]} : vector<16x384xf32> to vector<16x128xf32>
    %104 = vector.extract_strided_slice %102 {offsets = [0, 128], sizes = [16, 128], strides = [1, 1]} : vector<16x384xf32> to vector<16x128xf32>
    %105 = vector.extract_strided_slice %102 {offsets = [0, 256], sizes = [16, 128], strides = [1, 1]} : vector<16x384xf32> to vector<16x128xf32>
    %106 = vector.extract_strided_slice %94 {offsets = [0, 384], sizes = [16, 128], strides = [1, 1]} : vector<16x512xf32> to vector<16x128xf32>
    %107 = math.tanh %106 : vector<16x128xf32>
    %108 = arith.mulf %104, %83 : vector<16x128xf32>
    %109 = arith.mulf %103, %107 : vector<16x128xf32>
    %110 = arith.addf %108, %109 : vector<16x128xf32>
    %111 = math.tanh %110 : vector<16x128xf32>
    %112 = arith.mulf %105, %111 : vector<16x128xf32>
    %c4_i32 = arith.constant 4 : i32
    %c16_i32_35 = arith.constant 16 : i32
    %113 = arith.muli %c4_i32, %c16_i32_35 : i32
    %114 = tpu.assume_multiple %113, 16 : i32
    %115 = arith.index_cast %114 : i32 to index
    %c0_36 = arith.constant 0 : index
    %116 = vector.load %arg1[%115, %c0_36] : memref<128x512xbf16, #tpu.memory_space<vmem>>, vector<16x512xbf16>
    %117 = arith.extf %116 : vector<16x512xbf16> to vector<16x512xf32>
    %118 = arith.truncf %112 : vector<16x128xf32> to vector<16x128xbf16>
    %c0_37 = arith.constant 0 : index
    %c0_38 = arith.constant 0 : index
    %119 = vector.load %arg2[%c0_37, %c0_38] : memref<128x512xbf16, #tpu.memory_space<vmem>>, vector<128x512xbf16>
    %cst_39 = arith.constant dense<0.000000e+00> : vector<16x512xf32>
    %120 = tpu.matmul %118, %119, %cst_39 {dimension_numbers = #tpu.dot_dimension_numbers<[1], [0], [0], [1], [0, 0, 1, 1], [], []>} : vector<16x128xbf16>, vector<128x512xbf16>, vector<16x512xf32> -> vector<16x512xf32>
    %121 = arith.addf %117, %120 : vector<16x512xf32>
    %122 = vector.extract_strided_slice %121 {offsets = [0, 0], sizes = [16, 384], strides = [1, 1]} : vector<16x512xf32> to vector<16x384xf32>
    %cst_40 = arith.constant 5.000000e-01 : f32
    %123 = vector.broadcast %cst_40 : f32 to vector<16x384xf32>
    %124 = arith.mulf %123, %122 : vector<16x384xf32>
    %125 = math.tanh %124 : vector<16x384xf32>
    %cst_41 = arith.constant 1.000000e+00 : f32
    %126 = vector.broadcast %cst_41 : f32 to vector<16x384xf32>
    %127 = arith.addf %125, %126 : vector<16x384xf32>
    %cst_42 = arith.constant 5.000000e-01 : f32
    %128 = vector.broadcast %cst_42 : f32 to vector<16x384xf32>
    %129 = arith.mulf %128, %127 : vector<16x384xf32>
    %130 = vector.extract_strided_slice %129 {offsets = [0, 0], sizes = [16, 128], strides = [1, 1]} : vector<16x384xf32> to vector<16x128xf32>
    %131 = vector.extract_strided_slice %129 {offsets = [0, 128], sizes = [16, 128], strides = [1, 1]} : vector<16x384xf32> to vector<16x128xf32>
    %132 = vector.extract_strided_slice %129 {offsets = [0, 256], sizes = [16, 128], strides = [1, 1]} : vector<16x384xf32> to vector<16x128xf32>
    %133 = vector.extract_strided_slice %121 {offsets = [0, 384], sizes = [16, 128], strides = [1, 1]} : vector<16x512xf32> to vector<16x128xf32>
    %134 = math.tanh %133 : vector<16x128xf32>
    %135 = arith.mulf %131, %110 : vector<16x128xf32>
    %136 = arith.mulf %130, %134 : vector<16x128xf32>
    %137 = arith.addf %135, %136 : vector<16x128xf32>
    %138 = math.tanh %137 : vector<16x128xf32>
    %139 = arith.mulf %132, %138 : vector<16x128xf32>
    %c5_i32 = arith.constant 5 : i32
    %c16_i32_43 = arith.constant 16 : i32
    %140 = arith.muli %c5_i32, %c16_i32_43 : i32
    %141 = tpu.assume_multiple %140, 16 : i32
    %142 = arith.index_cast %141 : i32 to index
    %c0_44 = arith.constant 0 : index
    %143 = vector.load %arg1[%142, %c0_44] : memref<128x512xbf16, #tpu.memory_space<vmem>>, vector<16x512xbf16>
    %144 = arith.extf %143 : vector<16x512xbf16> to vector<16x512xf32>
    %145 = arith.truncf %139 : vector<16x128xf32> to vector<16x128xbf16>
    %c0_45 = arith.constant 0 : index
    %c0_46 = arith.constant 0 : index
    %146 = vector.load %arg2[%c0_45, %c0_46] : memref<128x512xbf16, #tpu.memory_space<vmem>>, vector<128x512xbf16>
    %cst_47 = arith.constant dense<0.000000e+00> : vector<16x512xf32>
    %147 = tpu.matmul %145, %146, %cst_47 {dimension_numbers = #tpu.dot_dimension_numbers<[1], [0], [0], [1], [0, 0, 1, 1], [], []>} : vector<16x128xbf16>, vector<128x512xbf16>, vector<16x512xf32> -> vector<16x512xf32>
    %148 = arith.addf %144, %147 : vector<16x512xf32>
    %149 = vector.extract_strided_slice %148 {offsets = [0, 0], sizes = [16, 384], strides = [1, 1]} : vector<16x512xf32> to vector<16x384xf32>
    %cst_48 = arith.constant 5.000000e-01 : f32
    %150 = vector.broadcast %cst_48 : f32 to vector<16x384xf32>
    %151 = arith.mulf %150, %149 : vector<16x384xf32>
    %152 = math.tanh %151 : vector<16x384xf32>
    %cst_49 = arith.constant 1.000000e+00 : f32
    %153 = vector.broadcast %cst_49 : f32 to vector<16x384xf32>
    %154 = arith.addf %152, %153 : vector<16x384xf32>
    %cst_50 = arith.constant 5.000000e-01 : f32
    %155 = vector.broadcast %cst_50 : f32 to vector<16x384xf32>
    %156 = arith.mulf %155, %154 : vector<16x384xf32>
    %157 = vector.extract_strided_slice %156 {offsets = [0, 0], sizes = [16, 128], strides = [1, 1]} : vector<16x384xf32> to vector<16x128xf32>
    %158 = vector.extract_strided_slice %156 {offsets = [0, 128], sizes = [16, 128], strides = [1, 1]} : vector<16x384xf32> to vector<16x128xf32>
    %159 = vector.extract_strided_slice %156 {offsets = [0, 256], sizes = [16, 128], strides = [1, 1]} : vector<16x384xf32> to vector<16x128xf32>
    %160 = vector.extract_strided_slice %148 {offsets = [0, 384], sizes = [16, 128], strides = [1, 1]} : vector<16x512xf32> to vector<16x128xf32>
    %161 = math.tanh %160 : vector<16x128xf32>
    %162 = arith.mulf %158, %137 : vector<16x128xf32>
    %163 = arith.mulf %157, %161 : vector<16x128xf32>
    %164 = arith.addf %162, %163 : vector<16x128xf32>
    %165 = math.tanh %164 : vector<16x128xf32>
    %166 = arith.mulf %159, %165 : vector<16x128xf32>
    %c6_i32 = arith.constant 6 : i32
    %c16_i32_51 = arith.constant 16 : i32
    %167 = arith.muli %c6_i32, %c16_i32_51 : i32
    %168 = tpu.assume_multiple %167, 16 : i32
    %169 = arith.index_cast %168 : i32 to index
    %c0_52 = arith.constant 0 : index
    %170 = vector.load %arg1[%169, %c0_52] : memref<128x512xbf16, #tpu.memory_space<vmem>>, vector<16x512xbf16>
    %171 = arith.extf %170 : vector<16x512xbf16> to vector<16x512xf32>
    %172 = arith.truncf %166 : vector<16x128xf32> to vector<16x128xbf16>
    %c0_53 = arith.constant 0 : index
    %c0_54 = arith.constant 0 : index
    %173 = vector.load %arg2[%c0_53, %c0_54] : memref<128x512xbf16, #tpu.memory_space<vmem>>, vector<128x512xbf16>
    %cst_55 = arith.constant dense<0.000000e+00> : vector<16x512xf32>
    %174 = tpu.matmul %172, %173, %cst_55 {dimension_numbers = #tpu.dot_dimension_numbers<[1], [0], [0], [1], [0, 0, 1, 1], [], []>} : vector<16x128xbf16>, vector<128x512xbf16>, vector<16x512xf32> -> vector<16x512xf32>
    %175 = arith.addf %171, %174 : vector<16x512xf32>
    %176 = vector.extract_strided_slice %175 {offsets = [0, 0], sizes = [16, 384], strides = [1, 1]} : vector<16x512xf32> to vector<16x384xf32>
    %cst_56 = arith.constant 5.000000e-01 : f32
    %177 = vector.broadcast %cst_56 : f32 to vector<16x384xf32>
    %178 = arith.mulf %177, %176 : vector<16x384xf32>
    %179 = math.tanh %178 : vector<16x384xf32>
    %cst_57 = arith.constant 1.000000e+00 : f32
    %180 = vector.broadcast %cst_57 : f32 to vector<16x384xf32>
    %181 = arith.addf %179, %180 : vector<16x384xf32>
    %cst_58 = arith.constant 5.000000e-01 : f32
    %182 = vector.broadcast %cst_58 : f32 to vector<16x384xf32>
    %183 = arith.mulf %182, %181 : vector<16x384xf32>
    %184 = vector.extract_strided_slice %183 {offsets = [0, 0], sizes = [16, 128], strides = [1, 1]} : vector<16x384xf32> to vector<16x128xf32>
    %185 = vector.extract_strided_slice %183 {offsets = [0, 128], sizes = [16, 128], strides = [1, 1]} : vector<16x384xf32> to vector<16x128xf32>
    %186 = vector.extract_strided_slice %183 {offsets = [0, 256], sizes = [16, 128], strides = [1, 1]} : vector<16x384xf32> to vector<16x128xf32>
    %187 = vector.extract_strided_slice %175 {offsets = [0, 384], sizes = [16, 128], strides = [1, 1]} : vector<16x512xf32> to vector<16x128xf32>
    %188 = math.tanh %187 : vector<16x128xf32>
    %189 = arith.mulf %185, %164 : vector<16x128xf32>
    %190 = arith.mulf %184, %188 : vector<16x128xf32>
    %191 = arith.addf %189, %190 : vector<16x128xf32>
    %192 = math.tanh %191 : vector<16x128xf32>
    %193 = arith.mulf %186, %192 : vector<16x128xf32>
    %c7_i32 = arith.constant 7 : i32
    %c16_i32_59 = arith.constant 16 : i32
    %194 = arith.muli %c7_i32, %c16_i32_59 : i32
    %195 = tpu.assume_multiple %194, 16 : i32
    %196 = arith.index_cast %195 : i32 to index
    %c0_60 = arith.constant 0 : index
    %197 = vector.load %arg1[%196, %c0_60] : memref<128x512xbf16, #tpu.memory_space<vmem>>, vector<16x512xbf16>
    %198 = arith.extf %197 : vector<16x512xbf16> to vector<16x512xf32>
    %199 = arith.truncf %193 : vector<16x128xf32> to vector<16x128xbf16>
    %c0_61 = arith.constant 0 : index
    %c0_62 = arith.constant 0 : index
    %200 = vector.load %arg2[%c0_61, %c0_62] : memref<128x512xbf16, #tpu.memory_space<vmem>>, vector<128x512xbf16>
    %cst_63 = arith.constant dense<0.000000e+00> : vector<16x512xf32>
    %201 = tpu.matmul %199, %200, %cst_63 {dimension_numbers = #tpu.dot_dimension_numbers<[1], [0], [0], [1], [0, 0, 1, 1], [], []>} : vector<16x128xbf16>, vector<128x512xbf16>, vector<16x512xf32> -> vector<16x512xf32>
    %202 = arith.addf %198, %201 : vector<16x512xf32>
    %203 = vector.extract_strided_slice %202 {offsets = [0, 0], sizes = [16, 384], strides = [1, 1]} : vector<16x512xf32> to vector<16x384xf32>
    %cst_64 = arith.constant 5.000000e-01 : f32
    %204 = vector.broadcast %cst_64 : f32 to vector<16x384xf32>
    %205 = arith.mulf %204, %203 : vector<16x384xf32>
    %206 = math.tanh %205 : vector<16x384xf32>
    %cst_65 = arith.constant 1.000000e+00 : f32
    %207 = vector.broadcast %cst_65 : f32 to vector<16x384xf32>
    %208 = arith.addf %206, %207 : vector<16x384xf32>
    %cst_66 = arith.constant 5.000000e-01 : f32
    %209 = vector.broadcast %cst_66 : f32 to vector<16x384xf32>
    %210 = arith.mulf %209, %208 : vector<16x384xf32>
    %211 = vector.extract_strided_slice %210 {offsets = [0, 0], sizes = [16, 128], strides = [1, 1]} : vector<16x384xf32> to vector<16x128xf32>
    %212 = vector.extract_strided_slice %210 {offsets = [0, 128], sizes = [16, 128], strides = [1, 1]} : vector<16x384xf32> to vector<16x128xf32>
    %213 = vector.extract_strided_slice %210 {offsets = [0, 256], sizes = [16, 128], strides = [1, 1]} : vector<16x384xf32> to vector<16x128xf32>
    %214 = vector.extract_strided_slice %202 {offsets = [0, 384], sizes = [16, 128], strides = [1, 1]} : vector<16x512xf32> to vector<16x128xf32>
    %215 = math.tanh %214 : vector<16x128xf32>
    %216 = arith.mulf %212, %191 : vector<16x128xf32>
    %217 = arith.mulf %211, %215 : vector<16x128xf32>
    %218 = arith.addf %216, %217 : vector<16x128xf32>
    %219 = math.tanh %218 : vector<16x128xf32>
    %220 = arith.mulf %213, %219 : vector<16x128xf32>
    %c8_i32 = arith.constant 8 : i32
    %c0_67 = arith.constant 0 : index
    %c0_68 = arith.constant 0 : index
    %221 = vector.load %arg6[%c0_67, %c0_68] : memref<16x128xf32, #tpu.memory_space<vmem>>, vector<16x128xf32>
    tpu.vector_store %arg6[%c0_67, %c0_68], %220 {strides = array<i32>} : memref<16x128xf32, #tpu.memory_space<vmem>>, vector<16x128xf32>,
    %c0_69 = arith.constant 0 : index
    %c0_70 = arith.constant 0 : index
    %222 = vector.load %arg7[%c0_69, %c0_70] : memref<16x128xf32, #tpu.memory_space<vmem>>, vector<16x128xf32>
    tpu.vector_store %arg7[%c0_69, %c0_70], %218 {strides = array<i32>} : memref<16x128xf32, #tpu.memory_space<vmem>>, vector<16x128xf32>,
    %c0_i32_71 = arith.constant 0 : i32
    %223 = arith.cmpi eq, %arg0, %c0_i32_71 : i32
    %224 = arith.extui %223 : i1 to i32
    %c0_i32_72 = arith.constant 0 : i32
    %225 = arith.cmpi ne, %224, %c0_i32_72 : i32
    scf.if %225 {
      %226 = arith.truncf %220 : vector<16x128xf32> to vector<16x128xbf16>
      %c0_73 = arith.constant 0 : index
      %c0_74 = arith.constant 0 : index
      %227 = vector.load %arg3[%c0_73, %c0_74] : memref<128x128xbf16, #tpu.memory_space<vmem>>, vector<128x128xbf16>
      %cst_75 = arith.constant dense<0.000000e+00> : vector<16x128xf32>
      %228 = tpu.matmul %226, %227, %cst_75 {dimension_numbers = #tpu.dot_dimension_numbers<[1], [0], [0], [1], [0, 0, 1, 1], [], []>} : vector<16x128xbf16>, vector<128x128xbf16>, vector<16x128xf32> -> vector<16x128xf32>
      %c0_76 = arith.constant 0 : index
      %c0_77 = arith.constant 0 : index
      %229 = vector.load %arg4[%c0_76, %c0_77] : memref<1x128xf32, #tpu.memory_space<vmem>>, vector<1x128xf32>
      %230 = vector.broadcast %229 : vector<1x128xf32> to vector<16x128xf32>
      %231 = arith.addf %228, %230 : vector<16x128xf32>
      %c0_78 = arith.constant 0 : index
      %c0_79 = arith.constant 0 : index
      %232 = vector.load %arg5[%c0_78, %c0_79] : memref<16x128xf32, #tpu.memory_space<vmem>>, vector<16x128xf32>
      tpu.vector_store %arg5[%c0_78, %c0_79], %231 {strides = array<i32>} : memref<16x128xf32, #tpu.memory_space<vmem>>, vector<16x128xf32>,
    } else {
    }
    return
  }
  func.func @transform_0(%arg0: i32) -> (i32, i32) {
    %c0_i32 = arith.constant 0 : i32
    %c0_i32_0 = arith.constant 0 : i32
    return %arg0, %c0_i32 : i32, i32
  }
  func.func @transform_1(%arg0: i32) -> (i32, i32) {
    %c0_i32 = arith.constant 0 : i32
    %c0_i32_0 = arith.constant 0 : i32
    %c0_i32_1 = arith.constant 0 : i32
    return %c0_i32, %c0_i32_0 : i32, i32
  }
  func.func @transform_2(%arg0: i32) -> (i32, i32) {
    %c0_i32 = arith.constant 0 : i32
    %c0_i32_0 = arith.constant 0 : i32
    %c0_i32_1 = arith.constant 0 : i32
    return %c0_i32, %c0_i32_0 : i32, i32
  }
  func.func @transform_3(%arg0: i32) -> (i32, i32) {
    %c0_i32 = arith.constant 0 : i32
    %c0_i32_0 = arith.constant 0 : i32
    %c0_i32_1 = arith.constant 0 : i32
    return %c0_i32, %c0_i32_0 : i32, i32
  }
  func.func @transform_4(%arg0: i32) -> (i32, i32) {
    %c0_i32 = arith.constant 0 : i32
    %c0_i32_0 = arith.constant 0 : i32
    %c0_i32_1 = arith.constant 0 : i32
    return %c0_i32, %c0_i32_0 : i32, i32
  }
}

</mosaic_0001>

<bundles_post_ra>
// kernel: lstm_classifier_forward.4
= control target key start
LH: loop header
LB: loop body
LE: loop exit
PB: predicated region body
PF: predicated region fallthrough
CT: control target
= control target key end

     0   :  { %8 = vsyncpa [#allocation3], 0  ;;  %s764_s12 = smov 0   ;;  %s875_s0 = inlined_call_operand.vmem [shape: bf16[128,16], index: 0, kind: input, shape index: {}]   ;;  %s876_s1 = inlined_call_operand.hbm [shape: bf16[16,512], index: 1, kind: input, shape index: {}]   ;;  %s877_s2 = inlined_call_operand.vmem [shape: f32[1,512], index: 2, kind: input, shape index: {}]   ;;  %s878_s3 = inlined_call_operand.vmem [shape: bf16[128,512], index: 3, kind: output, shape index: {}]  }
   0x1 LB: > { %s607_s13 = sadd.s32 4294967295, %s738_s12   ;;  %p609_p0 = scmp.ge.s32.totalorder %s738_s12, 1  ;;  %s738_s12 = sphi %s764_s12, %s14_s12  }
   0x2   : > { %p113_p1 = scmp.lt.s32.totalorder %s738_s12, 3  ;;  %s740_s14 = smov [#allocation2]  }
   0x3   : > { %s125_s15 = sshll.u32 %s740_s14, 4  ;;  %p776_p3 = scmp.eq.s32.totalorder %s607_s13, 0  ;;  %s126_s15 = int_to_ptr.vmem [resolvable:$true] %s125_s15 }
   0x4   : > { %p772_p2 = pnand %p609_p0, %p113_p1  ;;  %s713_s18 = scalar_lea.vmem %s126_s15, 512 }
   0x5   : > { %p714_p7 = scmp.ne.s32.totalorder %s126_s15, %s713_s18  ;;  %p721_p10 = scmp.lt.s32.totalorder %s126_s15, %s126_s15 }
   0x6   : > { %p674_p4 = pneg %p772_p2  ;;  %p722_p11 = scmp.lt.s32.totalorder %s713_s18, %s713_s18 }
   0x8   : > { %p675_p5 = pnand %p776_p3, %p674_p4  ;;  %p723_p12 = por %p722_p11, %p721_p10 }
   0xa   : > { %p704_p6 = pneg %p675_p5 }
   0xc   : > { %p716_p8 = pnand %p714_p7, %p704_p6 }
   0xe   : > { %p717_p9 = pneg %p716_p8 }
  0x10   : > { %p724_p13 = pnand %p723_p12, %p717_p9 }
  0x12   : > { %727 = shalt.err (!%p724_p13)
}
  0x13   : > { %s741_s19 = smov 256   ;;  %s742_s20 = smov 16  }
  0x14   : > { %677 = dma.hbm_to_vmem [thread:$0]  (!%p675_p5), %s876_s1, 512, %s126_s15, [#allocation3], %s741_s19, %s741_s19, %s742_s20  }
  0x15   : > { %153 = sbr.rel (%p772_p2) target bundleno = 262 (0x106), region = 32 }
  0x1a   : > { %733 = dma.done.wait (%p776_p3), [#allocation3], 512  }
  0x1b   : > { %735 = vsyncadd (%p776_p3), [#allocation3], 4294966784  ;;  %s614_s23 = sshll.u32 %s607_s13, 3  ;;  %v743_v0 = vmov 0   ;;  %v692_v1 = vld [vmem:[#allocation2 + $0x4] ss:$16 sps:$4 sm:$0xff]   ;;  %v206_v9 = vlaneseq }
  0x1c   : > { %311 = vmatprep.mubr.bf16.mxu0 %v743_v0  ;;  %384 = vmatprep.mubr.bf16.mxu1 %v743_v0  ;;  %p179_p0 = scmp.lt.s32.totalorder %s614_s23, 15  ;;  %v694_v2 = vld [vmem:[#allocation2 + $0xc] ss:$16 sps:$4 sm:$0xff]   ;;  %v696_v3 = vld [vmem:[#allocation2] ss:$16 sps:$4 sm:$0xff]   ;;  %vm266_vm0 = vcmask 130048  }
  0x1d   : > { %293 = vmatprep.subr.bf16.mxu0 %v692_v1  ;;  %v697_v4 = vld [vmem:[#allocation2 + $0x8] ss:$16 sps:$4 sm:$0xff]   ;;  %366 = vmatprep.subr.bf16.mxu1 %v694_v2  ;;  %v207_v10 = vshrl.u32 %v206_v9, 7  ;;  %v204_v15 = vld [vmem:[%s877_s2] sm:$0xf] }
  0x1e   : > { %s882_s23 = smov (!%p179_p0, %s614_s23), 15  ;;  %294 = vmatpush1.bf16.msra.mxu0 %v696_v3  ;;  %367 = vmatpush1.bf16.msra.mxu1 %v697_v4 }
  0x1f   : > { %s615_s24 = sshll.u32 %s882_s23, 2  ;;  %v208_v11 = vsub.s32 0, %v207_v10  ;;  %v216_v12 = vsub.s32 2, %v207_v10  ;;  %v212_v13 = vsub.s32 1, %v207_v10  ;;  %v220_v14 = vsub.s32 3, %v207_v10  ;;  %s653_s30 = sshll.u32 %s882_s23, 4 }
  0x20   : > { %s182_s27 = scalar_lea.vmem %s875_s0, %s615_s24  ;;  %s826_s6 = scalar_lea.vmem %s878_s3, %s653_s30 }
  0x21   : > { %v698_v5 = vld [vmem:[%s182_s27] sm:$0xff]   ;;  %v699_v6 = vld [vmem:[%s182_s27 + $0x8] sm:$0xff]   ;;  %v700_v7 = vld [vmem:[%s182_s27 + $0x10] sm:$0xff]   ;;  %v810_v16 = vrot.slane %v204_v15, %v208_v11  ;;  %v812_v17 = vrot.slane %v204_v15, %v216_v12  ;;  %v814_v18 = vrot.slane %v204_v15, %v212_v13  ;;  %v816_v19 = vrot.slane %v204_v15, %v220_v14 }
  0x22   : > { %627 = vmatmul.mubr.msk.bf16.vlgmr.msra.gmra.mxu0 %vm266_vm0, %v698_v5  ;;  %631 = vmatmul.mubr.msk.bf16.vlgmr.msra.gmra.mxu1 %vm266_vm0, %v698_v5  ;;  %v701_v8 = vld [vmem:[%s182_s27 + $0x18] sm:$0xff]  }
  0x23   : > { %321 = vmatprep.mubr.bf16.mxu0 %v743_v0  ;;  %394 = vmatprep.mubr.bf16.mxu1 %v743_v0 }
  0x2a   : > { %628 = vmatmul.mubr.msk.bf16.gmra.mxu0 %vm266_vm0, %v699_v6  ;;  %632 = vmatmul.mubr.msk.bf16.gmra.mxu1 %vm266_vm0, %v699_v6 }
  0x2b   : > { %331 = vmatprep.mubr.bf16.mxu0 %v743_v0  ;;  %404 = vmatprep.mubr.bf16.mxu1 %v743_v0 }
  0x32   : > { %629 = vmatmul.mubr.msk.bf16.gmra.mxu0 %vm266_vm0, %v700_v7  ;;  %633 = vmatmul.mubr.msk.bf16.gmra.mxu1 %vm266_vm0, %v700_v7 }
  0x33   : > { %341 = vmatprep.mubr.bf16.mxu0 %v743_v0  ;;  %414 = vmatprep.mubr.bf16.mxu1 %v743_v0 }
  0x3a   : > { %630 = vmatmul.mubr.msk.bf16.gmra.mxu0 %vm266_vm0, %v701_v8  ;;  %634 = vmatmul.mubr.msk.bf16.gmra.mxu1 %vm266_vm0, %v701_v8 }
  0xe2   : > { %v313_v20 = vpop.f32.mrf.mxu0  ;;  %v386_v21 = vpop.f32.mrf.mxu1 }
  0xe3   : > { %v314_v24 = vadd.f32 %v313_v20, %v810_v16  ;;  %v387_v25 = vadd.f32 %v386_v21, %v812_v17 }
  0xe4   : > { %v315_v22 = vpop.f32.mrf.mxu0  ;;  %v388_v23 = vpop.f32.mrf.mxu1 }
  0xe5   : > { %v316_v26 = vadd.f32 %v315_v22, %v814_v18  ;;  %v389_v27 = vadd.f32 %v388_v23, %v816_v19 }
  0xe6   : > { %v317_v28 = vpop.f32.mrf.mxu0  ;;  %v390_v29 = vpop.f32.mrf.mxu1 }
  0xe7   : > { %v654_v30 = vpack.c.bf16 %v316_v26, %v314_v24  ;;  %v655_v31 = vpack.c.bf16 %v389_v27, %v387_v25  ;;  %v318_v34 = vadd.f32 %v317_v28, %v810_v16  ;;  %v391_v35 = vadd.f32 %v390_v29, %v812_v17 }
  0xe8   : > { %v319_v32 = vpop.f32.mrf.mxu0  ;;  %v392_v33 = vpop.f32.mrf.mxu1 }
  0xe9   : > { %521 = vst [vmem:[%s826_s6] sm:$0xff] %v654_v30  ;;  %522 = vst [vmem:[%s826_s6 + $0x8] sm:$0xff] %v655_v31  ;;  %v320_v36 = vadd.f32 %v319_v32, %v814_v18  ;;  %v393_v37 = vadd.f32 %v392_v33, %v816_v19 }
  0xea   : > { %v323_v38 = vpop.f32.mrf.mxu0  ;;  %v396_v39 = vpop.f32.mrf.mxu1 }
  0xeb   : > { %v656_v40 = vpack.c.bf16 %v320_v36, %v318_v34  ;;  %v657_v41 = vpack.c.bf16 %v393_v37, %v391_v35  ;;  %v324_v44 = vadd.f32 %v323_v38, %v810_v16  ;;  %v397_v45 = vadd.f32 %v396_v39, %v812_v17 }
  0xec   : > { %v325_v42 = vpop.f32.mrf.mxu0  ;;  %v398_v43 = vpop.f32.mrf.mxu1 }
  0xed   : > { %523 = vst [vmem:[%s826_s6 + $0x10] sm:$0xff] %v656_v40  ;;  %524 = vst [vmem:[%s826_s6 + $0x18] sm:$0xff] %v657_v41  ;;  %v326_v46 = vadd.f32 %v325_v42, %v814_v18  ;;  %v399_v47 = vadd.f32 %v398_v43, %v816_v19 }
  0xee   : > { %v327_v48 = vpop.f32.mrf.mxu0  ;;  %v400_v49 = vpop.f32.mrf.mxu1 }
  0xef   : > { %v658_v50 = vpack.c.bf16 %v326_v46, %v324_v44  ;;  %v659_v51 = vpack.c.bf16 %v399_v47, %v397_v45  ;;  %v328_v54 = vadd.f32 %v327_v48, %v810_v16  ;;  %v401_v55 = vadd.f32 %v400_v49, %v812_v17 }
  0xf0   : > { %v329_v52 = vpop.f32.mrf.mxu0  ;;  %v402_v53 = vpop.f32.mrf.mxu1 }
  0xf1   : > { %525 = vst [vmem:[%s826_s6 + $0x20] sm:$0xff] %v658_v50  ;;  %526 = vst [vmem:[%s826_s6 + $0x28] sm:$0xff] %v659_v51  ;;  %v330_v56 = vadd.f32 %v329_v52, %v814_v18  ;;  %v403_v57 = vadd.f32 %v402_v53, %v816_v19 }
  0xf2   : > { %v333_v58 = vpop.f32.mrf.mxu0  ;;  %v406_v59 = vpop.f32.mrf.mxu1 }
  0xf3   : > { %v660_v60 = vpack.c.bf16 %v330_v56, %v328_v54  ;;  %v661_v61 = vpack.c.bf16 %v403_v57, %v401_v55  ;;  %v334_v0 = vadd.f32 %v333_v58, %v810_v16  ;;  %v407_v1 = vadd.f32 %v406_v59, %v812_v17 }
  0xf4   : > { %v335_v62 = vpop.f32.mrf.mxu0  ;;  %v408_v63 = vpop.f32.mrf.mxu1 }
  0xf5   : > { %527 = vst [vmem:[%s826_s6 + $0x30] sm:$0xff] %v660_v60  ;;  %528 = vst [vmem:[%s826_s6 + $0x38] sm:$0xff] %v661_v61  ;;  %v336_v2 = vadd.f32 %v335_v62, %v814_v18  ;;  %v409_v3 = vadd.f32 %v408_v63, %v816_v19 }
  0xf6   : > { %v337_v4 = vpop.f32.mrf.mxu0  ;;  %v410_v5 = vpop.f32.mrf.mxu1 }
  0xf7   : > { %v662_v6 = vpack.c.bf16 %v336_v2, %v334_v0  ;;  %v663_v7 = vpack.c.bf16 %v409_v3, %v407_v1  ;;  %v338_v10 = vadd.f32 %v337_v4, %v810_v16  ;;  %v411_v11 = vadd.f32 %v410_v5, %v812_v17 }
  0xf8   : > { %v339_v8 = vpop.f32.mrf.mxu0  ;;  %v412_v9 = vpop.f32.mrf.mxu1 }
  0xf9   : > { %529 = vst [vmem:[%s826_s6 + $0x40] sm:$0xff] %v662_v6  ;;  %530 = vst [vmem:[%s826_s6 + $0x48] sm:$0xff] %v663_v7  ;;  %v340_v12 = vadd.f32 %v339_v8, %v814_v18  ;;  %v413_v13 = vadd.f32 %v412_v9, %v816_v19 }
  0xfa   : > { %v343_v14 = vpop.f32.mrf.mxu0  ;;  %v416_v15 = vpop.f32.mrf.mxu1 }
  0xfb   : > { %v664_v20 = vpack.c.bf16 %v340_v12, %v338_v10  ;;  %v665_v21 = vpack.c.bf16 %v413_v13, %v411_v11  ;;  %v344_v24 = vadd.f32 %v343_v14, %v810_v16  ;;  %v417_v25 = vadd.f32 %v416_v15, %v812_v17 }
  0xfc   : > { %v345_v22 = vpop.f32.mrf.mxu0  ;;  %v418_v23 = vpop.f32.mrf.mxu1 }
  0xfd   : > { %531 = vst [vmem:[%s826_s6 + $0x50] sm:$0xff] %v664_v20  ;;  %532 = vst [vmem:[%s826_s6 + $0x58] sm:$0xff] %v665_v21  ;;  %v346_v26 = vadd.f32 %v345_v22, %v814_v18  ;;  %v419_v27 = vadd.f32 %v418_v23, %v816_v19 }
  0xfe   : > { %v347_v28 = vpop.f32.mrf.mxu0  ;;  %v420_v29 = vpop.f32.mrf.mxu1 }
  0xff   : > { %v666_v30 = vpack.c.bf16 %v346_v26, %v344_v24  ;;  %v667_v31 = vpack.c.bf16 %v419_v27, %v417_v25  ;;  %v348_v34 = vadd.f32 %v347_v28, %v810_v16  ;;  %v421_v35 = vadd.f32 %v420_v29, %v812_v17 }
 0x100   : > { %v349_v32 = vpop.f32.mrf.mxu0  ;;  %v422_v33 = vpop.f32.mrf.mxu1 }
 0x101   : > { %533 = vst [vmem:[%s826_s6 + $0x60] sm:$0xff] %v666_v30  ;;  %534 = vst [vmem:[%s826_s6 + $0x68] sm:$0xff] %v667_v31  ;;  %v350_v36 = vadd.f32 %v349_v32, %v814_v18  ;;  %v423_v37 = vadd.f32 %v422_v33, %v816_v19 }
 0x103   : > { %v668_v38 = vpack.c.bf16 %v350_v36, %v348_v34  ;;  %v669_v39 = vpack.c.bf16 %v423_v37, %v421_v35 }
 0x105   : > { %535 = vst [vmem:[%s826_s6 + $0x70] sm:$0xff] %v668_v38  ;;  %536 = vst [vmem:[%s826_s6 + $0x78] sm:$0xff] %v669_v39 }
 0x106 PF: > { %s14_s12 = sadd.s32 1, %s738_s12  }
 0x107   : > { %p11_p1 = scmp.ge.s32.totalorder %s14_s12, 4  }
 0x109   :  { %13 = sbr.rel (!%p11_p1) target bundleno = 1 (0x1), region = 67 }
 0x10e   :  { %561 = vsyncpa [#allocation3], 1 }
 0x10f   :  { %563 = vsyncpa [#allocation3 + $0x1], 1 }

// kernel: lstm_classifier_forward.6
= control target key start
LH: loop header
LB: loop body
LE: loop exit
PB: predicated region body
PF: predicated region fallthrough
CT: control target
= control target key end

     0   :  { %s910_s12 = smov 0   ;;  %s1102_s0 = inlined_call_operand.vmem [shape: bf16[128,128], index: 0, kind: input, shape index: {}]   ;;  %s1103_s1 = inlined_call_operand.vmem [shape: bf16[128,512], index: 1, kind: input, shape index: {}]   ;;  %s1104_s2 = inlined_call_operand.vmem [shape: f32[1,512], index: 2, kind: input, shape index: {}]   ;;  %s1105_s3 = inlined_call_operand.vmem [shape: bf16[128,512], index: 3, kind: output, shape index: {}]  }
   0x1 LB: > { %s739_s13 = sadd.s32 4294967295, %s887_s12   ;;  %p743_p0 = scmp.ge.s32.totalorder %s887_s12, 1  ;;  %s887_s12 = sphi %s910_s12, %s13_s12  }
   0x2   : > { %p138_p1 = scmp.lt.s32.totalorder %s887_s12, 3 }
   0x4   : > { %p139_p2 = pnand %p743_p0, %p138_p1 }
   0x5   : > { %s744_s5 = sshll.u32 (!%p139_p2), %s739_s13, 3 }
   0x6   : > { %142 = sbr.rel (%p139_p2) target bundleno = 273 (0x111), region = 32  ;;  %p164_p3 = scmp.lt.s32.totalorder (!%p139_p2), %s744_s5, 15 }
   0xb   : > { %v829_v0 = vld [vmem:[%s1103_s1 + $0xe4] ss:$16 sps:$4 sm:$0xff]   ;;  %v831_v1 = vld [vmem:[%s1103_s1 + $0xec] ss:$16 sps:$4 sm:$0xff]   ;;  %v889_v2 = vmov 0   ;;  %s1107_s5 = smov (!%p164_p3, %s744_s5), 15  ;;  %v219_v37 = vlaneseq }
   0xc   : > { %455 = vmatprep.mubr.bf16.mxu0 %v889_v2  ;;  %528 = vmatprep.mubr.bf16.mxu1 %v889_v2  ;;  %v833_v3 = vld [vmem:[%s1103_s1 + $0xe0] ss:$16 sps:$4 sm:$0xff]   ;;  %v834_v4 = vld [vmem:[%s1103_s1 + $0xe8] ss:$16 sps:$4 sm:$0xff]   ;;  %v835_v5 = vld [vmem:[%s1103_s1 + $0xc4] ss:$16 sps:$4 sm:$0xff]  }
   0xd   : > { %423 = vmatprep.subr.bf16.mxu0 %v829_v0  ;;  %496 = vmatprep.subr.bf16.mxu1 %v831_v1  ;;  %v837_v6 = vld [vmem:[%s1103_s1 + $0xcc] ss:$16 sps:$4 sm:$0xff]   ;;  %v839_v7 = vld [vmem:[%s1103_s1 + $0xc0] ss:$16 sps:$4 sm:$0xff]   ;;  %v840_v8 = vld [vmem:[%s1103_s1 + $0xc8] ss:$16 sps:$4 sm:$0xff]  }
   0xe   : > { %424 = vmatpush1.bf16.msra.mxu0 %v833_v3  ;;  %497 = vmatpush1.bf16.msra.mxu1 %v834_v4  ;;  %v841_v9 = vld [vmem:[%s1103_s1 + $0xa4] ss:$16 sps:$4 sm:$0xff]   ;;  %v843_v10 = vld [vmem:[%s1103_s1 + $0xac] ss:$16 sps:$4 sm:$0xff]   ;;  %v845_v11 = vld [vmem:[%s1103_s1 + $0xa0] ss:$16 sps:$4 sm:$0xff]  }
   0xf   : > { %425 = vmatprep.subr.bf16.mxu0 %v835_v5  ;;  %498 = vmatprep.subr.bf16.mxu1 %v837_v6  ;;  %v846_v12 = vld [vmem:[%s1103_s1 + $0xa8] ss:$16 sps:$4 sm:$0xff]   ;;  %v847_v13 = vld [vmem:[%s1103_s1 + $0x84] ss:$16 sps:$4 sm:$0xff]   ;;  %v849_v14 = vld [vmem:[%s1103_s1 + $0x8c] ss:$16 sps:$4 sm:$0xff]  }
  0x10   : > { %v851_v15 = vld [vmem:[%s1103_s1 + $0x80] ss:$16 sps:$4 sm:$0xff]   ;;  %v852_v16 = vld [vmem:[%s1103_s1 + $0x88] ss:$16 sps:$4 sm:$0xff]   ;;  %v853_v17 = vld [vmem:[%s1103_s1 + $0x64] ss:$16 sps:$4 sm:$0xff]  }
  0x11   : > { %v855_v18 = vld [vmem:[%s1103_s1 + $0x6c] ss:$16 sps:$4 sm:$0xff]   ;;  %v857_v19 = vld [vmem:[%s1103_s1 + $0x60] ss:$16 sps:$4 sm:$0xff]   ;;  %v858_v20 = vld [vmem:[%s1103_s1 + $0x68] ss:$16 sps:$4 sm:$0xff]  }
  0x12   : > { %426 = vmatpush1.bf16.msra.mxu0 %v839_v7  ;;  %499 = vmatpush1.bf16.msra.mxu1 %v840_v8  ;;  %v859_v21 = vld [vmem:[%s1103_s1 + $0x44] ss:$16 sps:$4 sm:$0xff]   ;;  %v861_v22 = vld [vmem:[%s1103_s1 + $0x4c] ss:$16 sps:$4 sm:$0xff]   ;;  %s745_s7 = sshll.u32 %s1107_s5, 2  ;;  %v220_v38 = vshrl.u32 %v219_v37, 7 }
  0x13   : > { %427 = vmatprep.subr.bf16.mxu0 %v841_v9  ;;  %500 = vmatprep.subr.bf16.mxu1 %v843_v10  ;;  %v863_v23 = vld [vmem:[%s1103_s1 + $0x40] ss:$16 sps:$4 sm:$0xff]   ;;  %v864_v24 = vld [vmem:[%s1103_s1 + $0x48] ss:$16 sps:$4 sm:$0xff]   ;;  %v865_v25 = vld [vmem:[%s1103_s1 + $0x24] ss:$16 sps:$4 sm:$0xff]   ;;  %s1001_s17 = scalar_lea.vmem %s1102_s0, %s745_s7 }
  0x14   : > { %v867_v26 = vld [vmem:[%s1103_s1 + $0x2c] ss:$16 sps:$4 sm:$0xff]   ;;  %v869_v27 = vld [vmem:[%s1103_s1 + $0x20] ss:$16 sps:$4 sm:$0xff]   ;;  %v870_v28 = vld [vmem:[%s1103_s1 + $0x28] ss:$16 sps:$4 sm:$0xff]  }
  0x15   : > { %v871_v29 = vld [vmem:[%s1103_s1 + $0x4] ss:$16 sps:$4 sm:$0xff]   ;;  %v873_v30 = vld [vmem:[%s1103_s1 + $0xc] ss:$16 sps:$4 sm:$0xff]   ;;  %v875_v31 = vld [vmem:[%s1103_s1] ss:$16 sps:$4 sm:$0xff]  }
  0x16   : > { %428 = vmatpush1.bf16.msra.mxu0 %v845_v11  ;;  %501 = vmatpush1.bf16.msra.mxu1 %v846_v12  ;;  %v876_v32 = vld [vmem:[%s1103_s1 + $0x8] ss:$16 sps:$4 sm:$0xff]   ;;  %v877_v33 = vld [vmem:[%s1001_s17] sm:$0xff]   ;;  %v879_v35 = vld [vmem:[%s1001_s17 + $0x10] sm:$0xff]   ;;  %v221_v39 = vsub.s32 0, %v220_v38  ;;  %v229_v40 = vsub.s32 2, %v220_v38 }
  0x17   : > { %429 = vmatprep.subr.bf16.mxu0 %v847_v13  ;;  %502 = vmatprep.subr.bf16.mxu1 %v849_v14  ;;  %v878_v34 = vld [vmem:[%s1001_s17 + $0x8] sm:$0xff]   ;;  %v880_v36 = vld [vmem:[%s1001_s17 + $0x18] sm:$0xff]   ;;  %v225_v41 = vsub.s32 1, %v220_v38  ;;  %v233_v42 = vsub.s32 3, %v220_v38  ;;  %v217_v43 = vld [vmem:[%s1104_s2] sm:$0xf] }
  0x18   : > { %v1037_v44 = vrot.slane %v217_v43, %v221_v39  ;;  %v1039_v45 = vrot.slane %v217_v43, %v229_v40  ;;  %s803_s8 = sshll.u32 %s1107_s5, 4 }
  0x19   : > { %v1041_v46 = vrot.slane %v217_v43, %v225_v41  ;;  %v1043_v47 = vrot.slane %v217_v43, %v233_v42  ;;  %s1053_s11 = scalar_lea.vmem %s1105_s3, %s803_s8 }
  0x1a   : > { %430 = vmatpush1.bf16.msra.mxu0 %v851_v15  ;;  %503 = vmatpush1.bf16.msra.mxu1 %v852_v16 }
  0x1b   : > { %431 = vmatprep.subr.bf16.mxu0 %v853_v17  ;;  %504 = vmatprep.subr.bf16.mxu1 %v855_v18 }
  0x1e   : > { %432 = vmatpush1.bf16.msra.mxu0 %v857_v19  ;;  %505 = vmatpush1.bf16.msra.mxu1 %v858_v20 }
  0x1f   : > { %433 = vmatprep.subr.bf16.mxu0 %v859_v21  ;;  %506 = vmatprep.subr.bf16.mxu1 %v861_v22 }
  0x22   : > { %434 = vmatpush1.bf16.msra.mxu0 %v863_v23  ;;  %507 = vmatpush1.bf16.msra.mxu1 %v864_v24 }
  0x23   : > { %435 = vmatprep.subr.bf16.mxu0 %v865_v25  ;;  %508 = vmatprep.subr.bf16.mxu1 %v867_v26 }
  0x26   : > { %436 = vmatpush1.bf16.msra.mxu0 %v869_v27  ;;  %509 = vmatpush1.bf16.msra.mxu1 %v870_v28 }
  0x27   : > { %437 = vmatprep.subr.bf16.mxu0 %v871_v29  ;;  %510 = vmatprep.subr.bf16.mxu1 %v873_v30 }
  0x2a   : > { %438 = vmatpush1.bf16.msra.mxu0 %v875_v31  ;;  %511 = vmatpush1.bf16.msra.mxu1 %v876_v32 }
  0x2d   : > { %456 = vmatmul.mubr.bf16.vlgmr.msra.gmra.mxu0 %v877_v33  ;;  %529 = vmatmul.mubr.bf16.vlgmr.msra.gmra.mxu1 %v877_v33 }
  0x2e   : > { %465 = vmatprep.mubr.bf16.mxu0 %v889_v2  ;;  %538 = vmatprep.mubr.bf16.mxu1 %v889_v2 }
  0x35   : > { %466 = vmatmul.mubr.bf16.gmra.mxu0 %v878_v34  ;;  %539 = vmatmul.mubr.bf16.gmra.mxu1 %v878_v34 }
  0x36   : > { %475 = vmatprep.mubr.bf16.mxu0 %v889_v2  ;;  %548 = vmatprep.mubr.bf16.mxu1 %v889_v2 }
  0x3d   : > { %476 = vmatmul.mubr.bf16.gmra.mxu0 %v879_v35  ;;  %549 = vmatmul.mubr.bf16.gmra.mxu1 %v879_v35 }
  0x3e   : > { %485 = vmatprep.mubr.bf16.mxu0 %v889_v2  ;;  %558 = vmatprep.mubr.bf16.mxu1 %v889_v2 }
  0x45   : > { %486 = vmatmul.mubr.bf16.gmra.mxu0 %v880_v36  ;;  %559 = vmatmul.mubr.bf16.gmra.mxu1 %v880_v36 }
  0xed   : > { %v457_v48 = vpop.f32.mrf.mxu0  ;;  %v530_v49 = vpop.f32.mrf.mxu1 }
  0xee   : > { %v458_v52 = vadd.f32 %v457_v48, %v1037_v44  ;;  %v531_v53 = vadd.f32 %v530_v49, %v1039_v45 }
  0xef   : > { %v459_v50 = vpop.f32.mrf.mxu0  ;;  %v532_v51 = vpop.f32.mrf.mxu1 }
  0xf0   : > { %v460_v54 = vadd.f32 %v459_v50, %v1041_v46  ;;  %v533_v55 = vadd.f32 %v532_v51, %v1043_v47 }
  0xf1   : > { %v461_v56 = vpop.f32.mrf.mxu0  ;;  %v534_v57 = vpop.f32.mrf.mxu1 }
  0xf2   : > { %v804_v58 = vpack.c.bf16 %v460_v54, %v458_v52  ;;  %v805_v59 = vpack.c.bf16 %v533_v55, %v531_v53  ;;  %v462_v62 = vadd.f32 %v461_v56, %v1037_v44  ;;  %v535_v63 = vadd.f32 %v534_v57, %v1039_v45 }
  0xf3   : > { %v463_v60 = vpop.f32.mrf.mxu0  ;;  %v536_v61 = vpop.f32.mrf.mxu1 }
  0xf4   : > { %665 = vst [vmem:[%s1053_s11] sm:$0xff] %v804_v58  ;;  %666 = vst [vmem:[%s1053_s11 + $0x8] sm:$0xff] %v805_v59  ;;  %v464_v0 = vadd.f32 %v463_v60, %v1041_v46  ;;  %v537_v1 = vadd.f32 %v536_v61, %v1043_v47 }
  0xf5   : > { %v467_v2 = vpop.f32.mrf.mxu0  ;;  %v540_v3 = vpop.f32.mrf.mxu1 }
  0xf6   : > { %v806_v4 = vpack.c.bf16 %v464_v0, %v462_v62  ;;  %v807_v5 = vpack.c.bf16 %v537_v1, %v535_v63  ;;  %v468_v8 = vadd.f32 %v467_v2, %v1037_v44  ;;  %v541_v9 = vadd.f32 %v540_v3, %v1039_v45 }
  0xf7   : > { %v469_v6 = vpop.f32.mrf.mxu0  ;;  %v542_v7 = vpop.f32.mrf.mxu1 }
  0xf8   : > { %667 = vst [vmem:[%s1053_s11 + $0x10] sm:$0xff] %v806_v4  ;;  %668 = vst [vmem:[%s1053_s11 + $0x18] sm:$0xff] %v807_v5  ;;  %v470_v10 = vadd.f32 %v469_v6, %v1041_v46  ;;  %v543_v11 = vadd.f32 %v542_v7, %v1043_v47 }
  0xf9   : > { %v471_v12 = vpop.f32.mrf.mxu0  ;;  %v544_v13 = vpop.f32.mrf.mxu1 }
  0xfa   : > { %v808_v14 = vpack.c.bf16 %v470_v10, %v468_v8  ;;  %v809_v15 = vpack.c.bf16 %v543_v11, %v541_v9  ;;  %v472_v18 = vadd.f32 %v471_v12, %v1037_v44  ;;  %v545_v19 = vadd.f32 %v544_v13, %v1039_v45 }
  0xfb   : > { %v473_v16 = vpop.f32.mrf.mxu0  ;;  %v546_v17 = vpop.f32.mrf.mxu1 }
  0xfc   : > { %669 = vst [vmem:[%s1053_s11 + $0x20] sm:$0xff] %v808_v14  ;;  %670 = vst [vmem:[%s1053_s11 + $0x28] sm:$0xff] %v809_v15  ;;  %v474_v20 = vadd.f32 %v473_v16, %v1041_v46  ;;  %v547_v21 = vadd.f32 %v546_v17, %v1043_v47 }
  0xfd   : > { %v477_v22 = vpop.f32.mrf.mxu0  ;;  %v550_v23 = vpop.f32.mrf.mxu1 }
  0xfe   : > { %v810_v24 = vpack.c.bf16 %v474_v20, %v472_v18  ;;  %v811_v25 = vpack.c.bf16 %v547_v21, %v545_v19  ;;  %v478_v28 = vadd.f32 %v477_v22, %v1037_v44  ;;  %v551_v29 = vadd.f32 %v550_v23, %v1039_v45 }
  0xff   : > { %v479_v26 = vpop.f32.mrf.mxu0  ;;  %v552_v27 = vpop.f32.mrf.mxu1 }
 0x100   : > { %671 = vst [vmem:[%s1053_s11 + $0x30] sm:$0xff] %v810_v24  ;;  %672 = vst [vmem:[%s1053_s11 + $0x38] sm:$0xff] %v811_v25  ;;  %v480_v30 = vadd.f32 %v479_v26, %v1041_v46  ;;  %v553_v31 = vadd.f32 %v552_v27, %v1043_v47 }
 0x101   : > { %v481_v32 = vpop.f32.mrf.mxu0  ;;  %v554_v33 = vpop.f32.mrf.mxu1 }
 0x102   : > { %v812_v34 = vpack.c.bf16 %v480_v30, %v478_v28  ;;  %v813_v35 = vpack.c.bf16 %v553_v31, %v551_v29  ;;  %v482_v38 = vadd.f32 %v481_v32, %v1037_v44  ;;  %v555_v39 = vadd.f32 %v554_v33, %v1039_v45 }
 0x103   : > { %v483_v36 = vpop.f32.mrf.mxu0  ;;  %v556_v37 = vpop.f32.mrf.mxu1 }
 0x104   : > { %673 = vst [vmem:[%s1053_s11 + $0x40] sm:$0xff] %v812_v34  ;;  %674 = vst [vmem:[%s1053_s11 + $0x48] sm:$0xff] %v813_v35  ;;  %v484_v40 = vadd.f32 %v483_v36, %v1041_v46  ;;  %v557_v41 = vadd.f32 %v556_v37, %v1043_v47 }
 0x105   : > { %v487_v42 = vpop.f32.mrf.mxu0  ;;  %v560_v43 = vpop.f32.mrf.mxu1 }
 0x106   : > { %v814_v48 = vpack.c.bf16 %v484_v40, %v482_v38  ;;  %v815_v49 = vpack.c.bf16 %v557_v41, %v555_v39  ;;  %v488_v52 = vadd.f32 %v487_v42, %v1037_v44  ;;  %v561_v53 = vadd.f32 %v560_v43, %v1039_v45 }
 0x107   : > { %v489_v50 = vpop.f32.mrf.mxu0  ;;  %v562_v51 = vpop.f32.mrf.mxu1 }
 0x108   : > { %675 = vst [vmem:[%s1053_s11 + $0x50] sm:$0xff] %v814_v48  ;;  %676 = vst [vmem:[%s1053_s11 + $0x58] sm:$0xff] %v815_v49  ;;  %v490_v54 = vadd.f32 %v489_v50, %v1041_v46  ;;  %v563_v55 = vadd.f32 %v562_v51, %v1043_v47 }
 0x109   : > { %v491_v56 = vpop.f32.mrf.mxu0  ;;  %v564_v57 = vpop.f32.mrf.mxu1 }
 0x10a   : > { %v816_v58 = vpack.c.bf16 %v490_v54, %v488_v52  ;;  %v817_v59 = vpack.c.bf16 %v563_v55, %v561_v53  ;;  %v492_v62 = vadd.f32 %v491_v56, %v1037_v44  ;;  %v565_v63 = vadd.f32 %v564_v57, %v1039_v45 }
 0x10b   : > { %v493_v60 = vpop.f32.mrf.mxu0  ;;  %v566_v61 = vpop.f32.mrf.mxu1 }
 0x10c   : > { %677 = vst [vmem:[%s1053_s11 + $0x60] sm:$0xff] %v816_v58  ;;  %678 = vst [vmem:[%s1053_s11 + $0x68] sm:$0xff] %v817_v59  ;;  %v494_v0 = vadd.f32 %v493_v60, %v1041_v46  ;;  %v567_v1 = vadd.f32 %v566_v61, %v1043_v47 }
 0x10e   : > { %v818_v2 = vpack.c.bf16 %v494_v0, %v492_v62  ;;  %v819_v3 = vpack.c.bf16 %v567_v1, %v565_v63 }
 0x110   : > { %679 = vst [vmem:[%s1053_s11 + $0x70] sm:$0xff] %v818_v2  ;;  %680 = vst [vmem:[%s1053_s11 + $0x78] sm:$0xff] %v819_v3 }
 0x111 PF: > { %s13_s12 = sadd.s32 1, %s887_s12  }
 0x112   : > { %p10_p4 = scmp.ge.s32.totalorder %s13_s12, 4  }
 0x114   :  { %12 = sbr.rel (!%p10_p4) target bundleno = 1 (0x1), region = 62 }

// kernel: lstm_classifier_forward.7
= control target key start
LH: loop header
LB: loop body
LE: loop exit
PB: predicated region body
PF: predicated region fallthrough
CT: control target
= control target key end

     0   :  { %v1873_v1 = vmov 0   ;;  %v1874_v33 = vmov 0.0|0.0   ;;  %vm1876_vm0 = vmmov 0   ;;  %s2679_s1 = inlined_call_operand.vmem [shape: bf16[128,512], index: 1, kind: input, shape index: {}]   ;;  %s2680_s0 = inlined_call_operand.vmem [shape: bf16[128,512], index: 0, kind: input, shape index: {}]   ;;  %s2681_s2 = inlined_call_operand.vmem [shape: bf16[128,128], index: 2, kind: input, shape index: {}]   ;;  %s2682_s3 = inlined_call_operand.vmem [shape: f32[1,128], index: 3, kind: input, shape index: {}]   ;;  %s2683_s4 = inlined_call_operand.vmem [shape: f32[16,128], index: 4, kind: output, shape index: {}]  }
   0x1   :  { %v1905_v0 = vld [vmem:[%s2679_s1 + $0xe4] ss:$16 sps:$4 sm:$0xff]   ;;  %270 = vmatprep.mubr.bf16.mxu0 %v1873_v1  ;;  %313 = vmatprep.mubr.bf16.mxu1 %v1873_v1  ;;  %v1912_v2 = vld [vmem:[%s2679_s1 + $0xec] ss:$16 sps:$4 sm:$0xff]   ;;  %v1918_v3 = vld [vmem:[%s2679_s1 + $0xe0] ss:$16 sps:$4 sm:$0xff]  }
   0x2   :  { %238 = vmatprep.subr.bf16.mxu0 %v1905_v0  ;;  %v1923_v4 = vld [vmem:[%s2679_s1 + $0xe8] ss:$16 sps:$4 sm:$0xff]   ;;  %281 = vmatprep.subr.bf16.mxu1 %v1912_v2  ;;  %v1929_v5 = vld [vmem:[%s2679_s1 + $0xc4] ss:$16 sps:$4 sm:$0xff]   ;;  %v1936_v6 = vld [vmem:[%s2679_s1 + $0xcc] ss:$16 sps:$4 sm:$0xff]  }
   0x3   :  { %239 = vmatpush1.bf16.msra.mxu0 %v1918_v3  ;;  %282 = vmatpush1.bf16.msra.mxu1 %v1923_v4  ;;  %v1941_v7 = vld [vmem:[%s2679_s1 + $0xc0] ss:$16 sps:$4 sm:$0xff]   ;;  %v1947_v8 = vld [vmem:[%s2679_s1 + $0xc8] ss:$16 sps:$4 sm:$0xff]   ;;  %v1953_v9 = vld [vmem:[%s2679_s1 + $0xa4] ss:$16 sps:$4 sm:$0xff]  }
   0x4   :  { %240 = vmatprep.subr.bf16.mxu0 %v1929_v5  ;;  %283 = vmatprep.subr.bf16.mxu1 %v1936_v6  ;;  %v1958_v10 = vld [vmem:[%s2679_s1 + $0xac] ss:$16 sps:$4 sm:$0xff]   ;;  %v1963_v11 = vld [vmem:[%s2679_s1 + $0xa0] ss:$16 sps:$4 sm:$0xff]   ;;  %v1968_v12 = vld [vmem:[%s2679_s1 + $0xa8] ss:$16 sps:$4 sm:$0xff]  }
   0x5   :  { %v1975_v13 = vld [vmem:[%s2679_s1 + $0x84] ss:$16 sps:$4 sm:$0xff]   ;;  %v1982_v14 = vld [vmem:[%s2679_s1 + $0x8c] ss:$16 sps:$4 sm:$0xff]   ;;  %v1987_v15 = vld [vmem:[%s2679_s1 + $0x80] ss:$16 sps:$4 sm:$0xff]  }
   0x6   :  { %v1994_v16 = vld [vmem:[%s2679_s1 + $0x88] ss:$16 sps:$4 sm:$0xff]   ;;  %v1999_v17 = vld [vmem:[%s2679_s1 + $0x64] ss:$16 sps:$4 sm:$0xff]   ;;  %v2006_v18 = vld [vmem:[%s2679_s1 + $0x6c] ss:$16 sps:$4 sm:$0xff]  }
   0x7   :  { %241 = vmatpush1.bf16.msra.mxu0 %v1941_v7  ;;  %284 = vmatpush1.bf16.msra.mxu1 %v1947_v8  ;;  %v2011_v19 = vld [vmem:[%s2679_s1 + $0x60] ss:$16 sps:$4 sm:$0xff]   ;;  %v2016_v20 = vld [vmem:[%s2679_s1 + $0x68] ss:$16 sps:$4 sm:$0xff]   ;;  %v2023_v21 = vld [vmem:[%s2679_s1 + $0x44] ss:$16 sps:$4 sm:$0xff]  }
   0x8   :  { %242 = vmatprep.subr.bf16.mxu0 %v1953_v9  ;;  %285 = vmatprep.subr.bf16.mxu1 %v1958_v10  ;;  %v2030_v22 = vld [vmem:[%s2679_s1 + $0x4c] ss:$16 sps:$4 sm:$0xff]   ;;  %v2037_v23 = vld [vmem:[%s2679_s1 + $0x40] ss:$16 sps:$4 sm:$0xff]   ;;  %v2042_v24 = vld [vmem:[%s2679_s1 + $0x48] ss:$16 sps:$4 sm:$0xff]  }
   0x9   :  { %v2049_v25 = vld [vmem:[%s2679_s1 + $0x24] ss:$16 sps:$4 sm:$0xff]   ;;  %v2054_v26 = vld [vmem:[%s2679_s1 + $0x2c] ss:$16 sps:$4 sm:$0xff]   ;;  %v2061_v27 = vld [vmem:[%s2679_s1 + $0x20] ss:$16 sps:$4 sm:$0xff]  }
   0xa   :  { %v2066_v28 = vld [vmem:[%s2679_s1 + $0x28] ss:$16 sps:$4 sm:$0xff]   ;;  %v2073_v29 = vld [vmem:[%s2679_s1 + $0x4] ss:$16 sps:$4 sm:$0xff]   ;;  %v2078_v30 = vld [vmem:[%s2679_s1 + $0xc] ss:$16 sps:$4 sm:$0xff]  }
   0xb   :  { %243 = vmatpush1.bf16.msra.mxu0 %v1963_v11  ;;  %286 = vmatpush1.bf16.msra.mxu1 %v1968_v12  ;;  %v2085_v31 = vld [vmem:[%s2679_s1] ss:$16 sps:$4 sm:$0xff]   ;;  %v2090_v32 = vld [vmem:[%s2679_s1 + $0x8] ss:$16 sps:$4 sm:$0xff]  }
   0xc   :  { %244 = vmatprep.subr.bf16.mxu0 %v1975_v13  ;;  %287 = vmatprep.subr.bf16.mxu1 %v1982_v14  ;;  %v33_v34 = vld [vmem:[%s2680_s0] sm:$0xff]  ;;  %v34_v36 = vld [vmem:[%s2680_s0 + $0x8] sm:$0xff]  ;;  %v35_v37 = vld [vmem:[%s2680_s0 + $0x10] sm:$0xff] }
   0xd   :  { %v37_v35 = vunpack.c.l.bf16 %v33_v34  ;;  %v38_v38 = vunpack.c.h.bf16 %v33_v34  ;;  %v40_v41 = vunpack.c.h.bf16 %v34_v36  ;;  %v41_v43 = vunpack.c.l.bf16 %v35_v37  ;;  %v36_v51 = vld [vmem:[%s2680_s0 + $0x18] sm:$0xff] }
   0xe   :  { %v42_v48 = vunpack.c.h.bf16 %v35_v37  ;;  %v44_v58 = vunpack.c.h.bf16 %v36_v51  ;;  %v39_v61 = vunpack.c.l.bf16 %v34_v36  ;;  %v43_v63 = vunpack.c.l.bf16 %v36_v51 }
   0xf   :  { %245 = vmatpush1.bf16.msra.mxu0 %v1987_v15  ;;  %288 = vmatpush1.bf16.msra.mxu1 %v1994_v16 }
  0x10   :  { %246 = vmatprep.subr.bf16.mxu0 %v1999_v17  ;;  %289 = vmatprep.subr.bf16.mxu1 %v2006_v18 }
  0x13   :  { %247 = vmatpush1.bf16.msra.mxu0 %v2011_v19  ;;  %290 = vmatpush1.bf16.msra.mxu1 %v2016_v20 }
  0x14   :  { %248 = vmatprep.subr.bf16.mxu0 %v2023_v21  ;;  %291 = vmatprep.subr.bf16.mxu1 %v2030_v22 }
  0x17   :  { %249 = vmatpush1.bf16.msra.mxu0 %v2037_v23  ;;  %292 = vmatpush1.bf16.msra.mxu1 %v2042_v24 }
  0x18   :  { %250 = vmatprep.subr.bf16.mxu0 %v2049_v25  ;;  %293 = vmatprep.subr.bf16.mxu1 %v2054_v26 }
  0x1b   :  { %251 = vmatpush1.bf16.msra.mxu0 %v2061_v27  ;;  %294 = vmatpush1.bf16.msra.mxu1 %v2066_v28 }
  0x1c   :  { %252 = vmatprep.subr.bf16.mxu0 %v2073_v29  ;;  %295 = vmatprep.subr.bf16.mxu1 %v2078_v30 }
  0x1f   :  { %253 = vmatpush1.bf16.msra.mxu0 %v2085_v31  ;;  %296 = vmatpush1.bf16.msra.mxu1 %v2090_v32 }
  0x20   :  { %384 = vmatprep.subr.bf16.mxu0 %v1905_v0  ;;  %427 = vmatprep.subr.bf16.mxu1 %v1912_v2 }
  0x22   :  { %271 = vmatmul.mubr.bf16.vlgmr.msra.gmra.mxu0 %v1874_v33  ;;  %314 = vmatmul.mubr.bf16.vlgmr.msra.gmra.mxu1 %v1874_v33 }
  0x23   :  { %385 = vmatpush1.bf16.msra.mxu0 %v1918_v3  ;;  %428 = vmatpush1.bf16.msra.mxu1 %v1923_v4 }
  0x24   :  { %386 = vmatprep.subr.bf16.mxu0 %v1929_v5  ;;  %429 = vmatprep.subr.bf16.mxu1 %v1936_v6 }
  0x25   :  { %416 = vmatprep.mubr.bf16.mxu0 %v1873_v1  ;;  %459 = vmatprep.mubr.bf16.mxu1 %v1873_v1 }
  0x27   :  { %387 = vmatpush1.bf16.msra.mxu0 %v1941_v7  ;;  %430 = vmatpush1.bf16.msra.mxu1 %v1947_v8 }
  0x28   :  { %388 = vmatprep.subr.bf16.mxu0 %v1953_v9  ;;  %431 = vmatprep.subr.bf16.mxu1 %v1958_v10 }
  0x2b   :  { %389 = vmatpush1.bf16.msra.mxu0 %v1963_v11  ;;  %432 = vmatpush1.bf16.msra.mxu1 %v1968_v12 }
  0x2c   :  { %390 = vmatprep.subr.bf16.mxu0 %v1975_v13  ;;  %433 = vmatprep.subr.bf16.mxu1 %v1982_v14 }
  0x2f   :  { %391 = vmatpush1.bf16.msra.mxu0 %v1987_v15  ;;  %434 = vmatpush1.bf16.msra.mxu1 %v1994_v16 }
  0x30   :  { %392 = vmatprep.subr.bf16.mxu0 %v1999_v17  ;;  %435 = vmatprep.subr.bf16.mxu1 %v2006_v18 }
  0x33   :  { %393 = vmatpush1.bf16.msra.mxu0 %v2011_v19  ;;  %436 = vmatpush1.bf16.msra.mxu1 %v2016_v20 }
  0x34   :  { %394 = vmatprep.subr.bf16.mxu0 %v2023_v21  ;;  %437 = vmatprep.subr.bf16.mxu1 %v2030_v22 }
  0x37   :  { %395 = vmatpush1.bf16.msra.mxu0 %v2037_v23  ;;  %438 = vmatpush1.bf16.msra.mxu1 %v2042_v24 }
  0x38   :  { %396 = vmatprep.subr.bf16.mxu0 %v2049_v25  ;;  %439 = vmatprep.subr.bf16.mxu1 %v2054_v26 }
  0x3b   :  { %397 = vmatpush1.bf16.msra.mxu0 %v2061_v27  ;;  %440 = vmatpush1.bf16.msra.mxu1 %v2066_v28 }
  0x3c   :  { %398 = vmatprep.subr.bf16.mxu0 %v2073_v29  ;;  %441 = vmatprep.subr.bf16.mxu1 %v2078_v30 }
  0x3f   :  { %399 = vmatpush1.bf16.msra.mxu0 %v2085_v31  ;;  %442 = vmatpush1.bf16.msra.mxu1 %v2090_v32 }
  0x40   :  { %530 = vmatprep.subr.bf16.mxu0 %v1905_v0  ;;  %573 = vmatprep.subr.bf16.mxu1 %v1912_v2 }
  0xe2   :  { %v272_v39 = vpop.f32.mrf.mxu0  ;;  %v315_v40 = vpop.f32.mrf.mxu1 }
  0xe3   :  { %v324_v42 = vadd.f32 %v272_v39, %v37_v35  ;;  %v326_v33 = vadd.f32 %v315_v40, %v39_v61 }
  0xe4   :  { %v274_v44 = vpop.f32.mrf.mxu0  ;;  %v317_v45 = vpop.f32.mrf.mxu1 }
  0xe5   :  { %v332_v46 = vmul.f32 0.5, %v324_v42  ;;  %v325_v47 = vadd.f32 %v274_v44, %v38_v38  ;;  %v327_v49 = vadd.f32 %v317_v45, %v40_v41  ;;  %v334_v38 = vmul.f32 0.5, %v326_v33 }
  0xe6   :  { %v276_v50 = vpop.f32.mrf.mxu0  ;;  %v319_v52 = vpop.f32.mrf.mxu1 }
  0xe7   :  { %1681 = vtanh.f32 %v332_v46  ;;  %v333_v53 = vmul.f32 0.5, %v325_v47  ;;  %v328_v54 = vadd.f32 %v276_v50, %v41_v43  ;;  %v330_v34 = vadd.f32 %v319_v52, %v43_v63 }
  0xe8   :  { %v278_v55 = vpop.f32.mrf.mxu0  ;;  %v321_v59 = vpop.f32.mrf.mxu1 }
  0xe9   :  { %1683 = vtanh.f32 %v333_v53  ;;  %v335_v56 = vmul.f32 0.5, %v328_v54  ;;  %v329_v57 = vadd.f32 %v278_v55, %v42_v48  ;;  %v331_v62 = vadd.f32 %v321_v59, %v44_v58 }
  0xea   :  { %1685 = vtanh.f32 %v327_v49  ;;  %v337_v41 = vmul.f32 0.5, %v330_v34 }
  0xeb   :  { %1687 = vtanh.f32 %v335_v56  ;;  %v336_v60 = vmul.f32 0.5, %v329_v57 }
  0xed   :  { %1689 = vtanh.f32 %v336_v60 }
  0xee   :  { %1691 = vtanh.f32 %v331_v62 }
  0xef   :  { %1693 = vtanh.f32 %v334_v38  ;;  %v1555_v38 = vld [vmem:[%s2680_s0 + $0x20] sm:$0xff] }
  0xf0   :  { %1695 = vtanh.f32 %v337_v41  ;;  %v1557_v41 = vld [vmem:[%s2680_s0 + $0x30] sm:$0xff] }
  0xf4   :  { %v1682_v35 = vpop.eup %1681 }
  0xf5   :  { %v344_v37 = vadd.f32 1.0, %v1682_v35 }
  0xf6   :  { %v1684_v39 = vpop.eup %1683 }
  0xf7   :  { %v1686_v42 = vpop.eup %1685  ;;  %v350_v43 = vmul.f32 0.5, %v344_v37  ;;  %v345_v44 = vadd.f32 1.0, %v1684_v39  ;;  %v375_v39 = vunpack.c.l.bf16 %v1555_v38 }
  0xf8   :  { %v1688_v45 = vpop.eup %1687 }
  0xf9   :  { %v351_v46 = vmul.f32 0.5, %v345_v44  ;;  %v347_v47 = vadd.f32 1.0, %v1688_v45  ;;  %v360_v49 = vmul.f32 %v1686_v42, %v350_v43  ;;  %v376_v42 = vunpack.c.h.bf16 %v1555_v38 }
  0xfa   :  { %v1690_v48 = vpop.eup %1689 }
  0xfb   :  { %v358_v36 = vmul.f32 0.0, %v351_v46  ;;  %v353_v50 = vmul.f32 0.5, %v347_v47  ;;  %v348_v40 = vadd.f32 1.0, %v1690_v48  ;;  %v1692_v53 = vpop.eup %1691  ;;  %v1556_v46 = vld [vmem:[%s2680_s0 + $0x28] sm:$0xff]  ;;  %v379_v47 = vunpack.c.l.bf16 %v1557_v41 }
  0xfc   :  { %v1694_v57 = vpop.eup %1693 }
  0xfd   :  { %v2144_v51 = vadd.f32 %v360_v49, %v358_v36  ;;  %v354_v52 = vmul.f32 0.5, %v348_v40  ;;  %v361_v55 = vmul.f32 %v1692_v53, %v353_v50  ;;  %v1696_v58 = vpop.eup %1695  ;;  %v346_v59 = vadd.f32 1.0, %v1694_v57 }
  0xfe   :  { %v349_v60 = vadd.f32 1.0, %v1696_v58  ;;  %v378_v36 = vunpack.c.h.bf16 %v1556_v46 }
  0xff   :  { %v359_v54 = vmul.f32 0.0, %v354_v52  ;;  %1697 = vtanh.f32 %v2144_v51  ;;  %v352_v62 = vmul.f32 0.5, %v346_v59  ;;  %v380_v52 = vunpack.c.h.bf16 %v1557_v41  ;;  %v1558_v59 = vld [vmem:[%s2680_s0 + $0x38] sm:$0xff] }
 0x100   :  { %v355_v63 = vmul.f32 0.5, %v349_v60  ;;  %v381_v38 = vunpack.c.l.bf16 %v1558_v59 }
 0x101   :  { %v2147_v56 = vadd.f32 %v361_v55, %v359_v54 }
 0x103   :  { %1699 = vtanh.f32 %v2147_v56 }
 0x10c   :  { %v1698_v61 = vpop.eup %1697 }
 0x10d   :  { %v366_v34 = vmul.f32 %v1698_v61, %v352_v62 }
 0x110   :  { %v1700_v33 = vpop.eup %1699 }
 0x111   :  { %v367_v35 = vmul.f32 %v1700_v33, %v355_v63  ;;  %v382_v63 = vunpack.c.h.bf16 %v1558_v59 }
 0x113   :  { %v383_v37 = vpack.c.bf16 %v367_v35, %v366_v34  ;;  %v377_v35 = vunpack.c.l.bf16 %v1556_v46 }
 0x115   :  { %417 = vmatmul.mubr.bf16.vlgmr.msra.gmra.mxu0 %v383_v37  ;;  %460 = vmatmul.mubr.bf16.vlgmr.msra.gmra.mxu1 %v383_v37 }
 0x116   :  { %531 = vmatpush1.bf16.msra.mxu0 %v1918_v3  ;;  %574 = vmatpush1.bf16.msra.mxu1 %v1923_v4 }
 0x117   :  { %532 = vmatprep.subr.bf16.mxu0 %v1929_v5  ;;  %575 = vmatprep.subr.bf16.mxu1 %v1936_v6 }
 0x118   :  { %562 = vmatprep.mubr.bf16.mxu0 %v1873_v1  ;;  %605 = vmatprep.mubr.bf16.mxu1 %v1873_v1 }
 0x11a   :  { %533 = vmatpush1.bf16.msra.mxu0 %v1941_v7  ;;  %576 = vmatpush1.bf16.msra.mxu1 %v1947_v8 }
 0x11b   :  { %534 = vmatprep.subr.bf16.mxu0 %v1953_v9  ;;  %577 = vmatprep.subr.bf16.mxu1 %v1958_v10 }
 0x11e   :  { %535 = vmatpush1.bf16.msra.mxu0 %v1963_v11  ;;  %578 = vmatpush1.bf16.msra.mxu1 %v1968_v12 }
 0x11f   :  { %536 = vmatprep.subr.bf16.mxu0 %v1975_v13  ;;  %579 = vmatprep.subr.bf16.mxu1 %v1982_v14 }
 0x122   :  { %537 = vmatpush1.bf16.msra.mxu0 %v1987_v15  ;;  %580 = vmatpush1.bf16.msra.mxu1 %v1994_v16 }
 0x123   :  { %538 = vmatprep.subr.bf16.mxu0 %v1999_v17  ;;  %581 = vmatprep.subr.bf16.mxu1 %v2006_v18 }
 0x126   :  { %539 = vmatpush1.bf16.msra.mxu0 %v2011_v19  ;;  %582 = vmatpush1.bf16.msra.mxu1 %v2016_v20 }
 0x127   :  { %540 = vmatprep.subr.bf16.mxu0 %v2023_v21  ;;  %583 = vmatprep.subr.bf16.mxu1 %v2030_v22 }
 0x12a   :  { %541 = vmatpush1.bf16.msra.mxu0 %v2037_v23  ;;  %584 = vmatpush1.bf16.msra.mxu1 %v2042_v24 }
 0x12b   :  { %542 = vmatprep.subr.bf16.mxu0 %v2049_v25  ;;  %585 = vmatprep.subr.bf16.mxu1 %v2054_v26 }
 0x12e   :  { %543 = vmatpush1.bf16.msra.mxu0 %v2061_v27  ;;  %586 = vmatpush1.bf16.msra.mxu1 %v2066_v28 }
 0x12f   :  { %544 = vmatprep.subr.bf16.mxu0 %v2073_v29  ;;  %587 = vmatprep.subr.bf16.mxu1 %v2078_v30 }
 0x132   :  { %545 = vmatpush1.bf16.msra.mxu0 %v2085_v31  ;;  %588 = vmatpush1.bf16.msra.mxu1 %v2090_v32 }
 0x133   :  { %676 = vmatprep.subr.bf16.mxu0 %v1905_v0  ;;  %719 = vmatprep.subr.bf16.mxu1 %v1912_v2 }
 0x1d5   :  { %v418_v43 = vpop.f32.mrf.mxu0  ;;  %v461_v44 = vpop.f32.mrf.mxu1 }
 0x1d6   :  { %v470_v45 = vadd.f32 %v418_v43, %v375_v39  ;;  %v472_v39 = vadd.f32 %v461_v44, %v377_v35 }
 0x1d7   :  { %v420_v48 = vpop.f32.mrf.mxu0  ;;  %v463_v49 = vpop.f32.mrf.mxu1 }
 0x1d8   :  { %v478_v50 = vmul.f32 0.5, %v470_v45  ;;  %v471_v40 = vadd.f32 %v420_v48, %v376_v42  ;;  %v473_v58 = vadd.f32 %v463_v49, %v378_v36  ;;  %v480_v45 = vmul.f32 0.5, %v472_v39 }
 0x1d9   :  { %v422_v53 = vpop.f32.mrf.mxu0  ;;  %v465_v54 = vpop.f32.mrf.mxu1 }
 0x1da   :  { %1701 = vtanh.f32 %v478_v50  ;;  %v479_v55 = vmul.f32 0.5, %v471_v40  ;;  %v474_v57 = vadd.f32 %v422_v53, %v379_v47  ;;  %v476_v41 = vadd.f32 %v465_v54, %v381_v38 }
 0x1db   :  { %v424_v60 = vpop.f32.mrf.mxu0  ;;  %v467_v33 = vpop.f32.mrf.mxu1 }
 0x1dc   :  { %1703 = vtanh.f32 %v479_v55  ;;  %v481_v61 = vmul.f32 0.5, %v474_v57  ;;  %v475_v62 = vadd.f32 %v424_v60, %v380_v52  ;;  %v477_v37 = vadd.f32 %v467_v33, %v382_v63 }
 0x1dd   :  { %v483_v48 = vmul.f32 0.5, %v476_v41 }
 0x1de   :  { %1705 = vtanh.f32 %v481_v61  ;;  %v482_v34 = vmul.f32 0.5, %v475_v62 }
 0x1df   :  { %1707 = vtanh.f32 %v473_v58 }
 0x1e0   :  { %1709 = vtanh.f32 %v482_v34 }
 0x1e1   :  { %1711 = vtanh.f32 %v477_v37 }
 0x1e2   :  { %1713 = vtanh.f32 %v480_v45 }
 0x1e3   :  { %1715 = vtanh.f32 %v483_v48  ;;  %v1561_v48 = vld [vmem:[%s2680_s0 + $0x50] sm:$0xff] }
 0x1e7   :  { %v1702_v42 = vpop.eup %1701 }
 0x1e8   :  { %v490_v43 = vadd.f32 1.0, %v1702_v42 }
 0x1e9   :  { %v1704_v47 = vpop.eup %1703 }
 0x1ea   :  { %v496_v36 = vmul.f32 0.5, %v490_v43  ;;  %v491_v49 = vadd.f32 1.0, %v1704_v47 }
 0x1eb   :  { %v1706_v50 = vpop.eup %1705 }
 0x1ec   :  { %v1708_v40 = vpop.eup %1707  ;;  %v497_v52 = vmul.f32 0.5, %v491_v49  ;;  %v493_v53 = vadd.f32 1.0, %v1706_v50 }
 0x1ed   :  { %v1710_v55 = vpop.eup %1709  ;;  %v506_v57 = vmul.f32 %v1708_v40, %v496_v36 }
 0x1ee   :  { %v504_v46 = vmul.f32 %v497_v52, %v2144_v51  ;;  %v499_v44 = vmul.f32 0.5, %v493_v53  ;;  %v494_v58 = vadd.f32 1.0, %v1710_v55  ;;  %v1712_v60 = vpop.eup %1711  ;;  %v1560_v52 = vld [vmem:[%s2680_s0 + $0x48] sm:$0xff]  ;;  %v525_v53 = vunpack.c.l.bf16 %v1561_v48 }
 0x1ef   :  { %v1714_v33 = vpop.eup %1713 }
 0x1f0   :  { %v2197_v54 = vadd.f32 %v506_v57, %v504_v46  ;;  %v500_v59 = vmul.f32 0.5, %v494_v58  ;;  %v507_v62 = vmul.f32 %v1712_v60, %v499_v44  ;;  %v1716_v34 = vpop.eup %1715  ;;  %v492_v35 = vadd.f32 1.0, %v1714_v33 }
 0x1f1   :  { %v495_v51 = vadd.f32 1.0, %v1716_v34  ;;  %v524_v46 = vunpack.c.h.bf16 %v1560_v52 }
 0x1f2   :  { %v505_v61 = vmul.f32 %v500_v59, %v2147_v56  ;;  %1717 = vtanh.f32 %v2197_v54  ;;  %v498_v38 = vmul.f32 0.5, %v492_v35  ;;  %v1559_v56 = vld [vmem:[%s2680_s0 + $0x40] sm:$0xff]  ;;  %v526_v59 = vunpack.c.h.bf16 %v1561_v48  ;;  %v1562_v35 = vld [vmem:[%s2680_s0 + $0x58] sm:$0xff] }
 0x1f3   :  { %v501_v39 = vmul.f32 0.5, %v495_v51  ;;  %v521_v47 = vunpack.c.l.bf16 %v1559_v56  ;;  %v522_v36 = vunpack.c.h.bf16 %v1559_v56  ;;  %v527_v56 = vunpack.c.l.bf16 %v1562_v35 }
 0x1f4   :  { %v2201_v63 = vadd.f32 %v507_v62, %v505_v61 }
 0x1f6   :  { %1719 = vtanh.f32 %v2201_v63 }
 0x1ff   :  { %v1718_v37 = vpop.eup %1717 }
 0x200   :  { %v512_v42 = vmul.f32 %v1718_v37, %v498_v38 }
 0x203   :  { %v1720_v41 = vpop.eup %1719 }
 0x204   :  { %v513_v43 = vmul.f32 %v1720_v41, %v501_v39  ;;  %v528_v39 = vunpack.c.h.bf16 %v1562_v35 }
 0x206   :  { %v529_v45 = vpack.c.bf16 %v513_v43, %v512_v42  ;;  %v523_v43 = vunpack.c.l.bf16 %v1560_v52 }
 0x208   :  { %563 = vmatmul.mubr.bf16.vlgmr.msra.gmra.mxu0 %v529_v45  ;;  %606 = vmatmul.mubr.bf16.vlgmr.msra.gmra.mxu1 %v529_v45 }
 0x209   :  { %677 = vmatpush1.bf16.msra.mxu0 %v1918_v3  ;;  %720 = vmatpush1.bf16.msra.mxu1 %v1923_v4 }
 0x20a   :  { %678 = vmatprep.subr.bf16.mxu0 %v1929_v5  ;;  %721 = vmatprep.subr.bf16.mxu1 %v1936_v6 }
 0x20b   :  { %708 = vmatprep.mubr.bf16.mxu0 %v1873_v1  ;;  %751 = vmatprep.mubr.bf16.mxu1 %v1873_v1 }
 0x20d   :  { %679 = vmatpush1.bf16.msra.mxu0 %v1941_v7  ;;  %722 = vmatpush1.bf16.msra.mxu1 %v1947_v8 }
 0x20e   :  { %680 = vmatprep.subr.bf16.mxu0 %v1953_v9  ;;  %723 = vmatprep.subr.bf16.mxu1 %v1958_v10 }
 0x211   :  { %681 = vmatpush1.bf16.msra.mxu0 %v1963_v11  ;;  %724 = vmatpush1.bf16.msra.mxu1 %v1968_v12 }
 0x212   :  { %682 = vmatprep.subr.bf16.mxu0 %v1975_v13  ;;  %725 = vmatprep.subr.bf16.mxu1 %v1982_v14 }
 0x215   :  { %683 = vmatpush1.bf16.msra.mxu0 %v1987_v15  ;;  %726 = vmatpush1.bf16.msra.mxu1 %v1994_v16 }
 0x216   :  { %684 = vmatprep.subr.bf16.mxu0 %v1999_v17  ;;  %727 = vmatprep.subr.bf16.mxu1 %v2006_v18 }
 0x219   :  { %685 = vmatpush1.bf16.msra.mxu0 %v2011_v19  ;;  %728 = vmatpush1.bf16.msra.mxu1 %v2016_v20 }
 0x21a   :  { %686 = vmatprep.subr.bf16.mxu0 %v2023_v21  ;;  %729 = vmatprep.subr.bf16.mxu1 %v2030_v22 }
 0x21d   :  { %687 = vmatpush1.bf16.msra.mxu0 %v2037_v23  ;;  %730 = vmatpush1.bf16.msra.mxu1 %v2042_v24 }
 0x21e   :  { %688 = vmatprep.subr.bf16.mxu0 %v2049_v25  ;;  %731 = vmatprep.subr.bf16.mxu1 %v2054_v26 }
 0x221   :  { %689 = vmatpush1.bf16.msra.mxu0 %v2061_v27  ;;  %732 = vmatpush1.bf16.msra.mxu1 %v2066_v28 }
 0x222   :  { %690 = vmatprep.subr.bf16.mxu0 %v2073_v29  ;;  %733 = vmatprep.subr.bf16.mxu1 %v2078_v30 }
 0x225   :  { %691 = vmatpush1.bf16.msra.mxu0 %v2085_v31  ;;  %734 = vmatpush1.bf16.msra.mxu1 %v2090_v32 }
 0x226   :  { %822 = vmatprep.subr.bf16.mxu0 %v1905_v0  ;;  %865 = vmatprep.subr.bf16.mxu1 %v1912_v2 }
 0x2c8   :  { %v564_v49 = vpop.f32.mrf.mxu0  ;;  %v607_v50 = vpop.f32.mrf.mxu1 }
 0x2c9   :  { %v616_v40 = vadd.f32 %v564_v49, %v521_v47  ;;  %v618_v47 = vadd.f32 %v607_v50, %v523_v43 }
 0x2ca   :  { %v566_v55 = vpop.f32.mrf.mxu0  ;;  %v609_v57 = vpop.f32.mrf.mxu1 }
 0x2cb   :  { %v624_v44 = vmul.f32 0.5, %v616_v40  ;;  %v617_v58 = vadd.f32 %v566_v55, %v522_v36  ;;  %v619_v34 = vadd.f32 %v609_v57, %v524_v46  ;;  %v626_v40 = vmul.f32 0.5, %v618_v47 }
 0x2cc   :  { %v568_v60 = vpop.f32.mrf.mxu0  ;;  %v611_v61 = vpop.f32.mrf.mxu1 }
 0x2cd   :  { %1721 = vtanh.f32 %v624_v44  ;;  %v625_v62 = vmul.f32 0.5, %v617_v58  ;;  %v620_v33 = vadd.f32 %v568_v60, %v525_v53  ;;  %v622_v48 = vadd.f32 %v611_v61, %v527_v56 }
 0x2ce   :  { %v570_v51 = vpop.f32.mrf.mxu0  ;;  %v613_v41 = vpop.f32.mrf.mxu1 }
 0x2cf   :  { %1723 = vtanh.f32 %v625_v62  ;;  %v627_v37 = vmul.f32 0.5, %v620_v33  ;;  %v621_v38 = vadd.f32 %v570_v51, %v526_v59  ;;  %v623_v45 = vadd.f32 %v613_v41, %v528_v39 }
 0x2d0   :  { %v629_v55 = vmul.f32 0.5, %v622_v48 }
 0x2d1   :  { %1725 = vtanh.f32 %v627_v37  ;;  %v628_v42 = vmul.f32 0.5, %v621_v38 }
 0x2d2   :  { %1727 = vtanh.f32 %v619_v34 }
 0x2d3   :  { %1729 = vtanh.f32 %v628_v42 }
 0x2d4   :  { %1731 = vtanh.f32 %v623_v45 }
 0x2d5   :  { %1733 = vtanh.f32 %v626_v40 }
 0x2d6   :  { %1735 = vtanh.f32 %v629_v55  ;;  %v1566_v55 = vld [vmem:[%s2680_s0 + $0x78] sm:$0xff] }
 0x2da   :  { %v1722_v36 = vpop.eup %1721 }
 0x2db   :  { %v636_v49 = vadd.f32 1.0, %v1722_v36 }
 0x2dc   :  { %v1724_v53 = vpop.eup %1723 }
 0x2dd   :  { %v642_v46 = vmul.f32 0.5, %v636_v49  ;;  %v637_v57 = vadd.f32 1.0, %v1724_v53 }
 0x2de   :  { %v1726_v44 = vpop.eup %1725 }
 0x2df   :  { %v1728_v58 = vpop.eup %1727  ;;  %v643_v59 = vmul.f32 0.5, %v637_v57  ;;  %v639_v60 = vadd.f32 1.0, %v1726_v44 }
 0x2e0   :  { %v1730_v62 = vpop.eup %1729  ;;  %v652_v33 = vmul.f32 %v1728_v58, %v642_v46  ;;  %v674_v58 = vunpack.c.h.bf16 %v1566_v55 }
 0x2e1   :  { %v650_v52 = vmul.f32 %v643_v59, %v2197_v54  ;;  %v645_v50 = vmul.f32 0.5, %v639_v60  ;;  %v640_v34 = vadd.f32 1.0, %v1730_v62  ;;  %v1732_v51 = vpop.eup %1731 }
 0x2e2   :  { %v1734_v41 = vpop.eup %1733 }
 0x2e3   :  { %v2251_v61 = vadd.f32 %v652_v33, %v650_v52  ;;  %v646_v35 = vmul.f32 0.5, %v640_v34  ;;  %v653_v38 = vmul.f32 %v1732_v51, %v645_v50  ;;  %v1736_v42 = vpop.eup %1735  ;;  %v638_v43 = vadd.f32 1.0, %v1734_v41 }
 0x2e4   :  { %v641_v54 = vadd.f32 1.0, %v1736_v42  ;;  %v673_v33 = vunpack.c.l.bf16 %v1566_v55  ;;  %v2341_v55 = vld [vmem:[%s2679_s1 + $0xc0] ss:$16 sps:$4 sm:$0xff]  }
 0x2e5   :  { %v651_v37 = vmul.f32 %v646_v35, %v2201_v63  ;;  %1737 = vtanh.f32 %v2251_v61  ;;  %v644_v56 = vmul.f32 0.5, %v638_v43 }
 0x2e6   :  { %v647_v47 = vmul.f32 0.5, %v641_v54 }
 0x2e7   :  { %v2255_v39 = vadd.f32 %v653_v38, %v651_v37 }
 0x2e9   :  { %1739 = vtanh.f32 %v2255_v39 }
 0x2f2   :  { %v1738_v45 = vpop.eup %1737 }
 0x2f3   :  { %v658_v36 = vmul.f32 %v1738_v45, %v644_v56 }
 0x2f6   :  { %v1740_v48 = vpop.eup %1739 }
 0x2f7   :  { %v659_v49 = vmul.f32 %v1740_v48, %v647_v47 }
 0x2f9   :  { %v675_v40 = vpack.c.bf16 %v659_v49, %v658_v36 }
 0x2fb   :  { %709 = vmatmul.mubr.bf16.vlgmr.msra.gmra.mxu0 %v675_v40  ;;  %752 = vmatmul.mubr.bf16.vlgmr.msra.gmra.mxu1 %v675_v40 }
 0x2fc   :  { %823 = vmatpush1.bf16.msra.mxu0 %v1918_v3  ;;  %866 = vmatpush1.bf16.msra.mxu1 %v1923_v4  ;;  %v1563_v3 = vld [vmem:[%s2680_s0 + $0x60] sm:$0xff] }
 0x2fd   :  { %824 = vmatprep.subr.bf16.mxu0 %v1929_v5  ;;  %867 = vmatprep.subr.bf16.mxu1 %v1936_v6  ;;  %v667_v4 = vunpack.c.l.bf16 %v1563_v3  ;;  %v1565_v5 = vld [vmem:[%s2680_s0 + $0x70] sm:$0xff]  ;;  %v668_v6 = vunpack.c.h.bf16 %v1563_v3 }
 0x2fe   :  { %854 = vmatprep.mubr.bf16.mxu0 %v1873_v1  ;;  %897 = vmatprep.mubr.bf16.mxu1 %v1873_v1 }
 0x300   :  { %825 = vmatpush1.bf16.msra.mxu0 %v1941_v7  ;;  %868 = vmatpush1.bf16.msra.mxu1 %v1947_v8 }
 0x301   :  { %826 = vmatprep.subr.bf16.mxu0 %v1953_v9  ;;  %869 = vmatprep.subr.bf16.mxu1 %v1958_v10  ;;  %v1564_v10 = vld [vmem:[%s2680_s0 + $0x68] sm:$0xff] }
 0x302   :  { %v669_v62 = vunpack.c.l.bf16 %v1564_v10 }
 0x304   :  { %827 = vmatpush1.bf16.msra.mxu0 %v1963_v11  ;;  %870 = vmatpush1.bf16.msra.mxu1 %v1968_v12 }
 0x305   :  { %828 = vmatprep.subr.bf16.mxu0 %v1975_v13  ;;  %871 = vmatprep.subr.bf16.mxu1 %v1982_v14 }
 0x308   :  { %829 = vmatpush1.bf16.msra.mxu0 %v1987_v15  ;;  %872 = vmatpush1.bf16.msra.mxu1 %v1994_v16  ;;  %v672_v15 = vunpack.c.h.bf16 %v1565_v5 }
 0x309   :  { %830 = vmatprep.subr.bf16.mxu0 %v1999_v17  ;;  %873 = vmatprep.subr.bf16.mxu1 %v2006_v18 }
 0x30c   :  { %831 = vmatpush1.bf16.msra.mxu0 %v2011_v19  ;;  %874 = vmatpush1.bf16.msra.mxu1 %v2016_v20 }
 0x30d   :  { %832 = vmatprep.subr.bf16.mxu0 %v2023_v21  ;;  %875 = vmatprep.subr.bf16.mxu1 %v2030_v22 }
 0x310   :  { %833 = vmatpush1.bf16.msra.mxu0 %v2037_v23  ;;  %876 = vmatpush1.bf16.msra.mxu1 %v2042_v24 }
 0x311   :  { %834 = vmatprep.subr.bf16.mxu0 %v2049_v25  ;;  %877 = vmatprep.subr.bf16.mxu1 %v2054_v26 }
 0x314   :  { %835 = vmatpush1.bf16.msra.mxu0 %v2061_v27  ;;  %878 = vmatpush1.bf16.msra.mxu1 %v2066_v28 }
 0x315   :  { %836 = vmatprep.subr.bf16.mxu0 %v2073_v29  ;;  %879 = vmatprep.subr.bf16.mxu1 %v2078_v30 }
 0x318   :  { %837 = vmatpush1.bf16.msra.mxu0 %v2085_v31  ;;  %880 = vmatpush1.bf16.msra.mxu1 %v2090_v32 }
 0x319   :  { %968 = vmatprep.subr.bf16.mxu0 %v1905_v0  ;;  %1011 = vmatprep.subr.bf16.mxu1 %v1912_v2  ;;  %v671_v0 = vunpack.c.l.bf16 %v1565_v5  ;;  %v670_v2 = vunpack.c.h.bf16 %v1564_v10 }
 0x3bb   :  { %v710_v7 = vpop.f32.mrf.mxu0  ;;  %v753_v8 = vpop.f32.mrf.mxu1 }
 0x3bc   :  { %v762_v9 = vadd.f32 %v710_v7, %v667_v4  ;;  %v764_v50 = vadd.f32 %v753_v8, %v669_v62  ;;  %v2383_v62 = vld [vmem:[%s2679_s1 + $0x8c] ss:$16 sps:$4 sm:$0xff]  }
 0x3bd   :  { %v712_v11 = vpop.f32.mrf.mxu0  ;;  %v755_v12 = vpop.f32.mrf.mxu1 }
 0x3be   :  { %v770_v13 = vmul.f32 0.5, %v762_v9  ;;  %v763_v14 = vadd.f32 %v712_v11, %v668_v6  ;;  %v765_v53 = vadd.f32 %v755_v12, %v670_v2  ;;  %v772_v37 = vmul.f32 0.5, %v764_v50  ;;  %v2401_v50 = vld [vmem:[%s2679_s1 + $0x64] ss:$16 sps:$4 sm:$0xff]  }
 0x3bf   :  { %v714_v16 = vpop.f32.mrf.mxu0  ;;  %v757_v17 = vpop.f32.mrf.mxu1 }
 0x3c0   :  { %1741 = vtanh.f32 %v770_v13  ;;  %v771_v18 = vmul.f32 0.5, %v763_v14  ;;  %v766_v63 = vadd.f32 %v714_v16, %v671_v0  ;;  %v768_v34 = vadd.f32 %v757_v17, %v673_v33  ;;  %v2395_v33 = vld [vmem:[%s2679_s1 + $0x88] ss:$16 sps:$4 sm:$0xff]  }
 0x3c1   :  { %v716_v46 = vpop.f32.mrf.mxu0  ;;  %v759_v59 = vpop.f32.mrf.mxu1 }
 0x3c2   :  { %1743 = vtanh.f32 %v771_v18  ;;  %v773_v57 = vmul.f32 0.5, %v766_v63  ;;  %v767_v44 = vadd.f32 %v716_v46, %v672_v15  ;;  %v769_v52 = vadd.f32 %v759_v59, %v674_v58  ;;  %v2321_v18 = vld [vmem:[%s2679_s1 + $0xe8] ss:$16 sps:$4 sm:$0xff]   ;;  %v2327_v63 = vld [vmem:[%s2679_s1 + $0xc4] ss:$16 sps:$4 sm:$0xff]  }
 0x3c3   :  { %v775_v41 = vmul.f32 0.5, %v768_v34  ;;  %v2347_v46 = vld [vmem:[%s2679_s1 + $0xc8] ss:$16 sps:$4 sm:$0xff]   ;;  %v2365_v58 = vld [vmem:[%s2679_s1 + $0xa0] ss:$16 sps:$4 sm:$0xff]  }
 0x3c4   :  { %1745 = vtanh.f32 %v773_v57  ;;  %v774_v60 = vmul.f32 0.5, %v767_v44  ;;  %v2353_v57 = vld [vmem:[%s2679_s1 + $0xa4] ss:$16 sps:$4 sm:$0xff]   ;;  %v2359_v44 = vld [vmem:[%s2679_s1 + $0xac] ss:$16 sps:$4 sm:$0xff]  }
 0x3c5   :  { %1747 = vtanh.f32 %v765_v53  ;;  %v2333_v53 = vld [vmem:[%s2679_s1 + $0xcc] ss:$16 sps:$4 sm:$0xff]   ;;  %v2371_v59 = vld [vmem:[%s2679_s1 + $0xa8] ss:$16 sps:$4 sm:$0xff]  }
 0x3c6   :  { %1749 = vtanh.f32 %v774_v60  ;;  %v2377_v60 = vld [vmem:[%s2679_s1 + $0x84] ss:$16 sps:$4 sm:$0xff]   ;;  %v2407_v34 = vld [vmem:[%s2679_s1 + $0x6c] ss:$16 sps:$4 sm:$0xff]  }
 0x3c7   :  { %1751 = vtanh.f32 %v769_v52  ;;  %v2389_v52 = vld [vmem:[%s2679_s1 + $0x80] ss:$16 sps:$4 sm:$0xff]  }
 0x3c8   :  { %1753 = vtanh.f32 %v772_v37 }
 0x3c9   :  { %1755 = vtanh.f32 %v775_v41 }
 0x3cd   :  { %v1742_v35 = vpop.eup %1741 }
 0x3ce   :  { %v782_v51 = vadd.f32 1.0, %v1742_v35 }
 0x3cf   :  { %v1744_v38 = vpop.eup %1743 }
 0x3d0   :  { %v788_v42 = vmul.f32 0.5, %v782_v51  ;;  %v783_v43 = vadd.f32 1.0, %v1744_v38 }
 0x3d1   :  { %v1746_v54 = vpop.eup %1745 }
 0x3d2   :  { %v1748_v45 = vpop.eup %1747  ;;  %v789_v56 = vmul.f32 0.5, %v783_v43  ;;  %v785_v47 = vadd.f32 1.0, %v1746_v54 }
 0x3d3   :  { %v1750_v48 = vpop.eup %1749  ;;  %v798_v49 = vmul.f32 %v1748_v45, %v788_v42  ;;  %v1570_v45 = vld [vmem:[%s2680_s0 + $0x98] sm:$0xff] }
 0x3d4   :  { %v796_v36 = vmul.f32 %v789_v56, %v2251_v61  ;;  %v791_v40 = vmul.f32 0.5, %v785_v47  ;;  %v786_v3 = vadd.f32 1.0, %v1750_v48  ;;  %v1752_v6 = vpop.eup %1751 }
 0x3d5   :  { %v1754_v10 = vpop.eup %1753 }
 0x3d6   :  { %v2305_v4 = vadd.f32 %v798_v49, %v796_v36  ;;  %v792_v5 = vmul.f32 0.5, %v786_v3  ;;  %v799_v8 = vmul.f32 %v1752_v6, %v791_v40  ;;  %v1756_v0 = vpop.eup %1755  ;;  %v784_v11 = vadd.f32 1.0, %v1754_v10 }
 0x3d7   :  { %v787_v61 = vadd.f32 1.0, %v1756_v0  ;;  %v820_v36 = vunpack.c.h.bf16 %v1570_v45  ;;  %v819_v6 = vunpack.c.l.bf16 %v1570_v45 }
 0x3d8   :  { %v797_v7 = vmul.f32 %v792_v5, %v2255_v39  ;;  %1757 = vtanh.f32 %v2305_v4  ;;  %v790_v12 = vmul.f32 0.5, %v784_v11  ;;  %v2315_v39 = vld [vmem:[%s2679_s1 + $0xe0] ss:$16 sps:$4 sm:$0xff]  }
 0x3d9   :  { %v793_v13 = vmul.f32 0.5, %v787_v61 }
 0x3da   :  { %v2309_v9 = vadd.f32 %v799_v8, %v797_v7 }
 0x3dc   :  { %1759 = vtanh.f32 %v2309_v9 }
 0x3e5   :  { %v1758_v2 = vpop.eup %1757 }
 0x3e6   :  { %v804_v15 = vmul.f32 %v1758_v2, %v790_v12 }
 0x3e9   :  { %v1760_v14 = vpop.eup %1759 }
 0x3ea   :  { %v805_v16 = vmul.f32 %v1760_v14, %v793_v13 }
 0x3ec   :  { %v821_v17 = vpack.c.bf16 %v805_v16, %v804_v15 }
 0x3ee   :  { %855 = vmatmul.mubr.bf16.vlgmr.msra.gmra.mxu0 %v821_v17  ;;  %898 = vmatmul.mubr.bf16.vlgmr.msra.gmra.mxu1 %v821_v17 }
 0x3ef   :  { %969 = vmatpush1.bf16.msra.mxu0 %v2315_v39  ;;  %1012 = vmatpush1.bf16.msra.mxu1 %v2321_v18 }
 0x3f0   :  { %970 = vmatprep.subr.bf16.mxu0 %v2327_v63  ;;  %1013 = vmatprep.subr.bf16.mxu1 %v2333_v53 }
 0x3f1   :  { %1000 = vmatprep.mubr.bf16.mxu0 %v1873_v1  ;;  %1043 = vmatprep.mubr.bf16.mxu1 %v1873_v1 }
 0x3f3   :  { %971 = vmatpush1.bf16.msra.mxu0 %v2341_v55  ;;  %1014 = vmatpush1.bf16.msra.mxu1 %v2347_v46 }
 0x3f4   :  { %972 = vmatprep.subr.bf16.mxu0 %v2353_v57  ;;  %1015 = vmatprep.subr.bf16.mxu1 %v2359_v44 }
 0x3f7   :  { %973 = vmatpush1.bf16.msra.mxu0 %v2365_v58  ;;  %1016 = vmatpush1.bf16.msra.mxu1 %v2371_v59 }
 0x3f8   :  { %974 = vmatprep.subr.bf16.mxu0 %v2377_v60  ;;  %1017 = vmatprep.subr.bf16.mxu1 %v2383_v62 }
 0x3fb   :  { %975 = vmatpush1.bf16.msra.mxu0 %v2389_v52  ;;  %1018 = vmatpush1.bf16.msra.mxu1 %v2395_v33 }
 0x3fc   :  { %976 = vmatprep.subr.bf16.mxu0 %v2401_v50  ;;  %1019 = vmatprep.subr.bf16.mxu1 %v2407_v34 }
 0x3ff   :  { %977 = vmatpush1.bf16.msra.mxu0 %v2011_v19  ;;  %1020 = vmatpush1.bf16.msra.mxu1 %v2016_v20  ;;  %v2427_v19 = vld [vmem:[%s2679_s1 + $0xe4] ss:$16 sps:$4 sm:$0xff]   ;;  %v2433_v20 = vld [vmem:[%s2679_s1 + $0xec] ss:$16 sps:$4 sm:$0xff]  }
 0x400   :  { %978 = vmatprep.subr.bf16.mxu0 %v2023_v21  ;;  %1021 = vmatprep.subr.bf16.mxu1 %v2030_v22  ;;  %v1567_v21 = vld [vmem:[%s2680_s0 + $0x80] sm:$0xff] }
 0x401   :  { %v813_v22 = vunpack.c.l.bf16 %v1567_v21 }
 0x403   :  { %979 = vmatpush1.bf16.msra.mxu0 %v2037_v23  ;;  %1022 = vmatpush1.bf16.msra.mxu1 %v2042_v24  ;;  %v1569_v23 = vld [vmem:[%s2680_s0 + $0x90] sm:$0xff]  ;;  %v814_v24 = vunpack.c.h.bf16 %v1567_v21 }
 0x404   :  { %980 = vmatprep.subr.bf16.mxu0 %v2049_v25  ;;  %1023 = vmatprep.subr.bf16.mxu1 %v2054_v26  ;;  %v818_v37 = vunpack.c.h.bf16 %v1569_v23 }
 0x407   :  { %981 = vmatpush1.bf16.msra.mxu0 %v2061_v27  ;;  %1024 = vmatpush1.bf16.msra.mxu1 %v2066_v28  ;;  %v1568_v28 = vld [vmem:[%s2680_s0 + $0x88] sm:$0xff] }
 0x408   :  { %982 = vmatprep.subr.bf16.mxu0 %v2073_v29  ;;  %1025 = vmatprep.subr.bf16.mxu1 %v2078_v30  ;;  %v817_v29 = vunpack.c.l.bf16 %v1569_v23  ;;  %v815_v3 = vunpack.c.l.bf16 %v1568_v28 }
 0x40b   :  { %983 = vmatpush1.bf16.msra.mxu0 %v2085_v31  ;;  %1026 = vmatpush1.bf16.msra.mxu1 %v2090_v32  ;;  %v816_v31 = vunpack.c.h.bf16 %v1568_v28 }
 0x40c   :  { %1114 = vmatprep.subr.bf16.mxu0 %v2427_v19  ;;  %1157 = vmatprep.subr.bf16.mxu1 %v2433_v20 }
 0x4ae   :  { %v856_v25 = vpop.f32.mrf.mxu0  ;;  %v899_v26 = vpop.f32.mrf.mxu1 }
 0x4af   :  { %v908_v27 = vadd.f32 %v856_v25, %v813_v22  ;;  %v910_v7 = vadd.f32 %v899_v26, %v815_v3  ;;  %v2519_v3 = vld [vmem:[%s2679_s1 + $0x2c] ss:$16 sps:$4 sm:$0xff]  }
 0x4b0   :  { %v858_v30 = vpop.f32.mrf.mxu0  ;;  %v901_v32 = vpop.f32.mrf.mxu1 }
 0x4b1   :  { %v916_v35 = vmul.f32 0.5, %v908_v27  ;;  %v909_v51 = vadd.f32 %v858_v30, %v814_v24  ;;  %v911_v54 = vadd.f32 %v901_v32, %v816_v31  ;;  %v918_v11 = vmul.f32 0.5, %v910_v7  ;;  %v2537_v7 = vld [vmem:[%s2679_s1 + $0x4] ss:$16 sps:$4 sm:$0xff]  }
 0x4b2   :  { %v860_v38 = vpop.f32.mrf.mxu0  ;;  %v903_v41 = vpop.f32.mrf.mxu1 }
 0x4b3   :  { %1761 = vtanh.f32 %v916_v35  ;;  %v917_v42 = vmul.f32 0.5, %v909_v51  ;;  %v912_v43 = vadd.f32 %v860_v38, %v817_v29  ;;  %v914_v8 = vadd.f32 %v903_v41, %v819_v6  ;;  %v2531_v6 = vld [vmem:[%s2679_s1 + $0x28] ss:$16 sps:$4 sm:$0xff]  }
 0x4b4   :  { %v862_v56 = vpop.f32.mrf.mxu0  ;;  %v905_v49 = vpop.f32.mrf.mxu1 }
 0x4b5   :  { %1763 = vtanh.f32 %v917_v42  ;;  %v919_v47 = vmul.f32 0.5, %v912_v43  ;;  %v913_v48 = vadd.f32 %v862_v56, %v818_v37  ;;  %v915_v5 = vadd.f32 %v905_v49, %v820_v36  ;;  %v2483_v56 = vld [vmem:[%s2679_s1 + $0x68] ss:$16 sps:$4 sm:$0xff]   ;;  %v2501_v36 = vld [vmem:[%s2679_s1 + $0x40] ss:$16 sps:$4 sm:$0xff]  }
 0x4b6   :  { %v921_v2 = vmul.f32 0.5, %v914_v8  ;;  %v2507_v49 = vld [vmem:[%s2679_s1 + $0x48] ss:$16 sps:$4 sm:$0xff]   ;;  %v2543_v8 = vld [vmem:[%s2679_s1 + $0xc] ss:$16 sps:$4 sm:$0xff]  }
 0x4b7   :  { %1765 = vtanh.f32 %v919_v47  ;;  %v920_v40 = vmul.f32 0.5, %v913_v48  ;;  %v2489_v47 = vld [vmem:[%s2679_s1 + $0x44] ss:$16 sps:$4 sm:$0xff]   ;;  %v2495_v48 = vld [vmem:[%s2679_s1 + $0x4c] ss:$16 sps:$4 sm:$0xff]  }
 0x4b8   :  { %1767 = vtanh.f32 %v911_v54 }
 0x4b9   :  { %1769 = vtanh.f32 %v920_v40  ;;  %v2513_v40 = vld [vmem:[%s2679_s1 + $0x24] ss:$16 sps:$4 sm:$0xff]  }
 0x4ba   :  { %1771 = vtanh.f32 %v915_v5  ;;  %v2525_v5 = vld [vmem:[%s2679_s1 + $0x20] ss:$16 sps:$4 sm:$0xff]  }
 0x4bb   :  { %1773 = vtanh.f32 %v918_v11  ;;  %v1571_v11 = vld [vmem:[%s2680_s0 + $0xa0] sm:$0xff] }
 0x4bc   :  { %1775 = vtanh.f32 %v921_v2  ;;  %v1573_v2 = vld [vmem:[%s2680_s0 + $0xb0] sm:$0xff] }
 0x4c0   :  { %v1762_v10 = vpop.eup %1761 }
 0x4c1   :  { %v928_v0 = vadd.f32 1.0, %v1762_v10  ;;  %v2549_v10 = vld [vmem:[%s2679_s1] ss:$16 sps:$4 sm:$0xff]  }
 0x4c2   :  { %v1764_v61 = vpop.eup %1763 }
 0x4c3   :  { %v934_v12 = vmul.f32 0.5, %v928_v0  ;;  %v929_v13 = vadd.f32 1.0, %v1764_v61  ;;  %v2555_v0 = vld [vmem:[%s2679_s1 + $0x8] ss:$16 sps:$4 sm:$0xff]   ;;  %v959_v61 = vunpack.c.l.bf16 %v1571_v11 }
 0x4c4   :  { %v1766_v14 = vpop.eup %1765 }
 0x4c5   :  { %v1768_v15 = vpop.eup %1767  ;;  %v935_v16 = vmul.f32 0.5, %v929_v13  ;;  %v931_v17 = vadd.f32 1.0, %v1766_v14 }
 0x4c6   :  { %v1770_v21 = vpop.eup %1769  ;;  %v944_v23 = vmul.f32 %v1768_v15, %v934_v12  ;;  %v960_v12 = vunpack.c.h.bf16 %v1571_v11 }
 0x4c7   :  { %v942_v22 = vmul.f32 %v935_v16, %v2305_v4  ;;  %v937_v24 = vmul.f32 0.5, %v931_v17  ;;  %v932_v25 = vadd.f32 1.0, %v1770_v21  ;;  %v1772_v28 = vpop.eup %1771  ;;  %v1572_v16 = vld [vmem:[%s2680_s0 + $0xa8] sm:$0xff] }
 0x4c8   :  { %v1774_v32 = vpop.eup %1773 }
 0x4c9   :  { %v2449_v26 = vadd.f32 %v944_v23, %v942_v22  ;;  %v938_v27 = vmul.f32 0.5, %v932_v25  ;;  %v945_v30 = vmul.f32 %v1772_v28, %v937_v24  ;;  %v1776_v35 = vpop.eup %1775  ;;  %v930_v51 = vadd.f32 1.0, %v1774_v32  ;;  %v1574_v32 = vld [vmem:[%s2680_s0 + $0xb8] sm:$0xff] }
 0x4ca   :  { %v933_v4 = vadd.f32 1.0, %v1776_v35  ;;  %v964_v24 = vunpack.c.h.bf16 %v1573_v2 }
 0x4cb   :  { %v943_v29 = vmul.f32 %v938_v27, %v2309_v9  ;;  %1777 = vtanh.f32 %v2449_v26  ;;  %v936_v38 = vmul.f32 0.5, %v930_v51  ;;  %v2477_v9 = vld [vmem:[%s2679_s1 + $0x60] ss:$16 sps:$4 sm:$0xff]  }
 0x4cc   :  { %v939_v41 = vmul.f32 0.5, %v933_v4 }
 0x4cd   :  { %v2453_v31 = vadd.f32 %v945_v30, %v943_v29 }
 0x4cf   :  { %1779 = vtanh.f32 %v2453_v31 }
 0x4d8   :  { %v1778_v37 = vpop.eup %1777 }
 0x4d9   :  { %v950_v43 = vmul.f32 %v1778_v37, %v936_v38  ;;  %v966_v37 = vunpack.c.h.bf16 %v1574_v32 }
 0x4dc   :  { %v1780_v42 = vpop.eup %1779 }
 0x4dd   :  { %v951_v54 = vmul.f32 %v1780_v42, %v939_v41  ;;  %v961_v42 = vunpack.c.l.bf16 %v1572_v16 }
 0x4df   :  { %v967_v45 = vpack.c.bf16 %v951_v54, %v950_v43  ;;  %v965_v54 = vunpack.c.l.bf16 %v1574_v32 }
 0x4e1   :  { %1001 = vmatmul.mubr.bf16.vlgmr.msra.gmra.mxu0 %v967_v45  ;;  %1044 = vmatmul.mubr.bf16.vlgmr.msra.gmra.mxu1 %v967_v45 }
 0x4e2   :  { %1115 = vmatpush1.bf16.msra.mxu0 %v2315_v39  ;;  %1158 = vmatpush1.bf16.msra.mxu1 %v2321_v18 }
 0x4e3   :  { %1116 = vmatprep.subr.bf16.mxu0 %v2327_v63  ;;  %1159 = vmatprep.subr.bf16.mxu1 %v2333_v53 }
 0x4e4   :  { %1146 = vmatprep.mubr.bf16.mxu0 %v1873_v1  ;;  %1189 = vmatprep.mubr.bf16.mxu1 %v1873_v1 }
 0x4e6   :  { %1117 = vmatpush1.bf16.msra.mxu0 %v2341_v55  ;;  %1160 = vmatpush1.bf16.msra.mxu1 %v2347_v46 }
 0x4e7   :  { %1118 = vmatprep.subr.bf16.mxu0 %v2353_v57  ;;  %1161 = vmatprep.subr.bf16.mxu1 %v2359_v44 }
 0x4ea   :  { %1119 = vmatpush1.bf16.msra.mxu0 %v2365_v58  ;;  %1162 = vmatpush1.bf16.msra.mxu1 %v2371_v59 }
 0x4eb   :  { %1120 = vmatprep.subr.bf16.mxu0 %v2377_v60  ;;  %1163 = vmatprep.subr.bf16.mxu1 %v2383_v62 }
 0x4ee   :  { %1121 = vmatpush1.bf16.msra.mxu0 %v2389_v52  ;;  %1164 = vmatpush1.bf16.msra.mxu1 %v2395_v33 }
 0x4ef   :  { %1122 = vmatprep.subr.bf16.mxu0 %v2401_v50  ;;  %1165 = vmatprep.subr.bf16.mxu1 %v2407_v34 }
 0x4f2   :  { %1123 = vmatpush1.bf16.msra.mxu0 %v2477_v9  ;;  %1166 = vmatpush1.bf16.msra.mxu1 %v2483_v56 }
 0x4f3   :  { %1124 = vmatprep.subr.bf16.mxu0 %v2489_v47  ;;  %1167 = vmatprep.subr.bf16.mxu1 %v2495_v48 }
 0x4f6   :  { %1125 = vmatpush1.bf16.msra.mxu0 %v2501_v36  ;;  %1168 = vmatpush1.bf16.msra.mxu1 %v2507_v49 }
 0x4f7   :  { %1126 = vmatprep.subr.bf16.mxu0 %v2513_v40  ;;  %1169 = vmatprep.subr.bf16.mxu1 %v2519_v3 }
 0x4fa   :  { %1127 = vmatpush1.bf16.msra.mxu0 %v2525_v5  ;;  %1170 = vmatpush1.bf16.msra.mxu1 %v2531_v6 }
 0x4fb   :  { %1128 = vmatprep.subr.bf16.mxu0 %v2537_v7  ;;  %1171 = vmatprep.subr.bf16.mxu1 %v2543_v8 }
 0x4fe   :  { %1129 = vmatpush1.bf16.msra.mxu0 %v2549_v10  ;;  %1172 = vmatpush1.bf16.msra.mxu1 %v2555_v0 }
 0x4ff   :  { %1260 = vmatprep.subr.bf16.mxu0 %v2427_v19  ;;  %1303 = vmatprep.subr.bf16.mxu1 %v2433_v20  ;;  %v963_v19 = vunpack.c.l.bf16 %v1573_v2  ;;  %v962_v20 = vunpack.c.h.bf16 %v1572_v16 }
 0x5a1   :  { %v1002_v13 = vpop.f32.mrf.mxu0  ;;  %v1045_v14 = vpop.f32.mrf.mxu1 }
 0x5a2   :  { %v1054_v15 = vadd.f32 %v1002_v13, %v959_v61  ;;  %v1056_v45 = vadd.f32 %v1045_v14, %v961_v42 }
 0x5a3   :  { %v1004_v17 = vpop.f32.mrf.mxu0  ;;  %v1047_v21 = vpop.f32.mrf.mxu1 }
 0x5a4   :  { %v1062_v22 = vmul.f32 0.5, %v1054_v15  ;;  %v1055_v23 = vadd.f32 %v1004_v17, %v960_v12  ;;  %v1057_v30 = vadd.f32 %v1047_v21, %v962_v20  ;;  %v1064_v12 = vmul.f32 0.5, %v1056_v45 }
 0x5a5   :  { %v1006_v25 = vpop.f32.mrf.mxu0  ;;  %v1049_v27 = vpop.f32.mrf.mxu1 }
 0x5a6   :  { %1781 = vtanh.f32 %v1062_v22  ;;  %v1063_v28 = vmul.f32 0.5, %v1055_v23  ;;  %v1058_v29 = vadd.f32 %v1006_v25, %v963_v19  ;;  %v1060_v11 = vadd.f32 %v1049_v27, %v965_v54 }
 0x5a7   :  { %v1008_v35 = vpop.f32.mrf.mxu0  ;;  %v1051_v38 = vpop.f32.mrf.mxu1 }
 0x5a8   :  { %1783 = vtanh.f32 %v1063_v28  ;;  %v1065_v51 = vmul.f32 0.5, %v1058_v29  ;;  %v1059_v4 = vadd.f32 %v1008_v35, %v964_v24  ;;  %v1061_v43 = vadd.f32 %v1051_v38, %v966_v37 }
 0x5a9   :  { %v1067_v15 = vmul.f32 0.5, %v1060_v11 }
 0x5aa   :  { %1785 = vtanh.f32 %v1065_v51  ;;  %v1066_v41 = vmul.f32 0.5, %v1059_v4 }
 0x5ab   :  { %1787 = vtanh.f32 %v1057_v30 }
 0x5ac   :  { %1789 = vtanh.f32 %v1066_v41 }
 0x5ad   :  { %1791 = vtanh.f32 %v1061_v43 }
 0x5ae   :  { %1793 = vtanh.f32 %v1064_v12 }
 0x5af   :  { %1795 = vtanh.f32 %v1067_v15 }
 0x5b3   :  { %v1782_v61 = vpop.eup %1781 }
 0x5b4   :  { %v1074_v2 = vadd.f32 1.0, %v1782_v61 }
 0x5b5   :  { %v1784_v13 = vpop.eup %1783 }
 0x5b6   :  { %v1080_v19 = vmul.f32 0.5, %v1074_v2  ;;  %v1075_v17 = vadd.f32 1.0, %v1784_v13 }
 0x5b7   :  { %v1786_v20 = vpop.eup %1785 }
 0x5b8   :  { %v1788_v21 = vpop.eup %1787  ;;  %v1081_v22 = vmul.f32 0.5, %v1075_v17  ;;  %v1077_v23 = vadd.f32 1.0, %v1786_v20 }
 0x5b9   :  { %v1790_v24 = vpop.eup %1789  ;;  %v1090_v25 = vmul.f32 %v1788_v21, %v1080_v19 }
 0x5ba   :  { %v1088_v16 = vmul.f32 %v1081_v22, %v2449_v26  ;;  %v1083_v14 = vmul.f32 0.5, %v1077_v23  ;;  %v1078_v28 = vadd.f32 1.0, %v1790_v24  ;;  %v1792_v30 = vpop.eup %1791 }
 0x5bb   :  { %v1794_v4 = vpop.eup %1793 }
 0x5bc   :  { %v2573_v27 = vadd.f32 %v1090_v25, %v1088_v16  ;;  %v1084_v29 = vmul.f32 0.5, %v1078_v28  ;;  %v1091_v35 = vmul.f32 %v1792_v30, %v1083_v14  ;;  %v1796_v37 = vpop.eup %1795  ;;  %v1076_v38 = vadd.f32 1.0, %v1794_v4 }
 0x5bd   :  { %v1079_v26 = vadd.f32 1.0, %v1796_v37 }
 0x5be   :  { %v1089_v32 = vmul.f32 %v1084_v29, %v2453_v31  ;;  %1797 = vtanh.f32 %v2573_v27  ;;  %v1082_v42 = vmul.f32 0.5, %v1076_v38 }
 0x5bf   :  { %v1085_v43 = vmul.f32 0.5, %v1079_v26 }
 0x5c0   :  { %v2577_v51 = vadd.f32 %v1091_v35, %v1089_v32 }
 0x5c2   :  { %1799 = vtanh.f32 %v2577_v51 }
 0x5cb   :  { %v1798_v41 = vpop.eup %1797 }
 0x5cc   :  { %v1096_v45 = vmul.f32 %v1798_v41, %v1082_v42 }
 0x5cf   :  { %v1800_v54 = vpop.eup %1799 }
 0x5d0   :  { %v1097_v11 = vmul.f32 %v1800_v54, %v1085_v43 }
 0x5d2   :  { %v1113_v61 = vpack.c.bf16 %v1097_v11, %v1096_v45 }
 0x5d4   :  { %1147 = vmatmul.mubr.bf16.vlgmr.msra.gmra.mxu0 %v1113_v61  ;;  %1190 = vmatmul.mubr.bf16.vlgmr.msra.gmra.mxu1 %v1113_v61 }
 0x5d5   :  { %1261 = vmatpush1.bf16.msra.mxu0 %v2315_v39  ;;  %1304 = vmatpush1.bf16.msra.mxu1 %v2321_v18  ;;  %v1577_v18 = vld [vmem:[%s2680_s0 + $0xd0] sm:$0xff] }
 0x5d6   :  { %1262 = vmatprep.subr.bf16.mxu0 %v2327_v63  ;;  %1305 = vmatprep.subr.bf16.mxu1 %v2333_v53 }
 0x5d7   :  { %1292 = vmatprep.mubr.bf16.mxu0 %v1873_v1  ;;  %1335 = vmatprep.mubr.bf16.mxu1 %v1873_v1  ;;  %v1575_v1 = vld [vmem:[%s2680_s0 + $0xc0] sm:$0xff] }
 0x5d8   :  { %v1105_v39 = vunpack.c.l.bf16 %v1575_v1  ;;  %v1106_v63 = vunpack.c.h.bf16 %v1575_v1 }
 0x5d9   :  { %1263 = vmatpush1.bf16.msra.mxu0 %v2341_v55  ;;  %1306 = vmatpush1.bf16.msra.mxu1 %v2347_v46 }
 0x5da   :  { %1264 = vmatprep.subr.bf16.mxu0 %v2353_v57  ;;  %1307 = vmatprep.subr.bf16.mxu1 %v2359_v44  ;;  %v1576_v57 = vld [vmem:[%s2680_s0 + $0xc8] sm:$0xff]  ;;  %v1109_v44 = vunpack.c.l.bf16 %v1577_v18 }
 0x5dd   :  { %1265 = vmatpush1.bf16.msra.mxu0 %v2365_v58  ;;  %1308 = vmatpush1.bf16.msra.mxu1 %v2371_v59  ;;  %v1108_v59 = vunpack.c.h.bf16 %v1576_v57 }
 0x5de   :  { %1266 = vmatprep.subr.bf16.mxu0 %v2377_v60  ;;  %1309 = vmatprep.subr.bf16.mxu1 %v2383_v62 }
 0x5e1   :  { %1267 = vmatpush1.bf16.msra.mxu0 %v2389_v52  ;;  %1310 = vmatpush1.bf16.msra.mxu1 %v2395_v33  ;;  %v1110_v33 = vunpack.c.h.bf16 %v1577_v18  ;;  %v1875_v18 = vmov 0.0  }
 0x5e2   :  { %1268 = vmatprep.subr.bf16.mxu0 %v2401_v50  ;;  %1311 = vmatprep.subr.bf16.mxu1 %v2407_v34 }
 0x5e5   :  { %1269 = vmatpush1.bf16.msra.mxu0 %v2477_v9  ;;  %1312 = vmatpush1.bf16.msra.mxu1 %v2483_v56 }
 0x5e6   :  { %1270 = vmatprep.subr.bf16.mxu0 %v2489_v47  ;;  %1313 = vmatprep.subr.bf16.mxu1 %v2495_v48  ;;  %v1578_v47 = vld [vmem:[%s2680_s0 + $0xd8] sm:$0xff] }
 0x5e9   :  { %1271 = vmatpush1.bf16.msra.mxu0 %v2501_v36  ;;  %1314 = vmatpush1.bf16.msra.mxu1 %v2507_v49 }
 0x5ea   :  { %1272 = vmatprep.subr.bf16.mxu0 %v2513_v40  ;;  %1315 = vmatprep.subr.bf16.mxu1 %v2519_v3  ;;  %v1112_v40 = vunpack.c.h.bf16 %v1578_v47 }
 0x5ed   :  { %1273 = vmatpush1.bf16.msra.mxu0 %v2525_v5  ;;  %1316 = vmatpush1.bf16.msra.mxu1 %v2531_v6  ;;  %v1107_v6 = vunpack.c.l.bf16 %v1576_v57  ;;  %v1678_v57 = vld [vmem:[%s2681_s2 + $0x10] sm:$0xff]  }
 0x5ee   :  { %1274 = vmatprep.subr.bf16.mxu0 %v2537_v7  ;;  %1317 = vmatprep.subr.bf16.mxu1 %v2543_v8  ;;  %v1111_v8 = vunpack.c.l.bf16 %v1578_v47 }
 0x5f1   :  { %1275 = vmatpush1.bf16.msra.mxu0 %v2549_v10  ;;  %1318 = vmatpush1.bf16.msra.mxu1 %v2555_v0 }
 0x5f2   :  { %1601 = vmatprep.subr.bf16.mxu0 %v1875_v18 }
 0x694   :  { %v1148_v53 = vpop.f32.mrf.mxu0  ;;  %v1191_v55 = vpop.f32.mrf.mxu1 }
 0x695   :  { %v1200_v46 = vadd.f32 %v1148_v53, %v1105_v39  ;;  %v1202_v10 = vadd.f32 %v1191_v55, %v1107_v6  ;;  %v1675_v53 = vld [vmem:[%s2681_s2 + $0x28] sm:$0xff]   ;;  %v1676_v55 = vld [vmem:[%s2681_s2 + $0x20] sm:$0xff]  }
 0x696   :  { %v1150_v58 = vpop.f32.mrf.mxu0  ;;  %v1193_v60 = vpop.f32.mrf.mxu1 }
 0x697   :  { %v1208_v62 = vmul.f32 0.5, %v1200_v46  ;;  %v1201_v52 = vadd.f32 %v1150_v58, %v1106_v63  ;;  %v1203_v56 = vadd.f32 %v1193_v60, %v1108_v59  ;;  %v1210_v13 = vmul.f32 0.5, %v1202_v10  ;;  %v1674_v63 = vld [vmem:[%s2681_s2 + $0x30] sm:$0xff]   ;;  %v1677_v46 = vld [vmem:[%s2681_s2 + $0x18] sm:$0xff]   ;;  %v1680_v58 = vld [vmem:[%s2681_s2] sm:$0xff]  }
 0x698   :  { %v1152_v50 = vpop.f32.mrf.mxu0  ;;  %v1195_v34 = vpop.f32.mrf.mxu1  ;;  %v1579_v59 = vld [vmem:[%s2680_s0 + $0xe0] sm:$0xff]  ;;  %v1582_v10 = vld [vmem:[%s2680_s0 + $0xf8] sm:$0xff] }
 0x699   :  { %1801 = vtanh.f32 %v1208_v62  ;;  %v1209_v31 = vmul.f32 0.5, %v1201_v52  ;;  %v1204_v9 = vadd.f32 %v1152_v50, %v1109_v44  ;;  %v1206_v0 = vadd.f32 %v1195_v34, %v1111_v8  ;;  %v1679_v44 = vld [vmem:[%s2681_s2 + $0x8] sm:$0xff]   ;;  %v1581_v62 = vld [vmem:[%s2680_s0 + $0xf0] sm:$0xff] }
 0x69a   :  { %v1154_v48 = vpop.f32.mrf.mxu0  ;;  %v1197_v3 = vpop.f32.mrf.mxu1  ;;  %v1251_v60 = vunpack.c.l.bf16 %v1579_v59  ;;  %v1252_v52 = vunpack.c.h.bf16 %v1579_v59 }
 0x69b   :  { %1803 = vtanh.f32 %v1209_v31  ;;  %v1211_v36 = vmul.f32 0.5, %v1204_v9  ;;  %v1205_v49 = vadd.f32 %v1154_v48, %v1110_v33  ;;  %v1207_v7 = vadd.f32 %v1197_v3, %v1112_v40  ;;  %v1580_v31 = vld [vmem:[%s2680_s0 + $0xe8] sm:$0xff] }
 0x69c   :  { %v1213_v19 = vmul.f32 0.5, %v1206_v0  ;;  %v1255_v9 = vunpack.c.l.bf16 %v1581_v62  ;;  %v1254_v47 = vunpack.c.h.bf16 %v1580_v31  ;;  %v1256_v40 = vunpack.c.h.bf16 %v1581_v62 }
 0x69d   :  { %1805 = vtanh.f32 %v1211_v36  ;;  %v1212_v5 = vmul.f32 0.5, %v1205_v49 }
 0x69e   :  { %1807 = vtanh.f32 %v1203_v56 }
 0x69f   :  { %1809 = vtanh.f32 %v1212_v5 }
 0x6a0   :  { %1811 = vtanh.f32 %v1207_v7 }
 0x6a1   :  { %1813 = vtanh.f32 %v1210_v13  ;;  %v1258_v13 = vunpack.c.h.bf16 %v1582_v10 }
 0x6a2   :  { %1815 = vtanh.f32 %v1213_v19 }
 0x6a6   :  { %v1802_v2 = vpop.eup %1801 }
 0x6a7   :  { %v1220_v12 = vadd.f32 1.0, %v1802_v2 }
 0x6a8   :  { %v1804_v15 = vpop.eup %1803 }
 0x6a9   :  { %v1226_v17 = vmul.f32 0.5, %v1220_v12  ;;  %v1221_v20 = vadd.f32 1.0, %v1804_v15 }
 0x6aa   :  { %v1806_v21 = vpop.eup %1805 }
 0x6ab   :  { %v1808_v22 = vpop.eup %1807  ;;  %v1227_v23 = vmul.f32 0.5, %v1221_v20  ;;  %v1223_v24 = vadd.f32 1.0, %v1806_v21  ;;  %v1257_v21 = vunpack.c.l.bf16 %v1582_v10 }
 0x6ac   :  { %v1810_v16 = vpop.eup %1809  ;;  %v1236_v14 = vmul.f32 %v1808_v22, %v1226_v17  ;;  %v1253_v17 = vunpack.c.l.bf16 %v1580_v31 }
 0x6ad   :  { %v1234_v25 = vmul.f32 %v1227_v23, %v2573_v27  ;;  %v1229_v28 = vmul.f32 0.5, %v1223_v24  ;;  %v1224_v29 = vadd.f32 1.0, %v1810_v16  ;;  %v1812_v35 = vpop.eup %1811 }
 0x6ae   :  { %v1814_v26 = vpop.eup %1813 }
 0x6af   :  { %v2625_v30 = vadd.f32 %v1236_v14, %v1234_v25  ;;  %v1230_v32 = vmul.f32 0.5, %v1224_v29  ;;  %v1237_v37 = vmul.f32 %v1812_v35, %v1229_v28  ;;  %v1816_v41 = vpop.eup %1815  ;;  %v1222_v42 = vadd.f32 1.0, %v1814_v26 }
 0x6b0   :  { %v1225_v27 = vadd.f32 1.0, %v1816_v41 }
 0x6b1   :  { %v1235_v4 = vmul.f32 %v1230_v32, %v2577_v51  ;;  %1817 = vtanh.f32 %v2625_v30  ;;  %v1228_v54 = vmul.f32 0.5, %v1222_v42  ;;  %v1673_v51 = vld [vmem:[%s2681_s2 + $0x38] sm:$0xff]  }
 0x6b2   :  { %v1231_v45 = vmul.f32 0.5, %v1225_v27 }
 0x6b3   :  { %v2629_v38 = vadd.f32 %v1237_v37, %v1235_v4 }
 0x6b5   :  { %1819 = vtanh.f32 %v2629_v38 }
 0x6be   :  { %v1818_v43 = vpop.eup %1817 }
 0x6bf   :  { %v1242_v61 = vmul.f32 %v1818_v43, %v1228_v54 }
 0x6c2   :  { %v1820_v11 = vpop.eup %1819 }
 0x6c3   :  { %v1243_v1 = vmul.f32 %v1820_v11, %v1231_v45 }
 0x6c5   :  { %v1259_v39 = vpack.c.bf16 %v1243_v1, %v1242_v61 }
 0x6c7   :  { %1293 = vmatmul.mubr.bf16.vlgmr.msra.gmra.mxu0 %v1259_v39  ;;  %1336 = vmatmul.mubr.bf16.vlgmr.msra.gmra.mxu1 %v1259_v39 }
 0x6c8   :  { %1602 = vmatpush3.bf16.msra.mxu0 %v1673_v51  ;;  %1617 = vmatprep.mubr.msk.bf16.mxu0 %vm1876_vm0, %v1875_v18 }
 0x6c9   :  { %1603 = vmatprep.subr.bf16.mxu0 %v1875_v18 }
 0x6cc   :  { %1604 = vmatpush3.bf16.msra.mxu0 %v1674_v63 }
 0x6cd   :  { %1605 = vmatprep.subr.bf16.mxu0 %v1875_v18 }
 0x6d0   :  { %1606 = vmatpush3.bf16.msra.mxu0 %v1675_v53 }
 0x6d1   :  { %1607 = vmatprep.subr.bf16.mxu0 %v1875_v18 }
 0x6d4   :  { %1608 = vmatpush3.bf16.msra.mxu0 %v1676_v55 }
 0x6d5   :  { %1609 = vmatprep.subr.bf16.mxu0 %v1875_v18 }
 0x6d8   :  { %1610 = vmatpush3.bf16.msra.mxu0 %v1677_v46 }
 0x6d9   :  { %1611 = vmatprep.subr.bf16.mxu0 %v1875_v18 }
 0x6dc   :  { %1612 = vmatpush3.bf16.msra.mxu0 %v1678_v57 }
 0x6dd   :  { %1613 = vmatprep.subr.bf16.mxu0 %v1875_v18 }
 0x6e0   :  { %1614 = vmatpush3.bf16.msra.mxu0 %v1679_v44 }
 0x6e1   :  { %1615 = vmatprep.subr.bf16.mxu0 %v1875_v18 }
 0x6e4   :  { %1616 = vmatpush3.bf16.msra.mxu0 %v1680_v58 }
 0x787   :  { %v1294_v33 = vpop.f32.mrf.mxu0  ;;  %v1337_v50 = vpop.f32.mrf.mxu1 }
 0x788   :  { %v1346_v34 = vadd.f32 %v1294_v33, %v1251_v60  ;;  %v1348_v22 = vadd.f32 %v1337_v50, %v1253_v17 }
 0x789   :  { %v1296_v56 = vpop.f32.mrf.mxu0  ;;  %v1339_v48 = vpop.f32.mrf.mxu1 }
 0x78a   :  { %v1354_v36 = vmul.f32 0.5, %v1346_v34  ;;  %v1347_v49 = vadd.f32 %v1296_v56, %v1252_v52  ;;  %v1349_v8 = vadd.f32 %v1339_v48, %v1254_v47  ;;  %v1356_v25 = vmul.f32 0.5, %v1348_v22 }
 0x78b   :  { %v1298_v3 = vpop.f32.mrf.mxu0  ;;  %v1341_v5 = vpop.f32.mrf.mxu1 }
 0x78c   :  { %1821 = vtanh.f32 %v1354_v36  ;;  %v1355_v6 = vmul.f32 0.5, %v1347_v49  ;;  %v1350_v7 = vadd.f32 %v1298_v3, %v1255_v9  ;;  %v1352_v23 = vadd.f32 %v1341_v5, %v1257_v21 }
 0x78d   :  { %v1300_v0 = vpop.f32.mrf.mxu0  ;;  %v1343_v15 = vpop.f32.mrf.mxu1 }
 0x78e   :  { %1823 = vtanh.f32 %v1355_v6  ;;  %v1357_v2 = vmul.f32 0.5, %v1350_v7  ;;  %v1351_v12 = vadd.f32 %v1300_v0, %v1256_v40  ;;  %v1353_v20 = vadd.f32 %v1343_v15, %v1258_v13 }
 0x78f   :  { %v1359_v28 = vmul.f32 0.5, %v1352_v23 }
 0x790   :  { %1825 = vtanh.f32 %v1357_v2  ;;  %v1358_v19 = vmul.f32 0.5, %v1351_v12 }
 0x791   :  { %1827 = vtanh.f32 %v1349_v8 }
 0x792   :  { %1829 = vtanh.f32 %v1358_v19 }
 0x793   :  { %1831 = vtanh.f32 %v1353_v20 }
 0x794   :  { %1833 = vtanh.f32 %v1356_v25 }
 0x795   :  { %1835 = vtanh.f32 %v1359_v28 }
 0x799   :  { %v1822_v24 = vpop.eup %1821 }
 0x79a   :  { %v1366_v16 = vadd.f32 1.0, %v1822_v24 }
 0x79b   :  { %v1824_v14 = vpop.eup %1823 }
 0x79c   :  { %v1372_v29 = vmul.f32 0.5, %v1366_v16  ;;  %v1367_v32 = vadd.f32 1.0, %v1824_v14 }
 0x79d   :  { %v1826_v35 = vpop.eup %1825 }
 0x79e   :  { %v1828_v4 = vpop.eup %1827  ;;  %v1373_v37 = vmul.f32 0.5, %v1367_v32  ;;  %v1369_v26 = vadd.f32 1.0, %v1826_v35 }
 0x79f   :  { %v1830_v41 = vpop.eup %1829  ;;  %v1382_v27 = vmul.f32 %v1828_v4, %v1372_v29 }
 0x7a0   :  { %v1380_v42 = vmul.f32 %v1373_v37, %v2625_v30  ;;  %v1375_v43 = vmul.f32 0.5, %v1369_v26  ;;  %v1370_v54 = vadd.f32 1.0, %v1830_v41  ;;  %v1832_v61 = vpop.eup %1831 }
 0x7a1   :  { %v1834_v18 = vpop.eup %1833 }
 0x7a2   :  { %v1384_v45 = vadd.f32 %v1382_v27, %v1380_v42  ;;  %v1376_v11 = vmul.f32 0.5, %v1370_v54  ;;  %v1383_v39 = vmul.f32 %v1832_v61, %v1375_v43  ;;  %v1836_v63 = vpop.eup %1835  ;;  %v1368_v53 = vadd.f32 1.0, %v1834_v18 }
 0x7a3   :  { %v1371_v55 = vadd.f32 1.0, %v1836_v63 }
 0x7a4   :  { %v1381_v1 = vmul.f32 %v1376_v11, %v2629_v38  ;;  %1837 = vtanh.f32 %v1384_v45  ;;  %v1374_v57 = vmul.f32 0.5, %v1368_v53  ;;  %v1583_v38 = vld [vmem:[%s2682_s3] ss:$0 sm:$0xff] }
 0x7a5   :  { %v1377_v44 = vmul.f32 0.5, %v1371_v55 }
 0x7a6   :  { %v1385_v51 = vadd.f32 %v1383_v39, %v1381_v1 }
 0x7a8   :  { %1839 = vtanh.f32 %v1385_v51 }
 0x7b1   :  { %v1838_v46 = vpop.eup %1837 }
 0x7b2   :  { %v1388_v58 = vmul.f32 %v1838_v46, %v1374_v57 }
 0x7b5   :  { %v1840_v30 = vpop.eup %1839 }
 0x7b6   :  { %v1389_v59 = vmul.f32 %v1840_v30, %v1377_v44 }
 0x7b8   :  { %v1397_v60 = vpack.c.bf16 %v1389_v59, %v1388_v58 }
 0x7ba   :  { %1618 = vmatmul.mubr.bf16.vlgmr.msra.gmra.mxu0 %v1397_v60 }
 0x87a   :  { %v1503_v62 = vpop.f32.mrf.mxu0 }
 0x87b   :  { %v1504_v52 = vadd.f32 %v1583_v38, %v1503_v62 }
 0x87c   :  { %v1619_v33 = vpop.f32.mrf.mxu0 }
 0x87d   :  { %1510 = vst [vmem:[%s2683_s4] sm:$0xff] %v1504_v52 }
 0x87e   :  { %v1506_v50 = vpop.f32.mrf.mxu0 }
 0x87f   :  { %v1507_v34 = vadd.f32 %v1583_v38, %v1506_v50 }
 0x880   :  { %v1620_v31 = vpop.f32.mrf.mxu0 }
 0x881   :  { %1511 = vst [vmem:[%s2683_s4 + $0x8] sm:$0xff] %v1507_v34 }

// kernel: lstm_classifier_forward.5
= control target key start
LH: loop header
LB: loop body
LE: loop exit
PB: predicated region body
PF: predicated region fallthrough
CT: control target
= control target key end

     0   :  { %v3458_v1 = vmov 0   ;;  %v3459_v33 = vmov 0.0|0.0   ;;  %s4243_s1 = inlined_call_operand.vmem [shape: bf16[128,512], index: 1, kind: input, shape index: {}]   ;;  %s4244_s0 = inlined_call_operand.vmem [shape: bf16[128,512], index: 0, kind: input, shape index: {}]   ;;  %s4245_s2 = inlined_call_operand.vmem [shape: bf16[128,128], index: 2, kind: output, shape index: {}]  }
   0x1   :  { %v3478_v0 = vld [vmem:[%s4243_s1 + $0xe4] ss:$16 sps:$4 sm:$0xff]   ;;  %264 = vmatprep.mubr.bf16.mxu0 %v3458_v1  ;;  %307 = vmatprep.mubr.bf16.mxu1 %v3458_v1  ;;  %v3485_v2 = vld [vmem:[%s4243_s1 + $0xec] ss:$16 sps:$4 sm:$0xff]   ;;  %v3491_v3 = vld [vmem:[%s4243_s1 + $0xe0] ss:$16 sps:$4 sm:$0xff]  }
   0x2   :  { %232 = vmatprep.subr.bf16.mxu0 %v3478_v0  ;;  %v3496_v4 = vld [vmem:[%s4243_s1 + $0xe8] ss:$16 sps:$4 sm:$0xff]   ;;  %275 = vmatprep.subr.bf16.mxu1 %v3485_v2  ;;  %v3502_v5 = vld [vmem:[%s4243_s1 + $0xc4] ss:$16 sps:$4 sm:$0xff]   ;;  %v3509_v6 = vld [vmem:[%s4243_s1 + $0xcc] ss:$16 sps:$4 sm:$0xff]  }
   0x3   :  { %233 = vmatpush1.bf16.msra.mxu0 %v3491_v3  ;;  %276 = vmatpush1.bf16.msra.mxu1 %v3496_v4  ;;  %v3514_v7 = vld [vmem:[%s4243_s1 + $0xc0] ss:$16 sps:$4 sm:$0xff]   ;;  %v3520_v8 = vld [vmem:[%s4243_s1 + $0xc8] ss:$16 sps:$4 sm:$0xff]   ;;  %v3526_v9 = vld [vmem:[%s4243_s1 + $0xa4] ss:$16 sps:$4 sm:$0xff]  }
   0x4   :  { %234 = vmatprep.subr.bf16.mxu0 %v3502_v5  ;;  %277 = vmatprep.subr.bf16.mxu1 %v3509_v6  ;;  %v3531_v10 = vld [vmem:[%s4243_s1 + $0xac] ss:$16 sps:$4 sm:$0xff]   ;;  %v3536_v11 = vld [vmem:[%s4243_s1 + $0xa0] ss:$16 sps:$4 sm:$0xff]   ;;  %v3541_v12 = vld [vmem:[%s4243_s1 + $0xa8] ss:$16 sps:$4 sm:$0xff]  }
   0x5   :  { %v3548_v13 = vld [vmem:[%s4243_s1 + $0x84] ss:$16 sps:$4 sm:$0xff]   ;;  %v3555_v14 = vld [vmem:[%s4243_s1 + $0x8c] ss:$16 sps:$4 sm:$0xff]   ;;  %v3560_v15 = vld [vmem:[%s4243_s1 + $0x80] ss:$16 sps:$4 sm:$0xff]  }
   0x6   :  { %v3567_v16 = vld [vmem:[%s4243_s1 + $0x88] ss:$16 sps:$4 sm:$0xff]   ;;  %v3572_v17 = vld [vmem:[%s4243_s1 + $0x64] ss:$16 sps:$4 sm:$0xff]   ;;  %v3579_v18 = vld [vmem:[%s4243_s1 + $0x6c] ss:$16 sps:$4 sm:$0xff]  }
   0x7   :  { %235 = vmatpush1.bf16.msra.mxu0 %v3514_v7  ;;  %278 = vmatpush1.bf16.msra.mxu1 %v3520_v8  ;;  %v3584_v19 = vld [vmem:[%s4243_s1 + $0x60] ss:$16 sps:$4 sm:$0xff]   ;;  %v3589_v20 = vld [vmem:[%s4243_s1 + $0x68] ss:$16 sps:$4 sm:$0xff]   ;;  %v3596_v21 = vld [vmem:[%s4243_s1 + $0x44] ss:$16 sps:$4 sm:$0xff]  }
   0x8   :  { %236 = vmatprep.subr.bf16.mxu0 %v3526_v9  ;;  %279 = vmatprep.subr.bf16.mxu1 %v3531_v10  ;;  %v3603_v22 = vld [vmem:[%s4243_s1 + $0x4c] ss:$16 sps:$4 sm:$0xff]   ;;  %v3610_v23 = vld [vmem:[%s4243_s1 + $0x40] ss:$16 sps:$4 sm:$0xff]   ;;  %v3615_v24 = vld [vmem:[%s4243_s1 + $0x48] ss:$16 sps:$4 sm:$0xff]  }
   0x9   :  { %v3622_v25 = vld [vmem:[%s4243_s1 + $0x24] ss:$16 sps:$4 sm:$0xff]   ;;  %v3627_v26 = vld [vmem:[%s4243_s1 + $0x2c] ss:$16 sps:$4 sm:$0xff]   ;;  %v3632_v27 = vld [vmem:[%s4243_s1 + $0x20] ss:$16 sps:$4 sm:$0xff]  }
   0xa   :  { %v3637_v28 = vld [vmem:[%s4243_s1 + $0x28] ss:$16 sps:$4 sm:$0xff]   ;;  %v3642_v29 = vld [vmem:[%s4243_s1 + $0x4] ss:$16 sps:$4 sm:$0xff]   ;;  %v3647_v30 = vld [vmem:[%s4243_s1 + $0xc] ss:$16 sps:$4 sm:$0xff]  }
   0xb   :  { %237 = vmatpush1.bf16.msra.mxu0 %v3536_v11  ;;  %280 = vmatpush1.bf16.msra.mxu1 %v3541_v12  ;;  %v3656_v31 = vld [vmem:[%s4243_s1] ss:$16 sps:$4 sm:$0xff]   ;;  %v3661_v32 = vld [vmem:[%s4243_s1 + $0x8] ss:$16 sps:$4 sm:$0xff]  }
   0xc   :  { %238 = vmatprep.subr.bf16.mxu0 %v3548_v13  ;;  %281 = vmatprep.subr.bf16.mxu1 %v3555_v14  ;;  %v27_v34 = vld [vmem:[%s4244_s0] sm:$0xff]  ;;  %v28_v36 = vld [vmem:[%s4244_s0 + $0x8] sm:$0xff]  ;;  %v29_v37 = vld [vmem:[%s4244_s0 + $0x10] sm:$0xff] }
   0xd   :  { %v31_v35 = vunpack.c.l.bf16 %v27_v34  ;;  %v32_v38 = vunpack.c.h.bf16 %v27_v34  ;;  %v34_v41 = vunpack.c.h.bf16 %v28_v36  ;;  %v35_v43 = vunpack.c.l.bf16 %v29_v37  ;;  %v30_v51 = vld [vmem:[%s4244_s0 + $0x18] sm:$0xff] }
   0xe   :  { %v36_v48 = vunpack.c.h.bf16 %v29_v37  ;;  %v38_v58 = vunpack.c.h.bf16 %v30_v51  ;;  %v33_v61 = vunpack.c.l.bf16 %v28_v36  ;;  %v37_v63 = vunpack.c.l.bf16 %v30_v51 }
   0xf   :  { %239 = vmatpush1.bf16.msra.mxu0 %v3560_v15  ;;  %282 = vmatpush1.bf16.msra.mxu1 %v3567_v16 }
  0x10   :  { %240 = vmatprep.subr.bf16.mxu0 %v3572_v17  ;;  %283 = vmatprep.subr.bf16.mxu1 %v3579_v18 }
  0x13   :  { %241 = vmatpush1.bf16.msra.mxu0 %v3584_v19  ;;  %284 = vmatpush1.bf16.msra.mxu1 %v3589_v20 }
  0x14   :  { %242 = vmatprep.subr.bf16.mxu0 %v3596_v21  ;;  %285 = vmatprep.subr.bf16.mxu1 %v3603_v22 }
  0x17   :  { %243 = vmatpush1.bf16.msra.mxu0 %v3610_v23  ;;  %286 = vmatpush1.bf16.msra.mxu1 %v3615_v24 }
  0x18   :  { %244 = vmatprep.subr.bf16.mxu0 %v3622_v25  ;;  %287 = vmatprep.subr.bf16.mxu1 %v3627_v26 }
  0x1b   :  { %245 = vmatpush1.bf16.msra.mxu0 %v3632_v27  ;;  %288 = vmatpush1.bf16.msra.mxu1 %v3637_v28 }
  0x1c   :  { %246 = vmatprep.subr.bf16.mxu0 %v3642_v29  ;;  %289 = vmatprep.subr.bf16.mxu1 %v3647_v30 }
  0x1f   :  { %247 = vmatpush1.bf16.msra.mxu0 %v3656_v31  ;;  %290 = vmatpush1.bf16.msra.mxu1 %v3661_v32 }
  0x20   :  { %579 = vmatprep.subr.bf16.mxu0 %v3478_v0  ;;  %622 = vmatprep.subr.bf16.mxu1 %v3485_v2 }
  0x22   :  { %265 = vmatmul.mubr.bf16.vlgmr.msra.gmra.mxu0 %v3459_v33  ;;  %308 = vmatmul.mubr.bf16.vlgmr.msra.gmra.mxu1 %v3459_v33 }
  0x23   :  { %580 = vmatpush1.bf16.msra.mxu0 %v3491_v3  ;;  %623 = vmatpush1.bf16.msra.mxu1 %v3496_v4 }
  0x24   :  { %581 = vmatprep.subr.bf16.mxu0 %v3502_v5  ;;  %624 = vmatprep.subr.bf16.mxu1 %v3509_v6 }
  0x25   :  { %611 = vmatprep.mubr.bf16.mxu0 %v3458_v1  ;;  %654 = vmatprep.mubr.bf16.mxu1 %v3458_v1 }
  0x27   :  { %582 = vmatpush1.bf16.msra.mxu0 %v3514_v7  ;;  %625 = vmatpush1.bf16.msra.mxu1 %v3520_v8 }
  0x28   :  { %583 = vmatprep.subr.bf16.mxu0 %v3526_v9  ;;  %626 = vmatprep.subr.bf16.mxu1 %v3531_v10 }
  0x2b   :  { %584 = vmatpush1.bf16.msra.mxu0 %v3536_v11  ;;  %627 = vmatpush1.bf16.msra.mxu1 %v3541_v12 }
  0x2c   :  { %585 = vmatprep.subr.bf16.mxu0 %v3548_v13  ;;  %628 = vmatprep.subr.bf16.mxu1 %v3555_v14 }
  0x2f   :  { %586 = vmatpush1.bf16.msra.mxu0 %v3560_v15  ;;  %629 = vmatpush1.bf16.msra.mxu1 %v3567_v16 }
  0x30   :  { %587 = vmatprep.subr.bf16.mxu0 %v3572_v17  ;;  %630 = vmatprep.subr.bf16.mxu1 %v3579_v18 }
  0x33   :  { %588 = vmatpush1.bf16.msra.mxu0 %v3584_v19  ;;  %631 = vmatpush1.bf16.msra.mxu1 %v3589_v20 }
  0x34   :  { %589 = vmatprep.subr.bf16.mxu0 %v3596_v21  ;;  %632 = vmatprep.subr.bf16.mxu1 %v3603_v22 }
  0x37   :  { %590 = vmatpush1.bf16.msra.mxu0 %v3610_v23  ;;  %633 = vmatpush1.bf16.msra.mxu1 %v3615_v24 }
  0x38   :  { %591 = vmatprep.subr.bf16.mxu0 %v3622_v25  ;;  %634 = vmatprep.subr.bf16.mxu1 %v3627_v26 }
  0x3b   :  { %592 = vmatpush1.bf16.msra.mxu0 %v3632_v27  ;;  %635 = vmatpush1.bf16.msra.mxu1 %v3637_v28 }
  0x3c   :  { %593 = vmatprep.subr.bf16.mxu0 %v3642_v29  ;;  %636 = vmatprep.subr.bf16.mxu1 %v3647_v30 }
  0x3f   :  { %594 = vmatpush1.bf16.msra.mxu0 %v3656_v31  ;;  %637 = vmatpush1.bf16.msra.mxu1 %v3661_v32 }
  0x40   :  { %927 = vmatprep.subr.bf16.mxu0 %v3478_v0  ;;  %970 = vmatprep.subr.bf16.mxu1 %v3485_v2 }
  0xe2   :  { %v266_v39 = vpop.f32.mrf.mxu0  ;;  %v309_v40 = vpop.f32.mrf.mxu1 }
  0xe3   :  { %v318_v42 = vadd.f32 %v266_v39, %v31_v35  ;;  %v320_v33 = vadd.f32 %v309_v40, %v33_v61 }
  0xe4   :  { %v268_v44 = vpop.f32.mrf.mxu0  ;;  %v311_v45 = vpop.f32.mrf.mxu1 }
  0xe5   :  { %v326_v46 = vmul.f32 0.5, %v318_v42  ;;  %v319_v47 = vadd.f32 %v268_v44, %v32_v38  ;;  %v321_v49 = vadd.f32 %v311_v45, %v34_v41  ;;  %v328_v38 = vmul.f32 0.5, %v320_v33 }
  0xe6   :  { %v270_v50 = vpop.f32.mrf.mxu0  ;;  %v313_v52 = vpop.f32.mrf.mxu1 }
  0xe7   :  { %3298 = vtanh.f32 %v326_v46  ;;  %v327_v53 = vmul.f32 0.5, %v319_v47  ;;  %v322_v54 = vadd.f32 %v270_v50, %v35_v43  ;;  %v324_v34 = vadd.f32 %v313_v52, %v37_v63 }
  0xe8   :  { %v272_v55 = vpop.f32.mrf.mxu0  ;;  %v315_v59 = vpop.f32.mrf.mxu1 }
  0xe9   :  { %3300 = vtanh.f32 %v327_v53  ;;  %v329_v56 = vmul.f32 0.5, %v322_v54  ;;  %v323_v57 = vadd.f32 %v272_v55, %v36_v48  ;;  %v325_v62 = vadd.f32 %v315_v59, %v38_v58 }
  0xea   :  { %3302 = vtanh.f32 %v321_v49  ;;  %v331_v41 = vmul.f32 0.5, %v324_v34 }
  0xeb   :  { %3304 = vtanh.f32 %v329_v56  ;;  %v330_v60 = vmul.f32 0.5, %v323_v57 }
  0xed   :  { %3306 = vtanh.f32 %v330_v60 }
  0xee   :  { %3308 = vtanh.f32 %v325_v62 }
  0xef   :  { %3310 = vtanh.f32 %v328_v38  ;;  %v2857_v38 = vld [vmem:[%s4244_s0 + $0x20] sm:$0xff] }
  0xf0   :  { %3312 = vtanh.f32 %v331_v41  ;;  %v2859_v41 = vld [vmem:[%s4244_s0 + $0x30] sm:$0xff] }
  0xf4   :  { %v3299_v35 = vpop.eup %3298 }
  0xf5   :  { %v338_v37 = vadd.f32 1.0, %v3299_v35 }
  0xf6   :  { %v3301_v39 = vpop.eup %3300 }
  0xf7   :  { %v3303_v42 = vpop.eup %3302  ;;  %v344_v43 = vmul.f32 0.5, %v338_v37  ;;  %v339_v44 = vadd.f32 1.0, %v3301_v39  ;;  %v379_v39 = vunpack.c.l.bf16 %v2857_v38 }
  0xf8   :  { %v3305_v45 = vpop.eup %3304 }
  0xf9   :  { %v345_v46 = vmul.f32 0.5, %v339_v44  ;;  %v341_v47 = vadd.f32 1.0, %v3305_v45  ;;  %v354_v49 = vmul.f32 %v3303_v42, %v344_v43  ;;  %v380_v42 = vunpack.c.h.bf16 %v2857_v38 }
  0xfa   :  { %v3307_v48 = vpop.eup %3306 }
  0xfb   :  { %v352_v36 = vmul.f32 0.0, %v345_v46  ;;  %v347_v50 = vmul.f32 0.5, %v341_v47  ;;  %v342_v40 = vadd.f32 1.0, %v3307_v48  ;;  %v3309_v53 = vpop.eup %3308  ;;  %v2858_v46 = vld [vmem:[%s4244_s0 + $0x28] sm:$0xff] }
  0xfc   :  { %v3311_v57 = vpop.eup %3310 }
  0xfd   :  { %v3717_v51 = vadd.f32 %v354_v49, %v352_v36  ;;  %v348_v52 = vmul.f32 0.5, %v342_v40  ;;  %v355_v55 = vmul.f32 %v3309_v53, %v347_v50  ;;  %v3313_v58 = vpop.eup %3312  ;;  %v340_v59 = vadd.f32 1.0, %v3311_v57  ;;  %v2860_v57 = vld [vmem:[%s4244_s0 + $0x38] sm:$0xff] }
  0xfe   :  { %v343_v60 = vadd.f32 1.0, %v3313_v58  ;;  %v384_v50 = vunpack.c.h.bf16 %v2859_v41 }
  0xff   :  { %v353_v54 = vmul.f32 0.0, %v348_v52  ;;  %3314 = vtanh.f32 %v3717_v51  ;;  %v346_v62 = vmul.f32 0.5, %v340_v59 }
 0x100   :  { %v349_v63 = vmul.f32 0.5, %v343_v60 }
 0x101   :  { %v3720_v56 = vadd.f32 %v355_v55, %v353_v54 }
 0x103   :  { %3316 = vtanh.f32 %v3720_v56 }
 0x10c   :  { %v3315_v61 = vpop.eup %3314 }
 0x10d   :  { %v360_v34 = vmul.f32 %v3315_v61, %v346_v62  ;;  %v386_v61 = vunpack.c.h.bf16 %v2860_v57 }
 0x110   :  { %v3317_v33 = vpop.eup %3316 }
 0x111   :  { %v361_v35 = vmul.f32 %v3317_v33, %v349_v63  ;;  %v381_v33 = vunpack.c.l.bf16 %v2858_v46 }
 0x113   :  { %v362_v37 = vpack.c.bf16 %v361_v35, %v360_v34  ;;  %v385_v35 = vunpack.c.l.bf16 %v2860_v57 }
 0x115   :  { %3157 = vst [vmem:[%s4245_s2] sm:$0xff] %v362_v37   ;;  %612 = vmatmul.mubr.bf16.vlgmr.msra.gmra.mxu0 %v362_v37  ;;  %655 = vmatmul.mubr.bf16.vlgmr.msra.gmra.mxu1 %v362_v37 }
 0x116   :  { %928 = vmatpush1.bf16.msra.mxu0 %v3491_v3  ;;  %971 = vmatpush1.bf16.msra.mxu1 %v3496_v4 }
 0x117   :  { %929 = vmatprep.subr.bf16.mxu0 %v3502_v5  ;;  %972 = vmatprep.subr.bf16.mxu1 %v3509_v6 }
 0x118   :  { %959 = vmatprep.mubr.bf16.mxu0 %v3458_v1  ;;  %1002 = vmatprep.mubr.bf16.mxu1 %v3458_v1 }
 0x11a   :  { %930 = vmatpush1.bf16.msra.mxu0 %v3514_v7  ;;  %973 = vmatpush1.bf16.msra.mxu1 %v3520_v8 }
 0x11b   :  { %931 = vmatprep.subr.bf16.mxu0 %v3526_v9  ;;  %974 = vmatprep.subr.bf16.mxu1 %v3531_v10 }
 0x11e   :  { %932 = vmatpush1.bf16.msra.mxu0 %v3536_v11  ;;  %975 = vmatpush1.bf16.msra.mxu1 %v3541_v12 }
 0x11f   :  { %933 = vmatprep.subr.bf16.mxu0 %v3548_v13  ;;  %976 = vmatprep.subr.bf16.mxu1 %v3555_v14 }
 0x122   :  { %934 = vmatpush1.bf16.msra.mxu0 %v3560_v15  ;;  %977 = vmatpush1.bf16.msra.mxu1 %v3567_v16 }
 0x123   :  { %935 = vmatprep.subr.bf16.mxu0 %v3572_v17  ;;  %978 = vmatprep.subr.bf16.mxu1 %v3579_v18 }
 0x126   :  { %936 = vmatpush1.bf16.msra.mxu0 %v3584_v19  ;;  %979 = vmatpush1.bf16.msra.mxu1 %v3589_v20 }
 0x127   :  { %937 = vmatprep.subr.bf16.mxu0 %v3596_v21  ;;  %980 = vmatprep.subr.bf16.mxu1 %v3603_v22 }
 0x12a   :  { %938 = vmatpush1.bf16.msra.mxu0 %v3610_v23  ;;  %981 = vmatpush1.bf16.msra.mxu1 %v3615_v24 }
 0x12b   :  { %939 = vmatprep.subr.bf16.mxu0 %v3622_v25  ;;  %982 = vmatprep.subr.bf16.mxu1 %v3627_v26 }
 0x12e   :  { %940 = vmatpush1.bf16.msra.mxu0 %v3632_v27  ;;  %983 = vmatpush1.bf16.msra.mxu1 %v3637_v28 }
 0x12f   :  { %941 = vmatprep.subr.bf16.mxu0 %v3642_v29  ;;  %984 = vmatprep.subr.bf16.mxu1 %v3647_v30 }
 0x132   :  { %942 = vmatpush1.bf16.msra.mxu0 %v3656_v31  ;;  %985 = vmatpush1.bf16.msra.mxu1 %v3661_v32 }
 0x133   :  { %1275 = vmatprep.subr.bf16.mxu0 %v3478_v0  ;;  %1318 = vmatprep.subr.bf16.mxu1 %v3485_v2  ;;  %v383_v0 = vunpack.c.l.bf16 %v2859_v41  ;;  %v382_v2 = vunpack.c.h.bf16 %v2858_v46 }
 0x1d5   :  { %v613_v43 = vpop.f32.mrf.mxu0  ;;  %v656_v44 = vpop.f32.mrf.mxu1 }
 0x1d6   :  { %v665_v45 = vadd.f32 %v613_v43, %v379_v39  ;;  %v667_v37 = vadd.f32 %v656_v44, %v381_v33 }
 0x1d7   :  { %v615_v47 = vpop.f32.mrf.mxu0  ;;  %v658_v48 = vpop.f32.mrf.mxu1 }
 0x1d8   :  { %v673_v36 = vmul.f32 0.5, %v665_v45  ;;  %v666_v49 = vadd.f32 %v615_v47, %v380_v42  ;;  %v668_v55 = vadd.f32 %v658_v48, %v382_v2  ;;  %v675_v42 = vmul.f32 0.5, %v667_v37 }
 0x1d9   :  { %v617_v40 = vpop.f32.mrf.mxu0  ;;  %v660_v52 = vpop.f32.mrf.mxu1 }
 0x1da   :  { %3318 = vtanh.f32 %v673_v36  ;;  %v674_v53 = vmul.f32 0.5, %v666_v49  ;;  %v669_v54 = vadd.f32 %v617_v40, %v383_v0  ;;  %v671_v38 = vadd.f32 %v660_v52, %v385_v35 }
 0x1db   :  { %v619_v58 = vpop.f32.mrf.mxu0  ;;  %v662_v62 = vpop.f32.mrf.mxu1 }
 0x1dc   :  { %3320 = vtanh.f32 %v674_v53  ;;  %v676_v59 = vmul.f32 0.5, %v669_v54  ;;  %v670_v60 = vadd.f32 %v619_v58, %v384_v50  ;;  %v672_v34 = vadd.f32 %v662_v62, %v386_v61 }
 0x1dd   :  { %v678_v45 = vmul.f32 0.5, %v671_v38 }
 0x1de   :  { %3322 = vtanh.f32 %v676_v59  ;;  %v677_v63 = vmul.f32 0.5, %v670_v60 }
 0x1df   :  { %3324 = vtanh.f32 %v668_v55 }
 0x1e0   :  { %3326 = vtanh.f32 %v677_v63 }
 0x1e1   :  { %3328 = vtanh.f32 %v672_v34 }
 0x1e2   :  { %3330 = vtanh.f32 %v675_v42 }
 0x1e3   :  { %3332 = vtanh.f32 %v678_v45 }
 0x1e7   :  { %v3319_v39 = vpop.eup %3318 }
 0x1e8   :  { %v685_v41 = vadd.f32 1.0, %v3319_v39 }
 0x1e9   :  { %v3321_v43 = vpop.eup %3320 }
 0x1ea   :  { %v691_v0 = vmul.f32 0.5, %v685_v41  ;;  %v686_v47 = vadd.f32 1.0, %v3321_v43 }
 0x1eb   :  { %v3323_v2 = vpop.eup %3322 }
 0x1ec   :  { %v3325_v48 = vpop.eup %3324  ;;  %v692_v36 = vmul.f32 0.5, %v686_v47  ;;  %v688_v49 = vadd.f32 1.0, %v3323_v2 }
 0x1ed   :  { %v3327_v50 = vpop.eup %3326  ;;  %v701_v40 = vmul.f32 %v3325_v48, %v691_v0 }
 0x1ee   :  { %v699_v46 = vmul.f32 %v692_v36, %v3717_v51  ;;  %v694_v44 = vmul.f32 0.5, %v688_v49  ;;  %v689_v53 = vadd.f32 1.0, %v3327_v50  ;;  %v3329_v55 = vpop.eup %3328 }
 0x1ef   :  { %v3331_v60 = vpop.eup %3330 }
 0x1f0   :  { %v3773_v52 = vadd.f32 %v701_v40, %v699_v46  ;;  %v695_v54 = vmul.f32 0.5, %v689_v53  ;;  %v702_v58 = vmul.f32 %v3329_v55, %v694_v44  ;;  %v3333_v61 = vpop.eup %3332  ;;  %v687_v62 = vadd.f32 1.0, %v3331_v60 }
 0x1f1   :  { %v690_v51 = vadd.f32 1.0, %v3333_v61 }
 0x1f2   :  { %v700_v57 = vmul.f32 %v695_v54, %v3720_v56  ;;  %3334 = vtanh.f32 %v3773_v52  ;;  %v693_v33 = vmul.f32 0.5, %v687_v62 }
 0x1f3   :  { %v696_v34 = vmul.f32 0.5, %v690_v51 }
 0x1f4   :  { %v3777_v59 = vadd.f32 %v702_v58, %v700_v57 }
 0x1f6   :  { %3336 = vtanh.f32 %v3777_v59 }
 0x1ff   :  { %v3335_v63 = vpop.eup %3334 }
 0x200   :  { %v707_v37 = vmul.f32 %v3335_v63, %v693_v33 }
 0x203   :  { %v3337_v35 = vpop.eup %3336 }
 0x204   :  { %v708_v38 = vmul.f32 %v3337_v35, %v696_v34 }
 0x206   :  { %v709_v39 = vpack.c.bf16 %v708_v38, %v707_v37 }
 0x208   :  { %3193 = vst [vmem:[%s4245_s2 + $0x8] sm:$0xff] %v709_v39   ;;  %960 = vmatmul.mubr.bf16.vlgmr.msra.gmra.mxu0 %v709_v39  ;;  %1003 = vmatmul.mubr.bf16.vlgmr.msra.gmra.mxu1 %v709_v39 }
 0x209   :  { %1276 = vmatpush1.bf16.msra.mxu0 %v3491_v3  ;;  %1319 = vmatpush1.bf16.msra.mxu1 %v3496_v4  ;;  %v2897_v3 = vld [vmem:[%s4244_s0 + $0x40] sm:$0xff] }
 0x20a   :  { %1277 = vmatprep.subr.bf16.mxu0 %v3502_v5  ;;  %1320 = vmatprep.subr.bf16.mxu1 %v3509_v6  ;;  %v727_v4 = vunpack.c.l.bf16 %v2897_v3  ;;  %v2899_v5 = vld [vmem:[%s4244_s0 + $0x50] sm:$0xff]  ;;  %v728_v6 = vunpack.c.h.bf16 %v2897_v3 }
 0x20b   :  { %1307 = vmatprep.mubr.bf16.mxu0 %v3458_v1  ;;  %1350 = vmatprep.mubr.bf16.mxu1 %v3458_v1 }
 0x20d   :  { %1278 = vmatpush1.bf16.msra.mxu0 %v3514_v7  ;;  %1321 = vmatpush1.bf16.msra.mxu1 %v3520_v8 }
 0x20e   :  { %1279 = vmatprep.subr.bf16.mxu0 %v3526_v9  ;;  %1322 = vmatprep.subr.bf16.mxu1 %v3531_v10  ;;  %v2898_v10 = vld [vmem:[%s4244_s0 + $0x48] sm:$0xff] }
 0x211   :  { %1280 = vmatpush1.bf16.msra.mxu0 %v3536_v11  ;;  %1323 = vmatpush1.bf16.msra.mxu1 %v3541_v12  ;;  %v731_v11 = vunpack.c.l.bf16 %v2899_v5 }
 0x212   :  { %1281 = vmatprep.subr.bf16.mxu0 %v3548_v13  ;;  %1324 = vmatprep.subr.bf16.mxu1 %v3555_v14  ;;  %v730_v13 = vunpack.c.h.bf16 %v2898_v10 }
 0x215   :  { %1282 = vmatpush1.bf16.msra.mxu0 %v3560_v15  ;;  %1325 = vmatpush1.bf16.msra.mxu1 %v3567_v16 }
 0x216   :  { %1283 = vmatprep.subr.bf16.mxu0 %v3572_v17  ;;  %1326 = vmatprep.subr.bf16.mxu1 %v3579_v18  ;;  %v732_v17 = vunpack.c.h.bf16 %v2899_v5 }
 0x219   :  { %1284 = vmatpush1.bf16.msra.mxu0 %v3584_v19  ;;  %1327 = vmatpush1.bf16.msra.mxu1 %v3589_v20 }
 0x21a   :  { %1285 = vmatprep.subr.bf16.mxu0 %v3596_v21  ;;  %1328 = vmatprep.subr.bf16.mxu1 %v3603_v22 }
 0x21d   :  { %1286 = vmatpush1.bf16.msra.mxu0 %v3610_v23  ;;  %1329 = vmatpush1.bf16.msra.mxu1 %v3615_v24  ;;  %v2900_v23 = vld [vmem:[%s4244_s0 + $0x58] sm:$0xff] }
 0x21e   :  { %1287 = vmatprep.subr.bf16.mxu0 %v3622_v25  ;;  %1330 = vmatprep.subr.bf16.mxu1 %v3627_v26 }
 0x221   :  { %1288 = vmatpush1.bf16.msra.mxu0 %v3632_v27  ;;  %1331 = vmatpush1.bf16.msra.mxu1 %v3637_v28  ;;  %v734_v27 = vunpack.c.h.bf16 %v2900_v23 }
 0x222   :  { %1289 = vmatprep.subr.bf16.mxu0 %v3642_v29  ;;  %1332 = vmatprep.subr.bf16.mxu1 %v3647_v30  ;;  %v729_v30 = vunpack.c.l.bf16 %v2898_v10  ;;  %v3872_v10 = vld [vmem:[%s4243_s1 + $0xcc] ss:$16 sps:$4 sm:$0xff]  }
 0x225   :  { %1290 = vmatpush1.bf16.msra.mxu0 %v3656_v31  ;;  %1333 = vmatpush1.bf16.msra.mxu1 %v3661_v32  ;;  %v733_v32 = vunpack.c.l.bf16 %v2900_v23  ;;  %v3949_v23 = vld [vmem:[%s4243_s1 + $0x60] ss:$16 sps:$4 sm:$0xff]  }
 0x2c8   :  { %v961_v7 = vpop.f32.mrf.mxu0  ;;  %v1004_v8 = vpop.f32.mrf.mxu1 }
 0x2c9   :  { %v1013_v9 = vadd.f32 %v961_v7, %v727_v4  ;;  %v1015_v56 = vadd.f32 %v1004_v8, %v729_v30  ;;  %v3853_v7 = vld [vmem:[%s4243_s1 + $0xe0] ss:$16 sps:$4 sm:$0xff]   ;;  %v3858_v8 = vld [vmem:[%s4243_s1 + $0xe8] ss:$16 sps:$4 sm:$0xff]   ;;  %v3990_v30 = vld [vmem:[%s4243_s1 + $0x2c] ss:$16 sps:$4 sm:$0xff]  }
 0x2ca   :  { %v963_v12 = vpop.f32.mrf.mxu0  ;;  %v1006_v14 = vpop.f32.mrf.mxu1 }
 0x2cb   :  { %v1021_v15 = vmul.f32 0.5, %v1013_v9  ;;  %v1014_v16 = vadd.f32 %v963_v12, %v728_v6  ;;  %v1016_v22 = vadd.f32 %v1006_v14, %v730_v13  ;;  %v1023_v45 = vmul.f32 0.5, %v1015_v56  ;;  %v3848_v6 = vld [vmem:[%s4243_s1 + $0xec] ss:$16 sps:$4 sm:$0xff]   ;;  %v3867_v9 = vld [vmem:[%s4243_s1 + $0xc4] ss:$16 sps:$4 sm:$0xff]  }
 0x2cc   :  { %v965_v18 = vpop.f32.mrf.mxu0  ;;  %v1008_v19 = vpop.f32.mrf.mxu1  ;;  %1666 = vmatprep.subr.bf16.mxu1 %v3848_v6  ;;  %v3882_v12 = vld [vmem:[%s4243_s1 + $0xc8] ss:$16 sps:$4 sm:$0xff]   ;;  %v3891_v13 = vld [vmem:[%s4243_s1 + $0xa4] ss:$16 sps:$4 sm:$0xff]   ;;  %v3896_v14 = vld [vmem:[%s4243_s1 + $0xac] ss:$16 sps:$4 sm:$0xff]  }
 0x2cd   :  { %3338 = vtanh.f32 %v1021_v15  ;;  %v1022_v20 = vmul.f32 0.5, %v1014_v16  ;;  %v1017_v21 = vadd.f32 %v965_v18, %v731_v11  ;;  %v1019_v41 = vadd.f32 %v1008_v19, %v733_v32  ;;  %v3877_v11 = vld [vmem:[%s4243_s1 + $0xc0] ss:$16 sps:$4 sm:$0xff]   ;;  %v3906_v16 = vld [vmem:[%s4243_s1 + $0xa8] ss:$16 sps:$4 sm:$0xff]  }
 0x2ce   :  { %v967_v24 = vpop.f32.mrf.mxu0  ;;  %v1010_v28 = vpop.f32.mrf.mxu1  ;;  %v3901_v15 = vld [vmem:[%s4243_s1 + $0xa0] ss:$16 sps:$4 sm:$0xff]   ;;  %v3920_v18 = vld [vmem:[%s4243_s1 + $0x8c] ss:$16 sps:$4 sm:$0xff]   ;;  %v4002_v32 = vld [vmem:[%s4243_s1 + $0x28] ss:$16 sps:$4 sm:$0xff]  }
 0x2cf   :  { %3340 = vtanh.f32 %v1022_v20  ;;  %v1024_v25 = vmul.f32 0.5, %v1017_v21  ;;  %v1018_v26 = vadd.f32 %v967_v24, %v732_v17  ;;  %v1020_v31 = vadd.f32 %v1010_v28, %v734_v27  ;;  %v3915_v17 = vld [vmem:[%s4243_s1 + $0x84] ss:$16 sps:$4 sm:$0xff]   ;;  %v3925_v19 = vld [vmem:[%s4243_s1 + $0x80] ss:$16 sps:$4 sm:$0xff]  }
 0x2d0   :  { %v1026_v47 = vmul.f32 0.5, %v1019_v41  ;;  %v3930_v20 = vld [vmem:[%s4243_s1 + $0x88] ss:$16 sps:$4 sm:$0xff]   ;;  %v3937_v21 = vld [vmem:[%s4243_s1 + $0x64] ss:$16 sps:$4 sm:$0xff]  }
 0x2d1   :  { %3342 = vtanh.f32 %v1024_v25  ;;  %v1025_v29 = vmul.f32 0.5, %v1018_v26  ;;  %v3954_v24 = vld [vmem:[%s4243_s1 + $0x68] ss:$16 sps:$4 sm:$0xff]   ;;  %v3961_v25 = vld [vmem:[%s4243_s1 + $0x44] ss:$16 sps:$4 sm:$0xff]  }
 0x2d2   :  { %3344 = vtanh.f32 %v1016_v22  ;;  %v3942_v22 = vld [vmem:[%s4243_s1 + $0x6c] ss:$16 sps:$4 sm:$0xff]   ;;  %v3973_v27 = vld [vmem:[%s4243_s1 + $0x40] ss:$16 sps:$4 sm:$0xff]   ;;  %v3978_v28 = vld [vmem:[%s4243_s1 + $0x48] ss:$16 sps:$4 sm:$0xff]  }
 0x2d3   :  { %3346 = vtanh.f32 %v1025_v29  ;;  %v3966_v26 = vld [vmem:[%s4243_s1 + $0x4c] ss:$16 sps:$4 sm:$0xff]   ;;  %v3985_v29 = vld [vmem:[%s4243_s1 + $0x24] ss:$16 sps:$4 sm:$0xff]  }
 0x2d4   :  { %3348 = vtanh.f32 %v1020_v31  ;;  %v3997_v31 = vld [vmem:[%s4243_s1 + $0x20] ss:$16 sps:$4 sm:$0xff]   ;;  %v4009_v56 = vld [vmem:[%s4243_s1 + $0x4] ss:$16 sps:$4 sm:$0xff]   ;;  %v4014_v41 = vld [vmem:[%s4243_s1 + $0xc] ss:$16 sps:$4 sm:$0xff]  }
 0x2d5   :  { %3350 = vtanh.f32 %v1023_v45  ;;  %v2937_v45 = vld [vmem:[%s4244_s0 + $0x60] sm:$0xff] }
 0x2d6   :  { %3352 = vtanh.f32 %v1026_v47  ;;  %v2939_v47 = vld [vmem:[%s4244_s0 + $0x70] sm:$0xff] }
 0x2da   :  { %v3339_v42 = vpop.eup %3338 }
 0x2db   :  { %v1033_v43 = vadd.f32 1.0, %v3339_v42  ;;  %v4021_v42 = vld [vmem:[%s4243_s1] ss:$16 sps:$4 sm:$0xff]  }
 0x2dc   :  { %v3341_v0 = vpop.eup %3340 }
 0x2dd   :  { %v1039_v2 = vmul.f32 0.5, %v1033_v43  ;;  %v1034_v48 = vadd.f32 1.0, %v3341_v0  ;;  %v4026_v43 = vld [vmem:[%s4243_s1 + $0x8] ss:$16 sps:$4 sm:$0xff]   ;;  %v1075_v0 = vunpack.c.l.bf16 %v2937_v45 }
 0x2de   :  { %v3343_v36 = vpop.eup %3342 }
 0x2df   :  { %v3345_v49 = vpop.eup %3344  ;;  %v1040_v50 = vmul.f32 0.5, %v1034_v48  ;;  %v1036_v46 = vadd.f32 1.0, %v3343_v36 }
 0x2e0   :  { %v3347_v40 = vpop.eup %3346  ;;  %v1049_v53 = vmul.f32 %v3345_v49, %v1039_v2  ;;  %v1076_v2 = vunpack.c.h.bf16 %v2937_v45 }
 0x2e1   :  { %v1047_v44 = vmul.f32 %v1040_v50, %v3773_v52  ;;  %v1042_v54 = vmul.f32 0.5, %v1036_v46  ;;  %v1037_v55 = vadd.f32 1.0, %v3347_v40  ;;  %v3349_v60 = vpop.eup %3348  ;;  %v2938_v50 = vld [vmem:[%s4244_s0 + $0x68] sm:$0xff]  ;;  %v1079_v46 = vunpack.c.l.bf16 %v2939_v47 }
 0x2e2   :  { %v3351_v63 = vpop.eup %3350 }
 0x2e3   :  { %v3828_v57 = vadd.f32 %v1049_v53, %v1047_v44  ;;  %v1043_v58 = vmul.f32 0.5, %v1037_v55  ;;  %v1050_v62 = vmul.f32 %v3349_v60, %v1042_v54  ;;  %v3353_v33 = vpop.eup %3352  ;;  %v1035_v34 = vadd.f32 1.0, %v3351_v63 }
 0x2e4   :  { %v1038_v52 = vadd.f32 1.0, %v3353_v33  ;;  %v1078_v44 = vunpack.c.h.bf16 %v2938_v50 }
 0x2e5   :  { %v1048_v61 = vmul.f32 %v1043_v58, %v3777_v59  ;;  %3354 = vtanh.f32 %v3828_v57  ;;  %v1041_v37 = vmul.f32 0.5, %v1035_v34  ;;  %v3843_v59 = vld [vmem:[%s4243_s1 + $0xe4] ss:$16 sps:$4 sm:$0xff]   ;;  %v1080_v58 = vunpack.c.h.bf16 %v2939_v47  ;;  %v2940_v34 = vld [vmem:[%s4244_s0 + $0x78] sm:$0xff] }
 0x2e6   :  { %v1044_v38 = vmul.f32 0.5, %v1038_v52  ;;  %1623 = vmatprep.subr.bf16.mxu0 %v3843_v59  ;;  %v1081_v45 = vunpack.c.l.bf16 %v2940_v34 }
 0x2e7   :  { %v3832_v51 = vadd.f32 %v1050_v62, %v1048_v61 }
 0x2e9   :  { %3356 = vtanh.f32 %v3832_v51 }
 0x2f2   :  { %v3355_v35 = vpop.eup %3354 }
 0x2f3   :  { %v1055_v3 = vmul.f32 %v3355_v35, %v1041_v37 }
 0x2f6   :  { %v3357_v39 = vpop.eup %3356 }
 0x2f7   :  { %v1056_v4 = vmul.f32 %v3357_v39, %v1044_v38  ;;  %v1082_v38 = vunpack.c.h.bf16 %v2940_v34 }
 0x2f9   :  { %v1057_v5 = vpack.c.bf16 %v1056_v4, %v1055_v3  ;;  %v1077_v4 = vunpack.c.l.bf16 %v2938_v50 }
 0x2fb   :  { %3194 = vst [vmem:[%s4245_s2 + $0x10] sm:$0xff] %v1057_v5   ;;  %1308 = vmatmul.mubr.bf16.vlgmr.msra.gmra.mxu0 %v1057_v5  ;;  %1351 = vmatmul.mubr.bf16.vlgmr.msra.gmra.mxu1 %v1057_v5 }
 0x2fc   :  { %1655 = vmatprep.mubr.bf16.mxu0 %v3458_v1  ;;  %1698 = vmatprep.mubr.bf16.mxu1 %v3458_v1 }
 0x2fd   :  { %1624 = vmatpush1.bf16.msra.mxu0 %v3853_v7  ;;  %1667 = vmatpush1.bf16.msra.mxu1 %v3858_v8 }
 0x2fe   :  { %1625 = vmatprep.subr.bf16.mxu0 %v3867_v9  ;;  %1668 = vmatprep.subr.bf16.mxu1 %v3872_v10 }
 0x301   :  { %1626 = vmatpush1.bf16.msra.mxu0 %v3877_v11  ;;  %1669 = vmatpush1.bf16.msra.mxu1 %v3882_v12 }
 0x302   :  { %1627 = vmatprep.subr.bf16.mxu0 %v3891_v13  ;;  %1670 = vmatprep.subr.bf16.mxu1 %v3896_v14 }
 0x305   :  { %1628 = vmatpush1.bf16.msra.mxu0 %v3901_v15  ;;  %1671 = vmatpush1.bf16.msra.mxu1 %v3906_v16 }
 0x306   :  { %1629 = vmatprep.subr.bf16.mxu0 %v3915_v17  ;;  %1672 = vmatprep.subr.bf16.mxu1 %v3920_v18 }
 0x309   :  { %1630 = vmatpush1.bf16.msra.mxu0 %v3925_v19  ;;  %1673 = vmatpush1.bf16.msra.mxu1 %v3930_v20 }
 0x30a   :  { %1631 = vmatprep.subr.bf16.mxu0 %v3937_v21  ;;  %1674 = vmatprep.subr.bf16.mxu1 %v3942_v22 }
 0x30d   :  { %1632 = vmatpush1.bf16.msra.mxu0 %v3949_v23  ;;  %1675 = vmatpush1.bf16.msra.mxu1 %v3954_v24 }
 0x30e   :  { %1633 = vmatprep.subr.bf16.mxu0 %v3961_v25  ;;  %1676 = vmatprep.subr.bf16.mxu1 %v3966_v26 }
 0x311   :  { %1634 = vmatpush1.bf16.msra.mxu0 %v3973_v27  ;;  %1677 = vmatpush1.bf16.msra.mxu1 %v3978_v28 }
 0x312   :  { %1635 = vmatprep.subr.bf16.mxu0 %v3985_v29  ;;  %1678 = vmatprep.subr.bf16.mxu1 %v3990_v30 }
 0x315   :  { %1636 = vmatpush1.bf16.msra.mxu0 %v3997_v31  ;;  %1679 = vmatpush1.bf16.msra.mxu1 %v4002_v32 }
 0x316   :  { %1637 = vmatprep.subr.bf16.mxu0 %v4009_v56  ;;  %1680 = vmatprep.subr.bf16.mxu1 %v4014_v41 }
 0x319   :  { %1638 = vmatpush1.bf16.msra.mxu0 %v4021_v42  ;;  %1681 = vmatpush1.bf16.msra.mxu1 %v4026_v43 }
 0x31a   :  { %1971 = vmatprep.subr.bf16.mxu0 %v3843_v59  ;;  %2014 = vmatprep.subr.bf16.mxu1 %v3848_v6 }
 0x3bb   :  { %v1309_v48 = vpop.f32.mrf.mxu0  ;;  %v1352_v36 = vpop.f32.mrf.mxu1 }
 0x3bc   :  { %v1361_v49 = vadd.f32 %v1309_v48, %v1075_v0  ;;  %v1363_v0 = vadd.f32 %v1352_v36, %v1077_v4 }
 0x3bd   :  { %v1311_v40 = vpop.f32.mrf.mxu0  ;;  %v1354_v53 = vpop.f32.mrf.mxu1 }
 0x3be   :  { %v1369_v54 = vmul.f32 0.5, %v1361_v49  ;;  %v1362_v55 = vadd.f32 %v1311_v40, %v1076_v2  ;;  %v1364_v33 = vadd.f32 %v1354_v53, %v1078_v44  ;;  %v1371_v49 = vmul.f32 0.5, %v1363_v0 }
 0x3bf   :  { %v1313_v60 = vpop.f32.mrf.mxu0  ;;  %v1356_v61 = vpop.f32.mrf.mxu1 }
 0x3c0   :  { %3358 = vtanh.f32 %v1369_v54  ;;  %v1370_v62 = vmul.f32 0.5, %v1362_v55  ;;  %v1365_v63 = vadd.f32 %v1313_v60, %v1079_v46  ;;  %v1367_v47 = vadd.f32 %v1356_v61, %v1081_v45 }
 0x3c1   :  { %v1315_v52 = vpop.f32.mrf.mxu0  ;;  %v1358_v39 = vpop.f32.mrf.mxu1 }
 0x3c2   :  { %3360 = vtanh.f32 %v1370_v62  ;;  %v1372_v35 = vmul.f32 0.5, %v1365_v63  ;;  %v1366_v37 = vadd.f32 %v1315_v52, %v1080_v58  ;;  %v1368_v5 = vadd.f32 %v1358_v39, %v1082_v38 }
 0x3c3   :  { %v1374_v40 = vmul.f32 0.5, %v1367_v47 }
 0x3c4   :  { %3362 = vtanh.f32 %v1372_v35  ;;  %v1373_v3 = vmul.f32 0.5, %v1366_v37 }
 0x3c5   :  { %3364 = vtanh.f32 %v1364_v33 }
 0x3c6   :  { %3366 = vtanh.f32 %v1373_v3 }
 0x3c7   :  { %3368 = vtanh.f32 %v1368_v5 }
 0x3c8   :  { %3370 = vtanh.f32 %v1371_v49 }
 0x3c9   :  { %3372 = vtanh.f32 %v1374_v40  ;;  %v2979_v40 = vld [vmem:[%s4244_s0 + $0x90] sm:$0xff] }
 0x3cd   :  { %v3359_v2 = vpop.eup %3358 }
 0x3ce   :  { %v1381_v48 = vadd.f32 1.0, %v3359_v2 }
 0x3cf   :  { %v3361_v46 = vpop.eup %3360 }
 0x3d0   :  { %v1387_v44 = vmul.f32 0.5, %v1381_v48  ;;  %v1382_v53 = vadd.f32 1.0, %v3361_v46 }
 0x3d1   :  { %v3363_v54 = vpop.eup %3362 }
 0x3d2   :  { %v3365_v55 = vpop.eup %3364  ;;  %v1388_v58 = vmul.f32 0.5, %v1382_v53  ;;  %v1384_v60 = vadd.f32 1.0, %v3363_v54 }
 0x3d3   :  { %v3367_v62 = vpop.eup %3366  ;;  %v1397_v63 = vmul.f32 %v3365_v55, %v1387_v44 }
 0x3d4   :  { %v1395_v50 = vmul.f32 %v1388_v58, %v3828_v57  ;;  %v1390_v36 = vmul.f32 0.5, %v1384_v60  ;;  %v1385_v33 = vadd.f32 1.0, %v3367_v62  ;;  %v3369_v52 = vpop.eup %3368  ;;  %v2978_v58 = vld [vmem:[%s4244_s0 + $0x88] sm:$0xff]  ;;  %v1427_v60 = vunpack.c.l.bf16 %v2979_v40 }
 0x3d5   :  { %v3371_v39 = vpop.eup %3370 }
 0x3d6   :  { %v4047_v61 = vadd.f32 %v1397_v63, %v1395_v50  ;;  %v1391_v34 = vmul.f32 0.5, %v1385_v33  ;;  %v1398_v37 = vmul.f32 %v3369_v52, %v1390_v36  ;;  %v3373_v3 = vpop.eup %3372  ;;  %v1383_v4 = vadd.f32 1.0, %v3371_v39 }
 0x3d7   :  { %v1386_v57 = vadd.f32 1.0, %v3373_v3  ;;  %v1426_v50 = vunpack.c.h.bf16 %v2978_v58 }
 0x3d8   :  { %v1396_v35 = vmul.f32 %v1391_v34, %v3832_v51  ;;  %3374 = vtanh.f32 %v4047_v61  ;;  %v1389_v45 = vmul.f32 0.5, %v1383_v4  ;;  %v2977_v51 = vld [vmem:[%s4244_s0 + $0x80] sm:$0xff]  ;;  %v1428_v34 = vunpack.c.h.bf16 %v2979_v40  ;;  %v2980_v4 = vld [vmem:[%s4244_s0 + $0x98] sm:$0xff] }
 0x3d9   :  { %v1392_v0 = vmul.f32 0.5, %v1386_v57  ;;  %v1423_v46 = vunpack.c.l.bf16 %v2977_v51  ;;  %v1424_v44 = vunpack.c.h.bf16 %v2977_v51  ;;  %v1429_v51 = vunpack.c.l.bf16 %v2980_v4 }
 0x3da   :  { %v4051_v38 = vadd.f32 %v1398_v37, %v1396_v35 }
 0x3dc   :  { %3376 = vtanh.f32 %v4051_v38 }
 0x3e5   :  { %v3375_v5 = vpop.eup %3374 }
 0x3e6   :  { %v1403_v2 = vmul.f32 %v3375_v5, %v1389_v45 }
 0x3e9   :  { %v3377_v47 = vpop.eup %3376 }
 0x3ea   :  { %v1404_v48 = vmul.f32 %v3377_v47, %v1392_v0  ;;  %v1430_v0 = vunpack.c.h.bf16 %v2980_v4 }
 0x3ec   :  { %v1405_v49 = vpack.c.bf16 %v1404_v48, %v1403_v2  ;;  %v1425_v48 = vunpack.c.l.bf16 %v2978_v58 }
 0x3ee   :  { %3195 = vst [vmem:[%s4245_s2 + $0x18] sm:$0xff] %v1405_v49   ;;  %1656 = vmatmul.mubr.bf16.vlgmr.msra.gmra.mxu0 %v1405_v49  ;;  %1699 = vmatmul.mubr.bf16.vlgmr.msra.gmra.mxu1 %v1405_v49 }
 0x3ef   :  { %1972 = vmatpush1.bf16.msra.mxu0 %v3853_v7  ;;  %2015 = vmatpush1.bf16.msra.mxu1 %v3858_v8 }
 0x3f0   :  { %1973 = vmatprep.subr.bf16.mxu0 %v3867_v9  ;;  %2016 = vmatprep.subr.bf16.mxu1 %v3872_v10 }
 0x3f1   :  { %2003 = vmatprep.mubr.bf16.mxu0 %v3458_v1  ;;  %2046 = vmatprep.mubr.bf16.mxu1 %v3458_v1 }
 0x3f3   :  { %1974 = vmatpush1.bf16.msra.mxu0 %v3877_v11  ;;  %2017 = vmatpush1.bf16.msra.mxu1 %v3882_v12 }
 0x3f4   :  { %1975 = vmatprep.subr.bf16.mxu0 %v3891_v13  ;;  %2018 = vmatprep.subr.bf16.mxu1 %v3896_v14 }
 0x3f7   :  { %1976 = vmatpush1.bf16.msra.mxu0 %v3901_v15  ;;  %2019 = vmatpush1.bf16.msra.mxu1 %v3906_v16 }
 0x3f8   :  { %1977 = vmatprep.subr.bf16.mxu0 %v3915_v17  ;;  %2020 = vmatprep.subr.bf16.mxu1 %v3920_v18 }
 0x3fb   :  { %1978 = vmatpush1.bf16.msra.mxu0 %v3925_v19  ;;  %2021 = vmatpush1.bf16.msra.mxu1 %v3930_v20 }
 0x3fc   :  { %1979 = vmatprep.subr.bf16.mxu0 %v3937_v21  ;;  %2022 = vmatprep.subr.bf16.mxu1 %v3942_v22 }
 0x3ff   :  { %1980 = vmatpush1.bf16.msra.mxu0 %v3949_v23  ;;  %2023 = vmatpush1.bf16.msra.mxu1 %v3954_v24 }
 0x400   :  { %1981 = vmatprep.subr.bf16.mxu0 %v3961_v25  ;;  %2024 = vmatprep.subr.bf16.mxu1 %v3966_v26 }
 0x403   :  { %1982 = vmatpush1.bf16.msra.mxu0 %v3973_v27  ;;  %2025 = vmatpush1.bf16.msra.mxu1 %v3978_v28 }
 0x404   :  { %1983 = vmatprep.subr.bf16.mxu0 %v3985_v29  ;;  %2026 = vmatprep.subr.bf16.mxu1 %v3990_v30 }
 0x407   :  { %1984 = vmatpush1.bf16.msra.mxu0 %v3997_v31  ;;  %2027 = vmatpush1.bf16.msra.mxu1 %v4002_v32 }
 0x408   :  { %1985 = vmatprep.subr.bf16.mxu0 %v4009_v56  ;;  %2028 = vmatprep.subr.bf16.mxu1 %v4014_v41 }
 0x40b   :  { %1986 = vmatpush1.bf16.msra.mxu0 %v4021_v42  ;;  %2029 = vmatpush1.bf16.msra.mxu1 %v4026_v43 }
 0x40c   :  { %2319 = vmatprep.subr.bf16.mxu0 %v3843_v59  ;;  %2362 = vmatprep.subr.bf16.mxu1 %v3848_v6 }
 0x4ae   :  { %v1657_v53 = vpop.f32.mrf.mxu0  ;;  %v1700_v54 = vpop.f32.mrf.mxu1 }
 0x4af   :  { %v1709_v55 = vadd.f32 %v1657_v53, %v1423_v46  ;;  %v1711_v46 = vadd.f32 %v1700_v54, %v1425_v48 }
 0x4b0   :  { %v1659_v62 = vpop.f32.mrf.mxu0  ;;  %v1702_v63 = vpop.f32.mrf.mxu1 }
 0x4b1   :  { %v1717_v36 = vmul.f32 0.5, %v1709_v55  ;;  %v1710_v33 = vadd.f32 %v1659_v62, %v1424_v44  ;;  %v1712_v3 = vadd.f32 %v1702_v63, %v1426_v50  ;;  %v1719_v55 = vmul.f32 0.5, %v1711_v46 }
 0x4b2   :  { %v1661_v52 = vpop.f32.mrf.mxu0  ;;  %v1704_v35 = vpop.f32.mrf.mxu1 }
 0x4b3   :  { %3378 = vtanh.f32 %v1717_v36  ;;  %v1718_v37 = vmul.f32 0.5, %v1710_v33  ;;  %v1713_v39 = vadd.f32 %v1661_v52, %v1427_v60  ;;  %v1715_v40 = vadd.f32 %v1704_v35, %v1429_v51 }
 0x4b4   :  { %v1663_v57 = vpop.f32.mrf.mxu0  ;;  %v1706_v47 = vpop.f32.mrf.mxu1 }
 0x4b5   :  { %3380 = vtanh.f32 %v1718_v37  ;;  %v1720_v5 = vmul.f32 0.5, %v1713_v39  ;;  %v1714_v45 = vadd.f32 %v1663_v57, %v1428_v34  ;;  %v1716_v49 = vadd.f32 %v1706_v47, %v1430_v0 }
 0x4b6   :  { %v1722_v62 = vmul.f32 0.5, %v1715_v40 }
 0x4b7   :  { %3382 = vtanh.f32 %v1720_v5  ;;  %v1721_v2 = vmul.f32 0.5, %v1714_v45 }
 0x4b8   :  { %3384 = vtanh.f32 %v1712_v3 }
 0x4b9   :  { %3386 = vtanh.f32 %v1721_v2 }
 0x4ba   :  { %3388 = vtanh.f32 %v1716_v49 }
 0x4bb   :  { %3390 = vtanh.f32 %v1719_v55 }
 0x4bc   :  { %3392 = vtanh.f32 %v1722_v62  ;;  %v3019_v62 = vld [vmem:[%s4244_s0 + $0xb0] sm:$0xff] }
 0x4c0   :  { %v3379_v44 = vpop.eup %3378 }
 0x4c1   :  { %v1729_v53 = vadd.f32 1.0, %v3379_v44 }
 0x4c2   :  { %v3381_v60 = vpop.eup %3380 }
 0x4c3   :  { %v1735_v50 = vmul.f32 0.5, %v1729_v53  ;;  %v1730_v63 = vadd.f32 1.0, %v3381_v60 }
 0x4c4   :  { %v3383_v36 = vpop.eup %3382 }
 0x4c5   :  { %v3385_v33 = vpop.eup %3384  ;;  %v1736_v34 = vmul.f32 0.5, %v1730_v63  ;;  %v1732_v52 = vadd.f32 1.0, %v3383_v36 }
 0x4c6   :  { %v3387_v37 = vpop.eup %3386  ;;  %v1745_v39 = vmul.f32 %v3385_v33, %v1735_v50 }
 0x4c7   :  { %v1743_v58 = vmul.f32 %v1736_v34, %v4047_v61  ;;  %v1738_v54 = vmul.f32 0.5, %v1732_v52  ;;  %v1733_v3 = vadd.f32 1.0, %v3387_v37  ;;  %v3389_v57 = vpop.eup %3388  ;;  %v3018_v34 = vld [vmem:[%s4244_s0 + $0xa8] sm:$0xff] }
 0x4c8   :  { %v3391_v47 = vpop.eup %3390 }
 0x4c9   :  { %v4104_v35 = vadd.f32 %v1745_v39, %v1743_v58  ;;  %v1739_v4 = vmul.f32 0.5, %v1733_v3  ;;  %v1746_v45 = vmul.f32 %v3389_v57, %v1738_v54  ;;  %v3393_v2 = vpop.eup %3392  ;;  %v1731_v48 = vadd.f32 1.0, %v3391_v47  ;;  %v3020_v47 = vld [vmem:[%s4244_s0 + $0xb8] sm:$0xff] }
 0x4ca   :  { %v1734_v61 = vadd.f32 1.0, %v3393_v2  ;;  %v1776_v54 = vunpack.c.h.bf16 %v3019_v62 }
 0x4cb   :  { %v1744_v5 = vmul.f32 %v1739_v4, %v4051_v38  ;;  %3394 = vtanh.f32 %v4104_v35  ;;  %v1737_v51 = vmul.f32 0.5, %v1731_v48  ;;  %v3017_v38 = vld [vmem:[%s4244_s0 + $0xa0] sm:$0xff] }
 0x4cc   :  { %v1740_v46 = vmul.f32 0.5, %v1734_v61  ;;  %v1771_v60 = vunpack.c.l.bf16 %v3017_v38  ;;  %v1772_v50 = vunpack.c.h.bf16 %v3017_v38 }
 0x4cd   :  { %v4108_v0 = vadd.f32 %v1746_v45, %v1744_v5 }
 0x4cf   :  { %3396 = vtanh.f32 %v4108_v0 }
 0x4d8   :  { %v3395_v49 = vpop.eup %3394 }
 0x4d9   :  { %v1751_v44 = vmul.f32 %v3395_v49, %v1737_v51  ;;  %v1778_v49 = vunpack.c.h.bf16 %v3020_v47 }
 0x4dc   :  { %v3397_v40 = vpop.eup %3396 }
 0x4dd   :  { %v1752_v53 = vmul.f32 %v3397_v40, %v1740_v46  ;;  %v1773_v40 = vunpack.c.l.bf16 %v3018_v34 }
 0x4df   :  { %v1753_v55 = vpack.c.bf16 %v1752_v53, %v1751_v44  ;;  %v1777_v53 = vunpack.c.l.bf16 %v3020_v47 }
 0x4e1   :  { %3196 = vst [vmem:[%s4245_s2 + $0x20] sm:$0xff] %v1753_v55   ;;  %2004 = vmatmul.mubr.bf16.vlgmr.msra.gmra.mxu0 %v1753_v55  ;;  %2047 = vmatmul.mubr.bf16.vlgmr.msra.gmra.mxu1 %v1753_v55 }
 0x4e2   :  { %2320 = vmatpush1.bf16.msra.mxu0 %v3853_v7  ;;  %2363 = vmatpush1.bf16.msra.mxu1 %v3858_v8 }
 0x4e3   :  { %2321 = vmatprep.subr.bf16.mxu0 %v3867_v9  ;;  %2364 = vmatprep.subr.bf16.mxu1 %v3872_v10 }
 0x4e4   :  { %2351 = vmatprep.mubr.bf16.mxu0 %v3458_v1  ;;  %2394 = vmatprep.mubr.bf16.mxu1 %v3458_v1 }
 0x4e6   :  { %2322 = vmatpush1.bf16.msra.mxu0 %v3877_v11  ;;  %2365 = vmatpush1.bf16.msra.mxu1 %v3882_v12 }
 0x4e7   :  { %2323 = vmatprep.subr.bf16.mxu0 %v3891_v13  ;;  %2366 = vmatprep.subr.bf16.mxu1 %v3896_v14 }
 0x4ea   :  { %2324 = vmatpush1.bf16.msra.mxu0 %v3901_v15  ;;  %2367 = vmatpush1.bf16.msra.mxu1 %v3906_v16 }
 0x4eb   :  { %2325 = vmatprep.subr.bf16.mxu0 %v3915_v17  ;;  %2368 = vmatprep.subr.bf16.mxu1 %v3920_v18 }
 0x4ee   :  { %2326 = vmatpush1.bf16.msra.mxu0 %v3925_v19  ;;  %2369 = vmatpush1.bf16.msra.mxu1 %v3930_v20 }
 0x4ef   :  { %2327 = vmatprep.subr.bf16.mxu0 %v3937_v21  ;;  %2370 = vmatprep.subr.bf16.mxu1 %v3942_v22 }
 0x4f2   :  { %2328 = vmatpush1.bf16.msra.mxu0 %v3949_v23  ;;  %2371 = vmatpush1.bf16.msra.mxu1 %v3954_v24 }
 0x4f3   :  { %2329 = vmatprep.subr.bf16.mxu0 %v3961_v25  ;;  %2372 = vmatprep.subr.bf16.mxu1 %v3966_v26 }
 0x4f6   :  { %2330 = vmatpush1.bf16.msra.mxu0 %v3973_v27  ;;  %2373 = vmatpush1.bf16.msra.mxu1 %v3978_v28 }
 0x4f7   :  { %2331 = vmatprep.subr.bf16.mxu0 %v3985_v29  ;;  %2374 = vmatprep.subr.bf16.mxu1 %v3990_v30 }
 0x4fa   :  { %2332 = vmatpush1.bf16.msra.mxu0 %v3997_v31  ;;  %2375 = vmatpush1.bf16.msra.mxu1 %v4002_v32 }
 0x4fb   :  { %2333 = vmatprep.subr.bf16.mxu0 %v4009_v56  ;;  %2376 = vmatprep.subr.bf16.mxu1 %v4014_v41 }
 0x4fe   :  { %2334 = vmatpush1.bf16.msra.mxu0 %v4021_v42  ;;  %2377 = vmatpush1.bf16.msra.mxu1 %v4026_v43 }
 0x4ff   :  { %2667 = vmatprep.subr.bf16.mxu0 %v3843_v59  ;;  %2710 = vmatprep.subr.bf16.mxu1 %v3848_v6  ;;  %v1775_v59 = vunpack.c.l.bf16 %v3019_v62  ;;  %v1774_v6 = vunpack.c.h.bf16 %v3018_v34 }
 0x5a1   :  { %v2005_v63 = vpop.f32.mrf.mxu0  ;;  %v2048_v36 = vpop.f32.mrf.mxu1 }
 0x5a2   :  { %v2057_v33 = vadd.f32 %v2005_v63, %v1771_v60  ;;  %v2059_v55 = vadd.f32 %v2048_v36, %v1773_v40 }
 0x5a3   :  { %v2007_v52 = vpop.f32.mrf.mxu0  ;;  %v2050_v37 = vpop.f32.mrf.mxu1 }
 0x5a4   :  { %v2065_v58 = vmul.f32 0.5, %v2057_v33  ;;  %v2058_v39 = vadd.f32 %v2007_v52, %v1772_v50  ;;  %v2060_v45 = vadd.f32 %v2050_v37, %v1774_v6  ;;  %v2067_v50 = vmul.f32 0.5, %v2059_v55 }
 0x5a5   :  { %v2009_v3 = vpop.f32.mrf.mxu0  ;;  %v2052_v4 = vpop.f32.mrf.mxu1 }
 0x5a6   :  { %3398 = vtanh.f32 %v2065_v58  ;;  %v2066_v57 = vmul.f32 0.5, %v2058_v39  ;;  %v2061_v5 = vadd.f32 %v2009_v3, %v1775_v59  ;;  %v2063_v38 = vadd.f32 %v2052_v4, %v1777_v53 }
 0x5a7   :  { %v2011_v2 = vpop.f32.mrf.mxu0  ;;  %v2054_v51 = vpop.f32.mrf.mxu1 }
 0x5a8   :  { %3400 = vtanh.f32 %v2066_v57  ;;  %v2068_v48 = vmul.f32 0.5, %v2061_v5  ;;  %v2062_v61 = vadd.f32 %v2011_v2, %v1776_v54  ;;  %v2064_v44 = vadd.f32 %v2054_v51, %v1778_v49 }
 0x5a9   :  { %v2070_v33 = vmul.f32 0.5, %v2063_v38 }
 0x5aa   :  { %3402 = vtanh.f32 %v2068_v48  ;;  %v2069_v46 = vmul.f32 0.5, %v2062_v61 }
 0x5ab   :  { %3404 = vtanh.f32 %v2060_v45 }
 0x5ac   :  { %3406 = vtanh.f32 %v2069_v46 }
 0x5ad   :  { %3408 = vtanh.f32 %v2064_v44 }
 0x5ae   :  { %3410 = vtanh.f32 %v2067_v50 }
 0x5af   :  { %3412 = vtanh.f32 %v2070_v33 }
 0x5b3   :  { %v3399_v60 = vpop.eup %3398 }
 0x5b4   :  { %v2077_v62 = vadd.f32 1.0, %v3399_v60 }
 0x5b5   :  { %v3401_v63 = vpop.eup %3400 }
 0x5b6   :  { %v2083_v59 = vmul.f32 0.5, %v2077_v62  ;;  %v2078_v52 = vadd.f32 1.0, %v3401_v63 }
 0x5b7   :  { %v3403_v6 = vpop.eup %3402 }
 0x5b8   :  { %v3405_v37 = vpop.eup %3404  ;;  %v2084_v58 = vmul.f32 0.5, %v2078_v52  ;;  %v2080_v39 = vadd.f32 1.0, %v3403_v6 }
 0x5b9   :  { %v3407_v54 = vpop.eup %3406  ;;  %v2093_v3 = vmul.f32 %v3405_v37, %v2083_v59 }
 0x5ba   :  { %v2091_v34 = vmul.f32 %v2084_v58, %v4104_v35  ;;  %v2086_v36 = vmul.f32 0.5, %v2080_v39  ;;  %v2081_v57 = vadd.f32 1.0, %v3407_v54  ;;  %v3409_v45 = vpop.eup %3408 }
 0x5bb   :  { %v3411_v61 = vpop.eup %3410 }
 0x5bc   :  { %v4161_v4 = vadd.f32 %v2093_v3, %v2091_v34  ;;  %v2087_v5 = vmul.f32 0.5, %v2081_v57  ;;  %v2094_v2 = vmul.f32 %v3409_v45, %v2086_v36  ;;  %v3413_v49 = vpop.eup %3412  ;;  %v2079_v51 = vadd.f32 1.0, %v3411_v61 }
 0x5bd   :  { %v2082_v35 = vadd.f32 1.0, %v3413_v49 }
 0x5be   :  { %v2092_v47 = vmul.f32 %v2087_v5, %v4108_v0  ;;  %3414 = vtanh.f32 %v4161_v4  ;;  %v2085_v40 = vmul.f32 0.5, %v2079_v51 }
 0x5bf   :  { %v2088_v44 = vmul.f32 0.5, %v2082_v35 }
 0x5c0   :  { %v4165_v48 = vadd.f32 %v2094_v2, %v2092_v47 }
 0x5c2   :  { %3416 = vtanh.f32 %v4165_v48 }
 0x5cb   :  { %v3415_v46 = vpop.eup %3414 }
 0x5cc   :  { %v2099_v55 = vmul.f32 %v3415_v46, %v2085_v40 }
 0x5cf   :  { %v3417_v53 = vpop.eup %3416 }
 0x5d0   :  { %v2100_v38 = vmul.f32 %v3417_v53, %v2088_v44 }
 0x5d2   :  { %v2101_v60 = vpack.c.bf16 %v2100_v38, %v2099_v55 }
 0x5d4   :  { %3197 = vst [vmem:[%s4245_s2 + $0x28] sm:$0xff] %v2101_v60   ;;  %2352 = vmatmul.mubr.bf16.vlgmr.msra.gmra.mxu0 %v2101_v60  ;;  %2395 = vmatmul.mubr.bf16.vlgmr.msra.gmra.mxu1 %v2101_v60 }
 0x5d5   :  { %2668 = vmatpush1.bf16.msra.mxu0 %v3853_v7  ;;  %2711 = vmatpush1.bf16.msra.mxu1 %v3858_v8  ;;  %v3059_v8 = vld [vmem:[%s4244_s0 + $0xd0] sm:$0xff] }
 0x5d6   :  { %2669 = vmatprep.subr.bf16.mxu0 %v3867_v9  ;;  %2712 = vmatprep.subr.bf16.mxu1 %v3872_v10 }
 0x5d7   :  { %2699 = vmatprep.mubr.bf16.mxu0 %v3458_v1  ;;  %2742 = vmatprep.mubr.bf16.mxu1 %v3458_v1  ;;  %v3057_v1 = vld [vmem:[%s4244_s0 + $0xc0] sm:$0xff] }
 0x5d8   :  { %v2119_v7 = vunpack.c.l.bf16 %v3057_v1  ;;  %v2120_v9 = vunpack.c.h.bf16 %v3057_v1 }
 0x5d9   :  { %2670 = vmatpush1.bf16.msra.mxu0 %v3877_v11  ;;  %2713 = vmatpush1.bf16.msra.mxu1 %v3882_v12 }
 0x5da   :  { %2671 = vmatprep.subr.bf16.mxu0 %v3891_v13  ;;  %2714 = vmatprep.subr.bf16.mxu1 %v3896_v14  ;;  %v3058_v13 = vld [vmem:[%s4244_s0 + $0xc8] sm:$0xff]  ;;  %v2123_v14 = vunpack.c.l.bf16 %v3059_v8 }
 0x5dd   :  { %2672 = vmatpush1.bf16.msra.mxu0 %v3901_v15  ;;  %2715 = vmatpush1.bf16.msra.mxu1 %v3906_v16  ;;  %v2122_v16 = vunpack.c.h.bf16 %v3058_v13 }
 0x5de   :  { %2673 = vmatprep.subr.bf16.mxu0 %v3915_v17  ;;  %2716 = vmatprep.subr.bf16.mxu1 %v3920_v18 }
 0x5e1   :  { %2674 = vmatpush1.bf16.msra.mxu0 %v3925_v19  ;;  %2717 = vmatpush1.bf16.msra.mxu1 %v3930_v20  ;;  %v2124_v20 = vunpack.c.h.bf16 %v3059_v8 }
 0x5e2   :  { %2675 = vmatprep.subr.bf16.mxu0 %v3937_v21  ;;  %2718 = vmatprep.subr.bf16.mxu1 %v3942_v22 }
 0x5e5   :  { %2676 = vmatpush1.bf16.msra.mxu0 %v3949_v23  ;;  %2719 = vmatpush1.bf16.msra.mxu1 %v3954_v24 }
 0x5e6   :  { %2677 = vmatprep.subr.bf16.mxu0 %v3961_v25  ;;  %2720 = vmatprep.subr.bf16.mxu1 %v3966_v26  ;;  %v3060_v26 = vld [vmem:[%s4244_s0 + $0xd8] sm:$0xff] }
 0x5e9   :  { %2678 = vmatpush1.bf16.msra.mxu0 %v3973_v27  ;;  %2721 = vmatpush1.bf16.msra.mxu1 %v3978_v28 }
 0x5ea   :  { %2679 = vmatprep.subr.bf16.mxu0 %v3985_v29  ;;  %2722 = vmatprep.subr.bf16.mxu1 %v3990_v30  ;;  %v2126_v30 = vunpack.c.h.bf16 %v3060_v26 }
 0x5ed   :  { %2680 = vmatpush1.bf16.msra.mxu0 %v3997_v31  ;;  %2723 = vmatpush1.bf16.msra.mxu1 %v4002_v32 }
 0x5ee   :  { %2681 = vmatprep.subr.bf16.mxu0 %v4009_v56  ;;  %2724 = vmatprep.subr.bf16.mxu1 %v4014_v41  ;;  %v2121_v56 = vunpack.c.l.bf16 %v3058_v13 }
 0x5f1   :  { %2682 = vmatpush1.bf16.msra.mxu0 %v4021_v42  ;;  %2725 = vmatpush1.bf16.msra.mxu1 %v4026_v43  ;;  %v2125_v42 = vunpack.c.l.bf16 %v3060_v26 }
 0x694   :  { %v2353_v10 = vpop.f32.mrf.mxu0  ;;  %v2396_v11 = vpop.f32.mrf.mxu1 }
 0x695   :  { %v2405_v12 = vadd.f32 %v2353_v10, %v2119_v7  ;;  %v2407_v43 = vadd.f32 %v2396_v11, %v2121_v56 }
 0x696   :  { %v2355_v15 = vpop.f32.mrf.mxu0  ;;  %v2398_v17 = vpop.f32.mrf.mxu1 }
 0x697   :  { %v2413_v18 = vmul.f32 0.5, %v2405_v12  ;;  %v2406_v19 = vadd.f32 %v2355_v15, %v2120_v9  ;;  %v2408_v25 = vadd.f32 %v2398_v17, %v2122_v16  ;;  %v2415_v63 = vmul.f32 0.5, %v2407_v43  ;;  %v3099_v9 = vld [vmem:[%s4244_s0 + $0xf0] sm:$0xff] }
 0x698   :  { %v2357_v21 = vpop.f32.mrf.mxu0  ;;  %v2400_v22 = vpop.f32.mrf.mxu1  ;;  %v2471_v15 = vunpack.c.l.bf16 %v3099_v9 }
 0x699   :  { %3418 = vtanh.f32 %v2413_v18  ;;  %v2414_v23 = vmul.f32 0.5, %v2406_v19  ;;  %v2409_v24 = vadd.f32 %v2357_v21, %v2123_v14  ;;  %v2411_v0 = vadd.f32 %v2400_v22, %v2125_v42  ;;  %v3098_v14 = vld [vmem:[%s4244_s0 + $0xe8] sm:$0xff] }
 0x69a   :  { %v2359_v27 = vpop.f32.mrf.mxu0  ;;  %v2402_v31 = vpop.f32.mrf.mxu1  ;;  %v2470_v17 = vunpack.c.h.bf16 %v3098_v14  ;;  %v2472_v21 = vunpack.c.h.bf16 %v3099_v9 }
 0x69b   :  { %3420 = vtanh.f32 %v2414_v23  ;;  %v2416_v28 = vmul.f32 0.5, %v2409_v24  ;;  %v2410_v29 = vadd.f32 %v2359_v27, %v2124_v20  ;;  %v2412_v41 = vadd.f32 %v2402_v31, %v2126_v30  ;;  %v3100_v27 = vld [vmem:[%s4244_s0 + $0xf8] sm:$0xff] }
 0x69c   :  { %v2418_v59 = vmul.f32 0.5, %v2411_v0  ;;  %v2474_v31 = vunpack.c.h.bf16 %v3100_v27  ;;  %v2473_v43 = vunpack.c.l.bf16 %v3100_v27 }
 0x69d   :  { %3422 = vtanh.f32 %v2416_v28  ;;  %v2417_v32 = vmul.f32 0.5, %v2410_v29 }
 0x69e   :  { %3424 = vtanh.f32 %v2408_v25 }
 0x69f   :  { %3426 = vtanh.f32 %v2417_v32 }
 0x6a0   :  { %3428 = vtanh.f32 %v2412_v41  ;;  %v2469_v41 = vunpack.c.l.bf16 %v3098_v14 }
 0x6a1   :  { %3430 = vtanh.f32 %v2415_v63 }
 0x6a2   :  { %3432 = vtanh.f32 %v2418_v59 }
 0x6a6   :  { %v3419_v62 = vpop.eup %3418 }
 0x6a7   :  { %v2425_v50 = vadd.f32 1.0, %v3419_v62 }
 0x6a8   :  { %v3421_v33 = vpop.eup %3420 }
 0x6a9   :  { %v2431_v52 = vmul.f32 0.5, %v2425_v50  ;;  %v2426_v6 = vadd.f32 1.0, %v3421_v33 }
 0x6aa   :  { %v3423_v37 = vpop.eup %3422 }
 0x6ab   :  { %v3425_v58 = vpop.eup %3424  ;;  %v2432_v39 = vmul.f32 0.5, %v2426_v6  ;;  %v2428_v54 = vadd.f32 1.0, %v3423_v37 }
 0x6ac   :  { %v3427_v34 = vpop.eup %3426  ;;  %v2441_v36 = vmul.f32 %v3425_v58, %v2431_v52 }
 0x6ad   :  { %v2439_v3 = vmul.f32 %v2432_v39, %v4161_v4  ;;  %v2434_v57 = vmul.f32 0.5, %v2428_v54  ;;  %v2429_v5 = vadd.f32 1.0, %v3427_v34  ;;  %v3429_v2 = vpop.eup %3428 }
 0x6ae   :  { %v3431_v35 = vpop.eup %3430 }
 0x6af   :  { %v4216_v45 = vadd.f32 %v2441_v36, %v2439_v3  ;;  %v2435_v47 = vmul.f32 0.5, %v2429_v5  ;;  %v2442_v49 = vmul.f32 %v3429_v2, %v2434_v57  ;;  %v3433_v46 = vpop.eup %3432  ;;  %v2427_v40 = vadd.f32 1.0, %v3431_v35 }
 0x6b0   :  { %v2430_v4 = vadd.f32 1.0, %v3433_v46 }
 0x6b1   :  { %v2440_v61 = vmul.f32 %v2435_v47, %v4165_v48  ;;  %3434 = vtanh.f32 %v4216_v45  ;;  %v2433_v53 = vmul.f32 0.5, %v2427_v40  ;;  %v3097_v48 = vld [vmem:[%s4244_s0 + $0xe0] sm:$0xff] }
 0x6b2   :  { %v2436_v55 = vmul.f32 0.5, %v2430_v4  ;;  %v2467_v8 = vunpack.c.l.bf16 %v3097_v48  ;;  %v2468_v10 = vunpack.c.h.bf16 %v3097_v48 }
 0x6b3   :  { %v4220_v51 = vadd.f32 %v2442_v49, %v2440_v61 }
 0x6b5   :  { %3436 = vtanh.f32 %v4220_v51 }
 0x6be   :  { %v3435_v44 = vpop.eup %3434 }
 0x6bf   :  { %v2447_v60 = vmul.f32 %v3435_v44, %v2433_v53 }
 0x6c2   :  { %v3437_v38 = vpop.eup %3436 }
 0x6c3   :  { %v2448_v1 = vmul.f32 %v3437_v38, %v2436_v55 }
 0x6c5   :  { %v2449_v7 = vpack.c.bf16 %v2448_v1, %v2447_v60 }
 0x6c7   :  { %3198 = vst [vmem:[%s4245_s2 + $0x30] sm:$0xff] %v2449_v7   ;;  %2700 = vmatmul.mubr.bf16.vlgmr.msra.gmra.mxu0 %v2449_v7  ;;  %2743 = vmatmul.mubr.bf16.vlgmr.msra.gmra.mxu1 %v2449_v7 }
 0x787   :  { %v2701_v11 = vpop.f32.mrf.mxu0  ;;  %v2744_v12 = vpop.f32.mrf.mxu1 }
 0x788   :  { %v2753_v13 = vadd.f32 %v2701_v11, %v2467_v8  ;;  %v2755_v0 = vadd.f32 %v2744_v12, %v2469_v41 }
 0x789   :  { %v2703_v16 = vpop.f32.mrf.mxu0  ;;  %v2746_v18 = vpop.f32.mrf.mxu1 }
 0x78a   :  { %v2761_v19 = vmul.f32 0.5, %v2753_v13  ;;  %v2754_v20 = vadd.f32 %v2703_v16, %v2468_v10  ;;  %v2756_v26 = vadd.f32 %v2746_v18, %v2470_v17  ;;  %v2763_v33 = vmul.f32 0.5, %v2755_v0 }
 0x78b   :  { %v2705_v22 = vpop.f32.mrf.mxu0  ;;  %v2748_v23 = vpop.f32.mrf.mxu1 }
 0x78c   :  { %3438 = vtanh.f32 %v2761_v19  ;;  %v2762_v24 = vmul.f32 0.5, %v2754_v20  ;;  %v2757_v25 = vadd.f32 %v2705_v22, %v2471_v15  ;;  %v2759_v62 = vadd.f32 %v2748_v23, %v2473_v43 }
 0x78d   :  { %v2707_v28 = vpop.f32.mrf.mxu0  ;;  %v2750_v32 = vpop.f32.mrf.mxu1 }
 0x78e   :  { %3440 = vtanh.f32 %v2762_v24  ;;  %v2764_v29 = vmul.f32 0.5, %v2757_v25  ;;  %v2758_v30 = vadd.f32 %v2707_v28, %v2472_v21  ;;  %v2760_v42 = vadd.f32 %v2750_v32, %v2474_v31 }
 0x78f   :  { %v2766_v52 = vmul.f32 0.5, %v2759_v62 }
 0x790   :  { %3442 = vtanh.f32 %v2764_v29  ;;  %v2765_v56 = vmul.f32 0.5, %v2758_v30 }
 0x791   :  { %3444 = vtanh.f32 %v2756_v26 }
 0x792   :  { %3446 = vtanh.f32 %v2765_v56 }
 0x793   :  { %3448 = vtanh.f32 %v2760_v42 }
 0x794   :  { %3450 = vtanh.f32 %v2763_v33 }
 0x795   :  { %3452 = vtanh.f32 %v2766_v52 }
 0x799   :  { %v3439_v50 = vpop.eup %3438 }
 0x79a   :  { %v2773_v63 = vadd.f32 1.0, %v3439_v50 }
 0x79b   :  { %v3441_v59 = vpop.eup %3440 }
 0x79c   :  { %v2779_v6 = vmul.f32 0.5, %v2773_v63  ;;  %v2774_v37 = vadd.f32 1.0, %v3441_v59 }
 0x79d   :  { %v3443_v58 = vpop.eup %3442 }
 0x79e   :  { %v3445_v39 = vpop.eup %3444  ;;  %v2780_v54 = vmul.f32 0.5, %v2774_v37  ;;  %v2776_v34 = vadd.f32 1.0, %v3443_v58 }
 0x79f   :  { %v3447_v3 = vpop.eup %3446  ;;  %v2789_v57 = vmul.f32 %v3445_v39, %v2779_v6 }
 0x7a0   :  { %v2787_v36 = vmul.f32 %v2780_v54, %v4216_v45  ;;  %v2782_v5 = vmul.f32 0.5, %v2776_v34  ;;  %v2777_v47 = vadd.f32 1.0, %v3447_v3  ;;  %v3449_v49 = vpop.eup %3448 }
 0x7a1   :  { %v3451_v4 = vpop.eup %3450 }
 0x7a2   :  { %v2791_v2 = vadd.f32 %v2789_v57, %v2787_v36  ;;  %v2783_v61 = vmul.f32 0.5, %v2777_v47  ;;  %v2790_v46 = vmul.f32 %v3449_v49, %v2782_v5  ;;  %v3453_v44 = vpop.eup %3452  ;;  %v2775_v53 = vadd.f32 1.0, %v3451_v4 }
 0x7a3   :  { %v2778_v55 = vadd.f32 1.0, %v3453_v44 }
 0x7a4   :  { %v2788_v35 = vmul.f32 %v2783_v61, %v4220_v51  ;;  %3454 = vtanh.f32 %v2791_v2  ;;  %v2781_v60 = vmul.f32 0.5, %v2775_v53 }
 0x7a5   :  { %v2784_v1 = vmul.f32 0.5, %v2778_v55 }
 0x7a6   :  { %v2792_v40 = vadd.f32 %v2790_v46, %v2788_v35 }
 0x7a8   :  { %3456 = vtanh.f32 %v2792_v40 }
 0x7b1   :  { %v3455_v38 = vpop.eup %3454 }
 0x7b2   :  { %v2795_v7 = vmul.f32 %v3455_v38, %v2781_v60 }
 0x7b5   :  { %v3457_v45 = vpop.eup %3456 }
 0x7b6   :  { %v2796_v48 = vmul.f32 %v3457_v45, %v2784_v1 }
 0x7b8   :  { %v3191_v8 = vpack.c.bf16 %v2796_v48, %v2795_v7 }
 0x7ba   :  { %3199 = vst [vmem:[%s4245_s2 + $0x38] sm:$0xff] %v3191_v8  }

</bundles_post_ra>
